<compile_context>
chip_gen: v5e
topology: v5e:2x2
jax: 0.10.0
libtpu: 0.0.40
codegen_flags: <defaults>
</compile_context>

<pallas_src>
import jax
import jax.numpy as jnp
from jax.experimental import pallas as pl
from jax.experimental.pallas import tpu as pltpu


def _round_up(v, m):
    return ((v + m - 1) // m) * m


def _make_codebook_kernel(d, emit_dist, exact_ties):
    """d = true feature dim; the codebook ref carries d+1 columns (last column
    is an iota used by the fast path to pull the argmax index off the MXU)."""

    def kernel(x_ref, e_ref, quant_ref, ind_ref, *dist_refs):
        x = x_ref[...]                      # (tn, d)     compute dtype
        e_ext = e_ref[...]                  # (c, d + 1)  compute dtype
        e = e_ext[:, :d]                    # (c, d) lane-prefix view (free)
        c = e_ext.shape[0]

        # Lane-dense logits: dist_t[c, n] = <e[c], x[n]>.  Codebook axis on the
        # sublanes so max/argmax are sublane reductions and the index output
        # (exact path) stays a lane-dense row.
        dist_t = jax.lax.dot_general(
            e, x, (((1,), (1,)), ((), ())),
            preferred_element_type=jnp.float32)             # (c, tn) f32

        m = jnp.max(dist_t, axis=0, keepdims=True)          # (1, tn)

        if exact_ties:
            # Exact first-occurrence argmax (== torch.argmax + F.one_hot).
            iota_f = jax.lax.broadcasted_iota(
                jnp.int32, dist_t.shape, 0).astype(jnp.float32)
            ind_f = jnp.min(jnp.where(dist_t == m, iota_f, float(c)),
                            axis=0, keepdims=True)          # (1, tn)
            ind_f = jnp.minimum(ind_f, float(c - 1))         # NaN insurance
            ind_ref[...] = ind_f.astype(jnp.int32)           # lane-dense (1, tn)
            onehot_t = (iota_f == ind_f).astype(e.dtype)     # (c, tn)
            quant = jax.lax.dot_general(
                onehot_t, e, (((0,), (0,)), ((), ())),
                preferred_element_type=jnp.float32)          # (tn, d)
            quant_ref[...] = quant.astype(quant_ref.dtype)
        else:
            # Fast path: one-hot straight from the max mask (2 VPU passes over
            # (c, tn) instead of 6); the argmax index rides along as the extra
            # iota column of e_ext in the same quantize matmul (d+1 is far
            # below the MXU output width -> no extra MXU streaming).  Exact
            # float ties (measure-zero) would sum rows / clamp the index.
            onehot_t = (dist_t == m).astype(e_ext.dtype)     # (c, tn)
            qext = jax.lax.dot_general(
                onehot_t, e_ext, (((0,), (0,)), ((), ())),
                preferred_element_type=jnp.float32)          # (tn, d + 1)
            quant_ref[...] = qext[:, :d].astype(quant_ref.dtype)
            idx = jnp.clip(qext[:, d:], 0.0, float(c - 1))   # (tn, 1)
            ind_ref[...] = idx.astype(jnp.int32)

        if emit_dist:
            # Re-computed in (tn, c) layout so the dominant (HBM-bound) dist
            # write is lane-dense; the duplicate MXU pass stays hidden behind
            # that write (review: revisit only if it becomes MXU-push-bound).
            dist_nc = jax.lax.dot_general(
                x, e, (((1,), (1,)), ((), ())),
                preferred_element_type=jnp.float32)          # (tn, c)
            dist_refs[0][...] = dist_nc.astype(dist_refs[0].dtype)

    return kernel


def cosine_sim_codebook_forward(
    x,
    embed,
    *,
    tile_n=None,
    compute_dtype=jnp.float32,
    return_dist=True,
    dist_dtype=None,
    exact_ties=False,
):
    """Eval-mode forward of CosineSimCodebook.

    x:     (b, n, d) float  (the parent module l2-normalizes before calling)
    embed: (1, c, d) float  (rows l2-normalized in __init__)
    Returns (quantize (b,n,d) f32, embed_ind (b,n) i32,
             dist (1,b,n,c) or None, num_reactivate=0).
    """
    b, n, d = x.shape
    h, c, d2 = embed.shape
    assert h == 1 and d2 == d  # TODO(synk): num_codebooks > 1

    compute_dtype = jnp.dtype(compute_dtype)
    dist_dtype = jnp.dtype(compute_dtype if dist_dtype is None else dist_dtype)

    # Folded-index fast path needs the iota column exactly representable in
    # compute_dtype (c <= 256 for bf16, <= 2^24 for f32); otherwise fall back.
    if not exact_ties:
        if (c - 1) > (1 << (jnp.finfo(compute_dtype).nmant + 1)):
            exact_ties = True

    N = b * n

    # Single cast straight to the compute dtype (no extra full-HBM passes).
    flat_in = x.reshape(N, d)
    if flat_in.dtype != compute_dtype:
        flat_in = flat_in.astype(compute_dtype)

    # Codebook + iota column (tiny (c, d+1) tensor -> negligible wrapper cost).
    iota_col = jnp.arange(c, dtype=jnp.float32).reshape(c, 1)
    e_in = jnp.concatenate([embed[0].astype(jnp.float32), iota_col], axis=-1)
    if e_in.dtype != compute_dtype:
        e_in = e_in.astype(compute_dtype)
    dp = d + 1

    # ---- tile selection ----------------------------------------------------
    if tile_n is None:
        tile_n = 2048 if return_dist else 1024
    tile_n = max(128, _round_up(int(tile_n), 128))
    # >= 2 grid steps so ("parallel",) can split across v7x's two TensorCores.
    tile_n = min(tile_n, max(128, _round_up(pl.cdiv(N, 2), 128)))

    cbytes = compute_dtype.itemsize
    distbytes = dist_dtype.itemsize if return_dist else 0

    def vmem_bytes(tn):
        byt = 2 * tn * d * cbytes                # x blocks (double buffered)
        byt += 2 * c * dp * cbytes               # codebook (<= 2 buffers)
        byt += 2 * tn * d * 4                    # quantize out blocks
        byt += 2 * tn * 4                        # index out blocks
        byt += 2 * tn * c * distbytes            # dist out blocks
        # live (c, tn) intermediates: dist_t f32 + one-hot (+ iota/masked f32
        # on the exact path) (+ dist_nc f32 before the cast)
        per = 4 + cbytes + (8 if exact_ties else 0) + (4 if return_dist else 0)
        byt += tn * c * per
        byt += tn * dp * 4                       # quant / qext accumulator
        return byt

    # VMEM cap from the actual chip when available (v7x has only 64 MiB/TC).
    try:
        vmem_cap = int(0.75 * pltpu.get_tpu_info().vmem_capacity_bytes)
    except Exception:
        vmem_cap = 48 << 20

    while tile_n > 128 and vmem_bytes(tile_n) + (4 << 20) > vmem_cap:
        tile_n = max(128, _round_up(tile_n // 2, 128))

    grid = (pl.cdiv(N, tile_n),)  # partial last block handled by Pallas clipping
    vmem_limit = int(min(max(vmem_bytes(tile_n) + (4 << 20), 8 << 20), vmem_cap))

    out_shapes = [jax.ShapeDtypeStruct((N, d), jnp.float32)]
    out_specs = [pl.BlockSpec((tile_n, d), lambda i: (i, 0))]
    if exact_ties:
        out_shapes.append(jax.ShapeDtypeStruct((1, N), jnp.int32))
        out_specs.append(pl.BlockSpec((1, tile_n), lambda i: (0, i)))
    else:
        out_shapes.append(jax.ShapeDtypeStruct((N, 1), jnp.int32))
        out_specs.append(pl.BlockSpec((tile_n, 1), lambda i: (i, 0)))
    if return_dist:
        out_shapes.append(jax.ShapeDtypeStruct((N, c), dist_dtype))
        out_specs.append(pl.BlockSpec((tile_n, c), lambda i: (i, 0)))

    flops = (4 + (2 if return_dist else 0)) * N * c * d
    bytes_accessed = (N * d * cbytes + c * dp * cbytes + N * d * 4 + N * 4
                      + N * c * distbytes)
    cost = pl.CostEstimate(flops=flops, transcendentals=0,
                           bytes_accessed=bytes_accessed)

    kernel = _make_codebook_kernel(d, return_dist, exact_ties)

    def run(codebook_pipeline_mode):
        cb_kwargs = {}
        if codebook_pipeline_mode is not None:
            cb_kwargs = dict(pipeline_mode=codebook_pipeline_mode)
        in_specs = [
            pl.BlockSpec((tile_n, d), lambda i: (i, 0)),            # x tile
            pl.BlockSpec((c, dp), lambda i: (0, 0), **cb_kwargs),   # codebook
        ]
        return pl.pallas_call(
            kernel,
            grid_spec=pltpu.PrefetchScalarGridSpec(
                num_scalar_prefetch=0,
                grid=grid,
                in_specs=in_specs,
                out_specs=out_specs,
            ),
            out_shape=tuple(out_shapes),
            compiler_params=pltpu.CompilerParams(
                dimension_semantics=("parallel",),
                vmem_limit_bytes=vmem_limit,
            ),
            cost_estimate=cost,
        )(flat_in, e_in)

    # Single-buffer the grid-invariant codebook block (saves its second VMEM
    # buffer); fall back to the default pipelining if this build rejects it.
    buffered = getattr(pl, "Buffered", None)
    outs = None
    if buffered is not None:
        try:
            outs = run(buffered(1))
        except Exception:
            outs = None
    if outs is None:
        outs = run(None)

    quantize = outs[0].reshape(b, n, d)          # metadata-only reshapes
    embed_ind = outs[1].reshape(b, n)
    dist_out = outs[2].reshape(1, b, n, c) if return_dist else None
    num_reactivate = 0
    return quantize, embed_ind, dist_out, num_reactivate


def _l2norm(t, axis=-1, eps=1e-12):
    return t / jnp.maximum(jnp.linalg.norm(t, axis=axis, keepdims=True), eps)


def init_codebook(key, num_codebooks, codebook_size, dim):
    # mimics l2norm(uniform_init(...)) from __init__ (kaiming-uniform-ish).
    bound = (3.0 / dim) ** 0.5
    embed = jax.random.uniform(
        key, (num_codebooks, codebook_size, dim),
        minval=-bound, maxval=bound, dtype=jnp.float32)
    return _l2norm(embed)


if __name__ == "__main__":
    key = jax.random.PRNGKey(0)
    k_x, k_e = jax.random.split(key)

    b, n, dim, codebook_size = 2, 160, 32, 256
    x = _l2norm(jax.random.normal(k_x, (b, n, dim), dtype=jnp.float32))
    embed = init_codebook(k_e, 1, codebook_size, dim)

    # --- exact path: f32, dist returned, small tile -> multi-step grid with a
    # partial last block (N=320, tile=128).
    quantize, embed_ind, dist, num_reactivate = cosine_sim_codebook_forward(
        x, embed, tile_n=128, exact_ties=True)
    jax.block_until_ready((quantize, embed_ind, dist))

    flatten = x.reshape(b * n, dim)
    dist_ref = jnp.matmul(flatten, embed[0].T,
                          precision=jax.lax.Precision.HIGHEST)
    ind_ref = jnp.argmax(dist_ref, axis=-1).astype(jnp.int32)

    assert quantize.shape == (b, n, dim)
    assert embed_ind.shape == (b, n) and embed_ind.dtype == jnp.int32
    assert dist.shape == (1, b, n, codebook_size)
    assert num_reactivate == 0
    assert jnp.allclose(dist.reshape(-1, codebook_size), dist_ref, atol=1e-4)

    ind_flat = embed_ind.reshape(-1)
    rows = jnp.arange(b * n)
    sel_sim = dist_ref[rows, ind_flat]
    assert bool(jnp.all(sel_sim >= dist_ref.max(axis=-1) - 1e-3))
    assert float(jnp.mean((ind_flat == ind_ref).astype(jnp.float32))) > 0.99
    assert jnp.allclose(quantize.reshape(-1, dim), embed[0][ind_flat], atol=1e-4)

    # --- fast path (default): bf16 operands, no dist, auto tile (>= 2 steps).
    q2, ind2, dist2, nr2 = cosine_sim_codebook_forward(
        x, embed, return_dist=False, compute_dtype=jnp.bfloat16)
    jax.block_until_ready((q2, ind2))

    assert dist2 is None and nr2 == 0
    assert q2.shape == (b, n, dim) and ind2.shape == (b, n)
    assert ind2.dtype == jnp.int32
    ind2_flat = ind2.reshape(-1)
    assert bool(jnp.all((ind2_flat >= 0) & (ind2_flat < codebook_size)))
    sel2 = dist_ref[rows, ind2_flat]
    assert bool(jnp.all(sel2 >= dist_ref.max(axis=-1) - 5e-2))
    e_bf = embed[0].astype(jnp.bfloat16).astype(jnp.float32)
    assert jnp.allclose(q2.reshape(-1, dim), e_bf[ind2_flat], atol=1e-6)

    print("KERNEL_OK")
</pallas_src>

<mosaic_0001>
module attributes {stable_mosaic.version = 11 : i64} {
  func.func @kernel(%arg0: i32, %arg1: memref<128x32xf32, #tpu.memory_space<vmem>>, %arg2: memref<256x33xf32, #tpu.memory_space<vmem>>, %arg3: memref<128x32xf32, #tpu.memory_space<vmem>>, %arg4: memref<1x128xi32, #tpu.memory_space<vmem>>, %arg5: memref<128x256xf32, #tpu.memory_space<vmem>>) attributes {dimension_semantics = [#tpu.dimension_semantics<parallel>], iteration_bounds = array<i64: 3>, scalar_prefetch = 0 : i64, scratch_operands = 0 : i64, tpu.core_type = #tpu.core_type<tc>, window_params = [{transform_indices = @transform_0, window_bounds = array<i64: 128, 32>}, {pipeline_mode = #tpu.pipeline_mode<synchronous>, transform_indices = @transform_1, window_bounds = array<i64: 256, 33>}, {transform_indices = @transform_2, window_bounds = array<i64: 128, 32>}, {transform_indices = @transform_3, window_bounds = array<i64: 1, 128>}, {transform_indices = @transform_4, window_bounds = array<i64: 128, 256>}]} {
    %c0 = arith.constant 0 : index
    %c0_0 = arith.constant 0 : index
    %0 = vector.load %arg1[%c0, %c0_0] : memref<128x32xf32, #tpu.memory_space<vmem>>, vector<128x32xf32>
    %c0_1 = arith.constant 0 : index
    %c0_2 = arith.constant 0 : index
    %1 = vector.load %arg2[%c0_1, %c0_2] : memref<256x33xf32, #tpu.memory_space<vmem>>, vector<256x33xf32>
    %2 = vector.extract_strided_slice %1 {offsets = [0, 0], sizes = [256, 32], strides = [1, 1]} : vector<256x33xf32> to vector<256x32xf32>
    %cst = arith.constant dense<0.000000e+00> : vector<256x128xf32>
    %3 = tpu.matmul %2, %0, %cst {dimension_numbers = #tpu.dot_dimension_numbers<[1], [1], [0], [0], [0, 0, 1, 0], [], []>} : vector<256x32xf32>, vector<128x32xf32>, vector<256x128xf32> -> vector<256x128xf32>
    %cst_3 = arith.constant dense<0xFF800000> : vector<128xf32>
    %4 = vector.multi_reduction <maximumf>, %3, %cst_3 [0] : vector<256x128xf32> to vector<128xf32>
    %5 = vector.shape_cast %4 : vector<128xf32> to vector<1x128xf32>
    %6 = tpu.iota {dimensions = array<i32: 0>} : vector<256x128xi32>
    %7 = arith.sitofp %6 : vector<256x128xi32> to vector<256x128xf32>
    %8 = vector.broadcast %5 : vector<1x128xf32> to vector<256x128xf32>
    %9 = arith.cmpf oeq, %3, %8 : vector<256x128xf32>
    %cst_4 = arith.constant 2.560000e+02 : f32
    %10 = vector.broadcast %cst_4 : f32 to vector<256x128xf32>
    %11 = arith.select %9, %7, %10 : vector<256x128xi1>, vector<256x128xf32>
    %cst_5 = arith.constant dense<0x7F800000> : vector<128xf32>
    %12 = vector.multi_reduction <minimumf>, %11, %cst_5 [0] : vector<256x128xf32> to vector<128xf32>
    %13 = vector.shape_cast %12 : vector<128xf32> to vector<1x128xf32>
    %cst_6 = arith.constant 2.550000e+02 : f32
    %14 = vector.broadcast %cst_6 : f32 to vector<1x128xf32>
    %15 = arith.minimumf %13, %14 : vector<1x128xf32>
    %16 = arith.fptosi %15 : vector<1x128xf32> to vector<1x128xi32>
    %c0_7 = arith.constant 0 : index
    %c0_8 = arith.constant 0 : index
    %17 = vector.load %arg4[%c0_7, %c0_8] : memref<1x128xi32, #tpu.memory_space<vmem>>, vector<1x128xi32>
    tpu.vector_store %arg4[%c0_7, %c0_8], %16 {strides = array<i32>} : memref<1x128xi32, #tpu.memory_space<vmem>>, vector<1x128xi32>,
    %18 = vector.broadcast %15 : vector<1x128xf32> to vector<256x128xf32>
    %19 = arith.cmpf oeq, %7, %18 : vector<256x128xf32>
    %20 = arith.extui %19 : vector<256x128xi1> to vector<256x128xi32>
    %21 = arith.sitofp %20 : vector<256x128xi32> to vector<256x128xf32>
    %cst_9 = arith.constant dense<0.000000e+00> : vector<128x32xf32>
    %22 = tpu.matmul %21, %2, %cst_9 {dimension_numbers = #tpu.dot_dimension_numbers<[0], [0], [1], [1], [0, 1, 1, 1], [], []>} : vector<256x128xf32>, vector<256x32xf32>, vector<128x32xf32> -> vector<128x32xf32>
    %c0_10 = arith.constant 0 : index
    %c0_11 = arith.constant 0 : index
    %23 = vector.load %arg3[%c0_10, %c0_11] : memref<128x32xf32, #tpu.memory_space<vmem>>, vector<128x32xf32>
    tpu.vector_store %arg3[%c0_10, %c0_11], %22 {strides = array<i32>} : memref<128x32xf32, #tpu.memory_space<vmem>>, vector<128x32xf32>,
    %cst_12 = arith.constant dense<0.000000e+00> : vector<128x256xf32>
    %24 = tpu.matmul %0, %2, %cst_12 {dimension_numbers = #tpu.dot_dimension_numbers<[1], [1], [0], [0], [0, 0, 1, 0], [], []>} : vector<128x32xf32>, vector<256x32xf32>, vector<128x256xf32> -> vector<128x256xf32>
    %c0_13 = arith.constant 0 : index
    %c0_14 = arith.constant 0 : index
    %25 = vector.load %arg5[%c0_13, %c0_14] : memref<128x256xf32, #tpu.memory_space<vmem>>, vector<128x256xf32>
    tpu.vector_store %arg5[%c0_13, %c0_14], %24 {strides = array<i32>} : memref<128x256xf32, #tpu.memory_space<vmem>>, vector<128x256xf32>,
    return
  }
  func.func @transform_0(%arg0: i32) -> (i32, i32) {
    %c0_i32 = arith.constant 0 : i32
    %c0_i32_0 = arith.constant 0 : i32
    return %arg0, %c0_i32 : i32, i32
  }
  func.func @transform_1(%arg0: i32) -> (i32, i32) {
    %c0_i32 = arith.constant 0 : i32
    %c0_i32_0 = arith.constant 0 : i32
    %c0_i32_1 = arith.constant 0 : i32
    return %c0_i32, %c0_i32_0 : i32, i32
  }
  func.func @transform_2(%arg0: i32) -> (i32, i32) {
    %c0_i32 = arith.constant 0 : i32
    %c0_i32_0 = arith.constant 0 : i32
    return %arg0, %c0_i32 : i32, i32
  }
  func.func @transform_3(%arg0: i32) -> (i32, i32) {
    %c0_i32 = arith.constant 0 : i32
    %c0_i32_0 = arith.constant 0 : i32
    return %c0_i32, %arg0 : i32, i32
  }
  func.func @transform_4(%arg0: i32) -> (i32, i32) {
    %c0_i32 = arith.constant 0 : i32
    %c0_i32_0 = arith.constant 0 : i32
    return %arg0, %c0_i32 : i32, i32
  }
}

module attributes {stable_mosaic.version = 11 : i64} {
  func.func @kernel(%arg0: i32, %arg1: memref<128x32xf32, #tpu.memory_space<vmem>>, %arg2: memref<256x33xf32, #tpu.memory_space<vmem>>, %arg3: memref<128x32xf32, #tpu.memory_space<vmem>>, %arg4: memref<1x128xi32, #tpu.memory_space<vmem>>, %arg5: memref<128x256xf32, #tpu.memory_space<vmem>>) attributes {dimension_semantics = [#tpu.dimension_semantics<parallel>], iteration_bounds = array<i64: 3>, scalar_prefetch = 0 : i64, scratch_operands = 0 : i64, tpu.core_type = #tpu.core_type<tc>, window_params = [{transform_indices = @transform_0, window_bounds = array<i64: 128, 32>}, {pipeline_mode = #tpu.pipeline_mode<synchronous>, transform_indices = @transform_1, window_bounds = array<i64: 256, 33>}, {transform_indices = @transform_2, window_bounds = array<i64: 128, 32>}, {transform_indices = @transform_3, window_bounds = array<i64: 1, 128>}, {transform_indices = @transform_4, window_bounds = array<i64: 128, 256>}]} {
    %c0 = arith.constant 0 : index
    %c0_0 = arith.constant 0 : index
    %0 = vector.load %arg1[%c0, %c0_0] : memref<128x32xf32, #tpu.memory_space<vmem>>, vector<128x32xf32>
    %c0_1 = arith.constant 0 : index
    %c0_2 = arith.constant 0 : index
    %1 = vector.load %arg2[%c0_1, %c0_2] : memref<256x33xf32, #tpu.memory_space<vmem>>, vector<256x33xf32>
    %2 = vector.extract_strided_slice %1 {offsets = [0, 0], sizes = [256, 32], strides = [1, 1]} : vector<256x33xf32> to vector<256x32xf32>
    %cst = arith.constant dense<0.000000e+00> : vector<256x128xf32>
    %3 = tpu.matmul %2, %0, %cst {dimension_numbers = #tpu.dot_dimension_numbers<[1], [1], [0], [0], [0, 0, 1, 0], [], []>} : vector<256x32xf32>, vector<128x32xf32>, vector<256x128xf32> -> vector<256x128xf32>
    %cst_3 = arith.constant dense<0xFF800000> : vector<128xf32>
    %4 = vector.multi_reduction <maximumf>, %3, %cst_3 [0] : vector<256x128xf32> to vector<128xf32>
    %5 = vector.shape_cast %4 : vector<128xf32> to vector<1x128xf32>
    %6 = tpu.iota {dimensions = array<i32: 0>} : vector<256x128xi32>
    %7 = arith.sitofp %6 : vector<256x128xi32> to vector<256x128xf32>
    %8 = vector.broadcast %5 : vector<1x128xf32> to vector<256x128xf32>
    %9 = arith.cmpf oeq, %3, %8 : vector<256x128xf32>
    %cst_4 = arith.constant 2.560000e+02 : f32
    %10 = vector.broadcast %cst_4 : f32 to vector<256x128xf32>
    %11 = arith.select %9, %7, %10 : vector<256x128xi1>, vector<256x128xf32>
    %cst_5 = arith.constant dense<0x7F800000> : vector<128xf32>
    %12 = vector.multi_reduction <minimumf>, %11, %cst_5 [0] : vector<256x128xf32> to vector<128xf32>
    %13 = vector.shape_cast %12 : vector<128xf32> to vector<1x128xf32>
    %cst_6 = arith.constant 2.550000e+02 : f32
    %14 = vector.broadcast %cst_6 : f32 to vector<1x128xf32>
    %15 = arith.minimumf %13, %14 : vector<1x128xf32>
    %16 = arith.fptosi %15 : vector<1x128xf32> to vector<1x128xi32>
    %c0_7 = arith.constant 0 : index
    %c0_8 = arith.constant 0 : index
    %17 = vector.load %arg4[%c0_7, %c0_8] : memref<1x128xi32, #tpu.memory_space<vmem>>, vector<1x128xi32>
    tpu.vector_store %arg4[%c0_7, %c0_8], %16 {strides = array<i32>} : memref<1x128xi32, #tpu.memory_space<vmem>>, vector<1x128xi32>,
    %18 = vector.broadcast %15 : vector<1x128xf32> to vector<256x128xf32>
    %19 = arith.cmpf oeq, %7, %18 : vector<256x128xf32>
    %20 = arith.extui %19 : vector<256x128xi1> to vector<256x128xi32>
    %21 = arith.sitofp %20 : vector<256x128xi32> to vector<256x128xf32>
    %cst_9 = arith.constant dense<0.000000e+00> : vector<128x32xf32>
    %22 = tpu.matmul %21, %2, %cst_9 {dimension_numbers = #tpu.dot_dimension_numbers<[0], [0], [1], [1], [0, 1, 1, 1], [], []>} : vector<256x128xf32>, vector<256x32xf32>, vector<128x32xf32> -> vector<128x32xf32>
    %c0_10 = arith.constant 0 : index
    %c0_11 = arith.constant 0 : index
    %23 = vector.load %arg3[%c0_10, %c0_11] : memref<128x32xf32, #tpu.memory_space<vmem>>, vector<128x32xf32>
    tpu.vector_store %arg3[%c0_10, %c0_11], %22 {strides = array<i32>} : memref<128x32xf32, #tpu.memory_space<vmem>>, vector<128x32xf32>,
    %cst_12 = arith.constant dense<0.000000e+00> : vector<128x256xf32>
    %24 = tpu.matmul %0, %2, %cst_12 {dimension_numbers = #tpu.dot_dimension_numbers<[1], [1], [0], [0], [0, 0, 1, 0], [], []>} : vector<128x32xf32>, vector<256x32xf32>, vector<128x256xf32> -> vector<128x256xf32>
    %c0_13 = arith.constant 0 : index
    %c0_14 = arith.constant 0 : index
    %25 = vector.load %arg5[%c0_13, %c0_14] : memref<128x256xf32, #tpu.memory_space<vmem>>, vector<128x256xf32>
    tpu.vector_store %arg5[%c0_13, %c0_14], %24 {strides = array<i32>} : memref<128x256xf32, #tpu.memory_space<vmem>>, vector<128x256xf32>,
    return
  }
  func.func @transform_0(%arg0: i32) -> (i32, i32) {
    %c0_i32 = arith.constant 0 : i32
    %c0_i32_0 = arith.constant 0 : i32
    return %arg0, %c0_i32 : i32, i32
  }
  func.func @transform_1(%arg0: i32) -> (i32, i32) {
    %c0_i32 = arith.constant 0 : i32
    %c0_i32_0 = arith.constant 0 : i32
    %c0_i32_1 = arith.constant 0 : i32
    return %c0_i32, %c0_i32_0 : i32, i32
  }
  func.func @transform_2(%arg0: i32) -> (i32, i32) {
    %c0_i32 = arith.constant 0 : i32
    %c0_i32_0 = arith.constant 0 : i32
    return %arg0, %c0_i32 : i32, i32
  }
  func.func @transform_3(%arg0: i32) -> (i32, i32) {
    %c0_i32 = arith.constant 0 : i32
    %c0_i32_0 = arith.constant 0 : i32
    return %c0_i32, %arg0 : i32, i32
  }
  func.func @transform_4(%arg0: i32) -> (i32, i32) {
    %c0_i32 = arith.constant 0 : i32
    %c0_i32_0 = arith.constant 0 : i32
    return %arg0, %c0_i32 : i32, i32
  }
}

</mosaic_0001>

<bundles_post_ra>
// kernel: tpu_custom_call.1
= control target key start
LH: loop header
LB: loop body
LE: loop exit
PB: predicated region body
PF: predicated region fallthrough
CT: control target
= control target key end

     0   :  { %s3437_s0 = inlined_call_operand.vmem [shape: f32[320,32], index: 0, kind: input, shape index: {}]   ;;  %s3438_s1 = inlined_call_operand.vmem [shape: f32[256,33], index: 1, kind: input, shape index: {}]   ;;  %s3439_s2 = inlined_call_operand.vmem [shape: f32[320,32], index: 2, kind: output, shape index: {0}]   ;;  %s3440_s3 = inlined_call_operand.hbm [shape: s32[1,320], index: 3, kind: output, shape index: {1}]   ;;  %s3441_s4 = inlined_call_operand.hbm [shape: f32[320,256], index: 4, kind: output, shape index: {2}]  }
   0x1   :  { %3457 = sst [smem:[#allocation17_spill]] %s3437_s0 }
   0x2   :  { %3458 = sst [smem:[#allocation18_spill]] %s3438_s1 }
   0x3   :  { %10 = vsyncpa [#allocation4], 0 }
   0x4   :  { %12 = vsyncpa [#allocation4 + $0x1], 0 }
   0x5   :  { %13 = vsyncpa [#allocation6], 0 }
   0x6   :  { %15 = vsyncpa [#allocation6 + $0x1], 0  ;;  %s2212_s15 = smov 0   ;;  %s2214_s16 = smov 0  }
   0x7   :  { %s2216_s17 = smov 0   ;;  %s2218_s18 = smov 0  }
   0x8 LB: > { %s2233_s19 = sadd.s32 4294967295, %s2147_s18   ;;  %s1610_s20 = sadd.s32 4294967294, %s2147_s18   ;;  %s2147_s18 = sphi %s2218_s18, %s3558_s18   ;;  %s2143_s17 = sphi %s2216_s17, %s3557_s17   ;;  %s2139_s16 = sphi %s2214_s16, %s3556_s16   ;;  %s2135_s15 = sphi %s2212_s15, %s3555_s15  }
   0x9   : > { %s2237_s21 = sadd.s32 1, %s2147_s18   ;;  %s75_s22 = sadd.s32 1, %s2143_s17 }
   0xa   : > { %s72_s23 = ssub.s32 %s2147_s18, %s2237_s21  ;;  %p85_p0 = scmp.ne.s32.totalorder %s2143_s17, %s2139_s16 }
   0xb   : > { %p73_p1 = scmp.eq.s32.totalorder %s72_s23, 0  ;;  %p86_p2 = scmp.eq.s32.totalorder %s2233_s19, 2 }
   0xc   : > { %p117_p3 = scmp.ne.s32.totalorder %s2139_s16, %s2135_s15  ;;  %p118_p4 = scmp.eq.s32.totalorder %s1610_s20, 2 }
   0xd   : > { %s2248_s24 = scalar_select %p73_p1, %s2143_s17, %s75_s22  }
   0xe   : > { %p2250_p5 = por %p86_p2, %p85_p0  ;;  %p2254_p6 = por %p118_p4, %p117_p3 }
   0xf   : > { %p1613_p7 = scmp.ge.s32.totalorder %s2147_s18, 1  ;;  %p182_p8 = scmp.lt.s32.totalorder %s2147_s18, 4 }
  0x11   : > { %p183_p9 = pnand %p1613_p7, %p182_p8 }
  0x13   : > { %186 = sbr.rel (%p183_p9) target bundleno = 1117 (0x45d), region = 28 }
  0x18   : > { %s2261_s27 = sshll.u32 %s2233_s19, 4  ;;  %vm293_vm0 = vcmask 261120   ;;  %s3461_s0 = sld [smem:[#allocation17_spill]] }
  0x19   : > { %p225_p10 = scmp.lt.s32.totalorder %s2261_s27, 39  ;;  %s3463_s1 = sld [smem:[#allocation18_spill]] }
  0x1a   : > { %s3075_s11 = sand.u32 1, %s2139_s16  }
  0x1b   : > { %s226_s28 = scalar_select %p225_p10, %s2261_s27, 39 }
  0x1c   : > { %s3456_s12 = scalar_lea.vmem [#allocation3], %s3075_s11  ;;  %s1614_s13 = sshll.u32 %s3075_s11, 7 }
  0x1d   : > { %s1617_s29 = sshll.u32 %s226_s28, 3  ;;  %s3160_s14 = scalar_lea.vmem [#allocation2], %s1614_s13  }
  0x1e   : > { %s2268_s6 = scalar_lea.vmem %s3461_s0, %s1617_s29  ;;  %s1242_s28 = ssub.s32 (%p2250_p5), 40, %s2261_s27 }
  0x1f   : > { %v260_v0 = vld [vmem:[%s2268_s6 + $0x78] sm:$0xff]  ;;  %v259_v1 = vld [vmem:[%s2268_s6 + $0x70] sm:$0xff]  ;;  %v258_v2 = vld [vmem:[%s2268_s6 + $0x68] sm:$0xff]  ;;  %s1788_s29 = sshll.u32 (%p2250_p5), %s2233_s19, 7  ;;  %p1243_p11 = scmp.lt.s32.totalorder (%p2250_p5), %s1242_s28, 16 }
  0x20   : > { %1618 = vmatpush.xpose.msk.msra.mxu0 %vm293_vm0, %v260_v0  ;;  %1794 = vmatpush.xpose.msk.msra.mxu2 %vm293_vm0, %v260_v0  ;;  %v257_v3 = vld [vmem:[%s2268_s6 + $0x60] sm:$0xff]  ;;  %v256_v4 = vld [vmem:[%s2268_s6 + $0x58] sm:$0xff]  ;;  %v255_v5 = vld [vmem:[%s2268_s6 + $0x50] sm:$0xff]  ;;  %s3271_s7 = scalar_lea.vmem (%p2250_p5), %s3439_s2, %s1788_s29  }
  0x21   : > { %v254_v6 = vld [vmem:[%s2268_s6 + $0x48] sm:$0xff]  ;;  %v253_v7 = vld [vmem:[%s2268_s6 + $0x40] sm:$0xff]  ;;  %v252_v8 = vld [vmem:[%s2268_s6 + $0x38] sm:$0xff] }
  0x22   : > { %v251_v9 = vld [vmem:[%s2268_s6 + $0x30] sm:$0xff]  ;;  %v250_v10 = vld [vmem:[%s2268_s6 + $0x28] sm:$0xff]  ;;  %v249_v11 = vld [vmem:[%s2268_s6 + $0x20] sm:$0xff] }
  0x23   : > { %v248_v12 = vld [vmem:[%s2268_s6 + $0x18] sm:$0xff]  ;;  %v247_v13 = vld [vmem:[%s2268_s6 + $0x10] sm:$0xff]  ;;  %v246_v14 = vld [vmem:[%s2268_s6 + $0x8] sm:$0xff] }
  0x24   : > { %1619 = vmatpush.xpose.msk.msra.mxu0 %vm293_vm0, %v259_v1  ;;  %1795 = vmatpush.xpose.msk.msra.mxu2 %vm293_vm0, %v259_v1  ;;  %v2316_v15 = vld [vmem:[%s2268_s6] sm:$0xff]  ;;  %v2332_v17 = vld [vmem:[%s3463_s1 + $0x8] sm:$0xff]  ;;  %v2339_v18 = vld [vmem:[%s3463_s1 + $0x10] sm:$0xff] }
  0x25   : > { %3462 = vst [vmem:[#allocation9_spill] sm:$0xff] %v2316_v15  ;;  %v2323_v16 = vld [vmem:[%s3463_s1] sm:$0xff]  ;;  %v2346_v19 = vld [vmem:[%s3463_s1 + $0x18] sm:$0xff]  ;;  %v2360_v21 = vld [vmem:[%s3463_s1 + $0x28] sm:$0xff] }
  0x26   : > { %v2353_v20 = vld [vmem:[%s3463_s1 + $0x20] sm:$0xff]  ;;  %v2367_v22 = vld [vmem:[%s3463_s1 + $0x30] sm:$0xff]  ;;  %v2374_v23 = vld [vmem:[%s3463_s1 + $0x38] sm:$0xff] }
  0x27   : > { %v2379_v24 = vld [vmem:[%s3463_s1 + $0xb8] sm:$0xff]  ;;  %v2388_v25 = vld [vmem:[%s3463_s1 + $0x40] sm:$0xff]  ;;  %v2402_v27 = vld [vmem:[%s3463_s1 + $0x48] sm:$0xff] }
  0x28   : > { %1620 = vmatpush.xpose.msk.msra.mxu0 %vm293_vm0, %v258_v2  ;;  %1796 = vmatpush.xpose.msk.msra.mxu2 %vm293_vm0, %v258_v2  ;;  %v2393_v26 = vld [vmem:[%s3463_s1 + $0xc0] sm:$0xff]  ;;  %v2407_v28 = vld [vmem:[%s3463_s1 + $0xc8] sm:$0xff]  ;;  %v2416_v29 = vld [vmem:[%s3463_s1 + $0x50] sm:$0xff] }
  0x29   : > { %v2421_v30 = vld [vmem:[%s3463_s1 + $0xd0] sm:$0xff]  ;;  %v276_v31 = vld [vmem:[%s3463_s1 + $0x78] sm:$0xff]  ;;  %v274_v33 = vld [vmem:[%s3463_s1 + $0x68] sm:$0xff] }
  0x2a   : > { %917 = vmatpush.msra.mxu1 %v276_v31  ;;  %1810 = vmatpush.msra.mxu3 %v276_v31  ;;  %v275_v32 = vld [vmem:[%s3463_s1 + $0x70] sm:$0xff]  ;;  %v272_v34 = vld [vmem:[%s3463_s1 + $0x58] sm:$0xff]  ;;  %v273_v35 = vld [vmem:[%s3463_s1 + $0x60] sm:$0xff] }
  0x2b   : > { %v2445_v36 = vld [vmem:[%s3463_s1 + $0xd8] sm:$0xff]  ;;  %v289_v37 = vld [vmem:[%s3463_s1 + $0xe0] sm:$0xff]  ;;  %v290_v38 = vld [vmem:[%s3463_s1 + $0xe8] sm:$0xff] }
  0x2c   : > { %1621 = vmatpush.xpose.msk.msra.mxu0 %vm293_vm0, %v257_v3  ;;  %1797 = vmatpush.xpose.msk.msra.mxu2 %vm293_vm0, %v257_v3  ;;  %v291_v39 = vld [vmem:[%s3463_s1 + $0xf0] sm:$0xff]  ;;  %v292_v40 = vld [vmem:[%s3463_s1 + $0xf8] sm:$0xff]  ;;  %v277_v42 = vld [vmem:[%s3463_s1 + $0x80] sm:$0xff] }
  0x2d   : > { %918 = vmatpush.msra.mxu1 %v275_v32  ;;  %1811 = vmatpush.msra.mxu3 %v275_v32  ;;  %v278_v44 = vld [vmem:[%s3463_s1 + $0x88] sm:$0xff]  ;;  %v279_v46 = vld [vmem:[%s3463_s1 + $0x90] sm:$0xff]  ;;  %v281_v49 = vld [vmem:[%s3463_s1 + $0xa0] sm:$0xff] }
  0x2e   : > { %v283_v47 = vld [vmem:[%s3463_s1 + $0xb0] sm:$0xff]  ;;  %v282_v48 = vld [vmem:[%s3463_s1 + $0xa8] sm:$0xff]  ;;  %v280_v50 = vld [vmem:[%s3463_s1 + $0x98] sm:$0xff] }
  0x2f   : > { %919 = vmatpush.msra.mxu1 %v274_v33  ;;  %1812 = vmatpush.msra.mxu3 %v274_v33 }
  0x30   : > { %1622 = vmatpush.xpose.msk.msra.mxu0 %vm293_vm0, %v256_v4  ;;  %1798 = vmatpush.xpose.msk.msra.mxu2 %vm293_vm0, %v256_v4 }
  0x31   : > { %920 = vmatpush.msra.mxu1 %v273_v35  ;;  %1813 = vmatpush.msra.mxu3 %v273_v35 }
  0x33   : > { %921 = vmatpush.msra.mxu1 %v272_v34  ;;  %1814 = vmatpush.msra.mxu3 %v272_v34 }
  0x34   : > { %1623 = vmatpush.xpose.msk.msra.mxu0 %vm293_vm0, %v255_v5  ;;  %1799 = vmatpush.xpose.msk.msra.mxu2 %vm293_vm0, %v255_v5 }
  0x35   : > { %922 = vmatpush.msra.mxu1 %v2416_v29  ;;  %1815 = vmatpush.msra.mxu3 %v2416_v29 }
  0x37   : > { %923 = vmatpush.msra.mxu1 %v2402_v27  ;;  %1816 = vmatpush.msra.mxu3 %v2402_v27 }
  0x38   : > { %1624 = vmatpush.xpose.msk.msra.mxu0 %vm293_vm0, %v254_v6  ;;  %1800 = vmatpush.xpose.msk.msra.mxu2 %vm293_vm0, %v254_v6 }
  0x39   : > { %924 = vmatpush.msra.mxu1 %v2388_v25  ;;  %1817 = vmatpush.msra.mxu3 %v2388_v25 }
  0x3b   : > { %925 = vmatpush.msra.mxu1 %v2374_v23  ;;  %1818 = vmatpush.msra.mxu3 %v2374_v23 }
  0x3c   : > { %1625 = vmatpush.xpose.msk.msra.mxu0 %vm293_vm0, %v253_v7  ;;  %1801 = vmatpush.xpose.msk.msra.mxu2 %vm293_vm0, %v253_v7 }
  0x3d   : > { %926 = vmatpush.msra.mxu1 %v2367_v22  ;;  %1819 = vmatpush.msra.mxu3 %v2367_v22 }
  0x3f   : > { %927 = vmatpush.msra.mxu1 %v2360_v21  ;;  %1820 = vmatpush.msra.mxu3 %v2360_v21 }
  0x40   : > { %1626 = vmatpush.xpose.msk.msra.mxu0 %vm293_vm0, %v252_v8  ;;  %1802 = vmatpush.xpose.msk.msra.mxu2 %vm293_vm0, %v252_v8 }
  0x41   : > { %928 = vmatpush.msra.mxu1 %v2353_v20  ;;  %1821 = vmatpush.msra.mxu3 %v2353_v20 }
  0x43   : > { %929 = vmatpush.msra.mxu1 %v2346_v19  ;;  %1822 = vmatpush.msra.mxu3 %v2346_v19 }
  0x44   : > { %1627 = vmatpush.xpose.msk.msra.mxu0 %vm293_vm0, %v251_v9  ;;  %1803 = vmatpush.xpose.msk.msra.mxu2 %vm293_vm0, %v251_v9 }
  0x45   : > { %930 = vmatpush.msra.mxu1 %v2339_v18  ;;  %1823 = vmatpush.msra.mxu3 %v2339_v18 }
  0x47   : > { %931 = vmatpush.msra.mxu1 %v2332_v17  ;;  %1824 = vmatpush.msra.mxu3 %v2332_v17 }
  0x48   : > { %1628 = vmatpush.xpose.msk.msra.mxu0 %vm293_vm0, %v250_v10  ;;  %1804 = vmatpush.xpose.msk.msra.mxu2 %vm293_vm0, %v250_v10 }
  0x49   : > { %932 = vmatpush.msra.mxu1 %v2323_v16  ;;  %1825 = vmatpush.msra.mxu3 %v2323_v16 }
  0x4b   : > { %1698 = vmatpush.xpose.msk.msrb.mxu3 %vm293_vm0, %v276_v31  ;;  %1730 = vmatpush.xpose.msk.msrb.mxu1 %vm293_vm0, %v292_v40 }
  0x4c   : > { %1629 = vmatpush.xpose.msk.msra.mxu0 %vm293_vm0, %v249_v11  ;;  %1805 = vmatpush.xpose.msk.msra.mxu2 %vm293_vm0, %v249_v11 }
  0x4f   : > { %1699 = vmatpush.xpose.msk.msrb.mxu3 %vm293_vm0, %v275_v32  ;;  %1731 = vmatpush.xpose.msk.msrb.mxu1 %vm293_vm0, %v291_v39 }
  0x50   : > { %1630 = vmatpush.xpose.msk.msra.mxu0 %vm293_vm0, %v248_v12  ;;  %1806 = vmatpush.xpose.msk.msra.mxu2 %vm293_vm0, %v248_v12 }
  0x53   : > { %1700 = vmatpush.xpose.msk.msrb.mxu3 %vm293_vm0, %v274_v33  ;;  %1732 = vmatpush.xpose.msk.msrb.mxu1 %vm293_vm0, %v290_v38 }
  0x54   : > { %1631 = vmatpush.xpose.msk.msra.mxu0 %vm293_vm0, %v247_v13  ;;  %1807 = vmatpush.xpose.msk.msra.mxu2 %vm293_vm0, %v247_v13 }
  0x57   : > { %1701 = vmatpush.xpose.msk.msrb.mxu3 %vm293_vm0, %v273_v35  ;;  %1733 = vmatpush.xpose.msk.msrb.mxu1 %vm293_vm0, %v289_v37 }
  0x58   : > { %1632 = vmatpush.xpose.msk.msra.mxu0 %vm293_vm0, %v246_v14  ;;  %1808 = vmatpush.xpose.msk.msra.mxu2 %vm293_vm0, %v246_v14 }
  0x5b   : > { %1702 = vmatpush.xpose.msk.msrb.mxu3 %vm293_vm0, %v272_v34  ;;  %1734 = vmatpush.xpose.msk.msrb.mxu1 %vm293_vm0, %v2445_v36 }
  0x5c   : > { %1633 = vmatpush.xpose.msk.msra.mxu0 %vm293_vm0, %v2316_v15  ;;  %1809 = vmatpush.xpose.msk.msra.mxu2 %vm293_vm0, %v2316_v15 }
  0x5f   : > { %1634 = vmatmul.msk.f32.vlgmr.msra.gmra.mxu0 %vm293_vm0, %v2323_v16  ;;  %1657 = vmatmul.msk.f32.vlgmr.msra.gmra.mxu2 %vm293_vm0, %v2379_v24 }
  0x60   : > { %982 = vmatpush.msra.mxu2 %v292_v40  ;;  %1703 = vmatpush.xpose.msk.msrb.mxu3 %vm293_vm0, %v2416_v29 }
  0x61   : > { %1735 = vmatpush.xpose.msk.msrb.mxu1 %vm293_vm0, %v2421_v30 }
  0x62   : > { %983 = vmatpush.msra.mxu2 %v291_v39 }
  0x64   : > { %984 = vmatpush.msra.mxu2 %v290_v38  ;;  %1704 = vmatpush.xpose.msk.msrb.mxu3 %vm293_vm0, %v2402_v27 }
  0x65   : > { %1736 = vmatpush.xpose.msk.msrb.mxu1 %vm293_vm0, %v2407_v28 }
  0x66   : > { %985 = vmatpush.msra.mxu2 %v289_v37 }
  0x67   : > { %1635 = vmatmul.msk.f32.gmra.mxu0 %vm293_vm0, %v2332_v17  ;;  %1658 = vmatmul.msk.f32.gmra.mxu2 %vm293_vm0, %v2393_v26 }
  0x68   : > { %986 = vmatpush.msra.mxu2 %v2445_v36  ;;  %1705 = vmatpush.xpose.msk.msrb.mxu3 %vm293_vm0, %v2388_v25 }
  0x69   : > { %1737 = vmatpush.xpose.msk.msrb.mxu1 %vm293_vm0, %v2393_v26 }
  0x6a   : > { %987 = vmatpush.msra.mxu2 %v2421_v30 }
  0x6c   : > { %988 = vmatpush.msra.mxu2 %v2407_v28  ;;  %1706 = vmatpush.xpose.msk.msrb.mxu3 %vm293_vm0, %v2374_v23 }
  0x6d   : > { %1738 = vmatpush.xpose.msk.msrb.mxu1 %vm293_vm0, %v2379_v24 }
  0x6e   : > { %989 = vmatpush.msra.mxu2 %v2393_v26 }
  0x6f   : > { %1636 = vmatmul.msk.f32.gmra.mxu0 %vm293_vm0, %v2339_v18  ;;  %1659 = vmatmul.msk.f32.gmra.mxu2 %vm293_vm0, %v2407_v28 }
  0x70   : > { %990 = vmatpush.msra.mxu2 %v2379_v24  ;;  %1707 = vmatpush.xpose.msk.msrb.mxu3 %vm293_vm0, %v2367_v22 }
  0x71   : > { %1739 = vmatpush.xpose.msk.msrb.mxu1 %vm293_vm0, %v283_v47 }
  0x72   : > { %991 = vmatpush.msra.mxu2 %v283_v47 }
  0x74   : > { %992 = vmatpush.msra.mxu2 %v282_v48  ;;  %1708 = vmatpush.xpose.msk.msrb.mxu3 %vm293_vm0, %v2360_v21 }
  0x75   : > { %1740 = vmatpush.xpose.msk.msrb.mxu1 %vm293_vm0, %v282_v48 }
  0x76   : > { %993 = vmatpush.msra.mxu2 %v281_v49 }
  0x77   : > { %1637 = vmatmul.msk.f32.gmra.mxu0 %vm293_vm0, %v2346_v19  ;;  %1660 = vmatmul.msk.f32.gmra.mxu2 %vm293_vm0, %v2421_v30 }
  0x78   : > { %994 = vmatpush.msra.mxu2 %v280_v50  ;;  %1709 = vmatpush.xpose.msk.msrb.mxu3 %vm293_vm0, %v2353_v20 }
  0x79   : > { %1741 = vmatpush.xpose.msk.msrb.mxu1 %vm293_vm0, %v281_v49 }
  0x7a   : > { %995 = vmatpush.msra.mxu2 %v279_v46 }
  0x7c   : > { %996 = vmatpush.msra.mxu2 %v278_v44  ;;  %1710 = vmatpush.xpose.msk.msrb.mxu3 %vm293_vm0, %v2346_v19 }
  0x7d   : > { %1742 = vmatpush.xpose.msk.msrb.mxu1 %vm293_vm0, %v280_v50 }
  0x7e   : > { %997 = vmatpush.msra.mxu2 %v277_v42 }
  0x7f   : > { %1638 = vmatmul.msk.f32.gmra.mxu0 %vm293_vm0, %v2353_v20  ;;  %1661 = vmatmul.msk.f32.gmra.mxu2 %vm293_vm0, %v2445_v36 }
  0x80   : > { %1711 = vmatpush.xpose.msk.msrb.mxu3 %vm293_vm0, %v2339_v18 }
  0x81   : > { %1743 = vmatpush.xpose.msk.msrb.mxu1 %vm293_vm0, %v279_v46 }
  0x84   : > { %1712 = vmatpush.xpose.msk.msrb.mxu3 %vm293_vm0, %v2332_v17 }
  0x85   : > { %1744 = vmatpush.xpose.msk.msrb.mxu1 %vm293_vm0, %v278_v44 }
  0x87   : > { %1639 = vmatmul.msk.f32.gmra.mxu0 %vm293_vm0, %v2360_v21  ;;  %1662 = vmatmul.msk.f32.gmra.mxu2 %vm293_vm0, %v289_v37 }
  0x88   : > { %1713 = vmatpush.xpose.msk.msrb.mxu3 %vm293_vm0, %v2323_v16 }
  0x89   : > { %1745 = vmatpush.xpose.msk.msrb.mxu1 %vm293_vm0, %v277_v42 }
  0x8f   : > { %1640 = vmatmul.msk.f32.gmra.mxu0 %vm293_vm0, %v2367_v22  ;;  %1663 = vmatmul.msk.f32.gmra.mxu2 %vm293_vm0, %v290_v38 }
  0x97   : > { %1641 = vmatmul.msk.f32.gmra.mxu0 %vm293_vm0, %v2374_v23  ;;  %1664 = vmatmul.msk.f32.gmra.mxu2 %vm293_vm0, %v291_v39 }
  0x9f   : > { %1642 = vmatmul.msk.f32.gmra.mxu0 %vm293_vm0, %v2388_v25  ;;  %1665 = vmatmul.msk.f32.gmra.mxu2 %vm293_vm0, %v292_v40 }
  0xa7   : > { %1643 = vmatmul.msk.f32.gmra.mxu0 %vm293_vm0, %v2402_v27 }
  0xaf   : > { %1644 = vmatmul.msk.f32.gmra.mxu0 %vm293_vm0, %v2416_v29 }
  0xb7   : > { %1645 = vmatmul.msk.f32.gmra.mxu0 %vm293_vm0, %v272_v34 }
  0xbf   : > { %1646 = vmatmul.msk.f32.gmra.mxu0 %vm293_vm0, %v273_v35 }
  0xc7   : > { %1647 = vmatmul.msk.f32.gmra.mxu0 %vm293_vm0, %v274_v33 }
  0xcf   : > { %1648 = vmatmul.msk.f32.gmra.mxu0 %vm293_vm0, %v275_v32 }
  0xd7   : > { %1649 = vmatmul.msk.f32.gmra.mxu0 %vm293_vm0, %v276_v31 }
  0xdc   : > { %v2496_v41 = vpop.f32.mrf.mxu0 }
  0xdf   : > { %1650 = vmatmul.msk.f32.gmra.mxu0 %vm293_vm0, %v277_v42 }
  0xe2   : > { %v2599_v61 = vpop.f32.mrf.mxu2 }
  0xe4   : > { %v2508_v43 = vpop.f32.mrf.mxu0 }
  0xe7   : > { %1651 = vmatmul.msk.f32.gmra.mxu0 %vm293_vm0, %v278_v44  ;;  %v588_v44 = vlaneseq }
  0xea   : > { %v2603_v63 = vpop.f32.mrf.mxu2 }
  0xec   : > { %v2524_v45 = vpop.f32.mrf.mxu0 }
  0xef   : > { %1652 = vmatmul.msk.f32.gmra.mxu0 %vm293_vm0, %v279_v46 }
  0xf2   : > { %v2607_v1 = vpop.f32.mrf.mxu2 }
  0xf4   : > { %v2550_v51 = vpop.f32.mrf.mxu0 }
  0xf7   : > { %1653 = vmatmul.msk.f32.gmra.mxu0 %vm293_vm0, %v280_v50 }
  0xfa   : > { %v2611_v3 = vpop.f32.mrf.mxu2 }
  0xfc   : > { %v2561_v52 = vpop.f32.mrf.mxu0 }
  0xfd   : > { %v551_v14 = vmax.f32 %v2496_v41, %v2561_v52 }
  0xff   : > { %1654 = vmatmul.msk.f32.gmra.mxu0 %vm293_vm0, %v281_v49 }
 0x102   : > { %v2617_v6 = vpop.f32.mrf.mxu2 }
 0x104   : > { %v2570_v53 = vpop.f32.mrf.mxu0 }
 0x105   : > { %v552_v12 = vmax.f32 %v2508_v43, %v2570_v53 }
 0x107   : > { %1655 = vmatmul.msk.f32.gmra.mxu0 %vm293_vm0, %v282_v48 }
 0x10a   : > { %v2621_v8 = vpop.f32.mrf.mxu2 }
 0x10c   : > { %v2579_v54 = vpop.f32.mrf.mxu0 }
 0x10d   : > { %v553_v23 = vmax.f32 %v2524_v45, %v2579_v54 }
 0x10f   : > { %1656 = vmatmul.msk.f32.gmra.mxu0 %vm293_vm0, %v283_v47 }
 0x112   : > { %v2625_v10 = vpop.f32.mrf.mxu2 }
 0x114   : > { %v2586_v55 = vpop.f32.mrf.mxu0 }
 0x115   : > { %v554_v13 = vmax.f32 %v2550_v51, %v2586_v55 }
 0x11a   : > { %v2640_v21 = vpop.f32.mrf.mxu2 }
 0x11c   : > { %v2589_v56 = vpop.f32.mrf.mxu0 }
 0x11d   : > { %v555_v18 = vmax.f32 %v551_v14, %v2589_v56 }
 0x122   : > { %v2662_v39 = vpop.f32.mrf.mxu2 }
 0x123   : > { %3464 = vst [vmem:[#allocation10_spill] sm:$0xff] %v2662_v39 }
 0x124   : > { %v2591_v57 = vpop.f32.mrf.mxu0 }
 0x125   : > { %v556_v16 = vmax.f32 %v552_v12, %v2591_v57  ;;  %v2669_v12 = vshrl.u32 %v588_v44, 7 }
 0x127   : > { %v2756_v44 = vadd.s32 128, %v2669_v12  ;;  %v2775_v15 = vadd.s32 136, %v2669_v12 }
 0x12c   : > { %v2593_v58 = vpop.f32.mrf.mxu0 }
 0x12d   : > { %v557_v27 = vmax.f32 %v553_v23, %v2593_v58  ;;  %v2684_v23 = vadd.s32 40, %v2669_v12 }
 0x134   : > { %v2595_v59 = vpop.f32.mrf.mxu0 }
 0x135   : > { %v558_v17 = vmax.f32 %v554_v13, %v2595_v59 }
 0x13c   : > { %v2597_v60 = vpop.f32.mrf.mxu0 }
 0x13d   : > { %v559_v24 = vmax.f32 %v555_v18, %v2597_v60  ;;  %v2678_v18 = vadd.s32 24, %v2669_v12 }
 0x144   : > { %v2601_v62 = vpop.f32.mrf.mxu0 }
 0x145   : > { %v560_v19 = vmax.f32 %v556_v16, %v2601_v62  ;;  %v2672_v16 = vadd.s32 8, %v2669_v12 }
 0x14c   : > { %v2605_v0 = vpop.f32.mrf.mxu0 }
 0x14d   : > { %v561_v30 = vmax.f32 %v557_v27, %v2605_v0 }
 0x154   : > { %v2609_v2 = vpop.f32.mrf.mxu0 }
 0x155   : > { %v562_v20 = vmax.f32 %v558_v17, %v2609_v2  ;;  %v2675_v17 = vadd.s32 16, %v2669_v12 }
 0x157   : > { %3465 = vst [vmem:[#allocation11_spill] sm:$0xff] %v2675_v17 }
 0x15c   : > { %v2613_v4 = vpop.f32.mrf.mxu0 }
 0x15d   : > { %v563_v28 = vmax.f32 %v559_v24, %v2613_v4  ;;  %v2687_v24 = vadd.s32 48, %v2669_v12 }
 0x15f   : > { %3466 = vst [vmem:[#allocation12_spill] sm:$0xff] %v2687_v24 }
 0x164   : > { %v2615_v5 = vpop.f32.mrf.mxu0 }
 0x165   : > { %v564_v25 = vmax.f32 %v560_v19, %v2615_v5 }
 0x16c   : > { %v2619_v7 = vpop.f32.mrf.mxu0 }
 0x16d   : > { %v565_v33 = vmax.f32 %v561_v30, %v2619_v7  ;;  %v2772_v30 = vadd.s32 176, %v2669_v12 }
 0x174   : > { %v2623_v9 = vpop.f32.mrf.mxu0 }
 0x175   : > { %v566_v26 = vmax.f32 %v562_v20, %v2623_v9  ;;  %v2681_v20 = vadd.s32 32, %v2669_v12 }
 0x177   : > { %v570_v31 = vmax.f32 %v566_v26, %v2599_v61  ;;  %v2691_v26 = vadd.s32 56, %v2669_v12 }
 0x179   : > { %v574_v36 = vmax.f32 %v570_v31, %v2617_v6  ;;  %v2697_v31 = vadd.s32 64, %v2669_v12 }
 0x17b   : > { %v578_v46 = vmax.f32 %v574_v36, %v2662_v39 }
 0x17c   : > { %v2627_v11 = vpop.f32.mrf.mxu0 }
 0x17d   : > { %v567_v32 = vmax.f32 %v563_v28, %v2627_v11  ;;  %v2741_v28 = vadd.s32 120, %v2669_v12 }
 0x17f   : > { %v571_v37 = vmax.f32 %v567_v32, %v2603_v63  ;;  %v2700_v32 = vadd.s32 72, %v2669_v12 }
 0x181   : > { %v575_v47 = vmax.f32 %v571_v37, %v2621_v8  ;;  %v2744_v37 = vadd.s32 216, %v2669_v12 }
 0x183   : > { %3469 = vst [vmem:[#allocation15_spill] sm:$0xff] %v2744_v37 }
 0x184   : > { %v2642_v22 = vpop.f32.mrf.mxu0 }
 0x185   : > { %v568_v29 = vmax.f32 %v564_v25, %v2642_v22  ;;  %v2789_v25 = vadd.s32 160, %v2669_v12 }
 0x187   : > { %v572_v34 = vmax.f32 %v568_v29, %v2607_v1  ;;  %v3445_v29 = vcvt.s32.f32 %v2675_v17 }
 0x189   : > { %v576_v40 = vmax.f32 %v572_v34, %v2625_v10  ;;  %v2706_v34 = vadd.s32 88, %v2669_v12 }
 0x18b   : > { %v579_v49 = vmax.f32 %v575_v47, %v576_v40  ;;  %v3446_v40 = vcvt.s32.f32 %v2687_v24  ;;  %v2719_v47 = vadd.s32 192, %v2669_v12 }
 0x18c   : > { %v2657_v35 = vpop.f32.mrf.mxu0 }
 0x18d   : > { %v569_v38 = vmax.f32 %v565_v33, %v2657_v35  ;;  %v2703_v33 = vadd.s32 80, %v2669_v12  ;;  %3467 = vst [vmem:[#allocation13_spill] sm:$0xff] %v2719_v47 }
 0x18f   : > { %v573_v42 = vmax.f32 %v569_v38, %v2611_v3 }
 0x191   : > { %v577_v48 = vmax.f32 %v573_v42, %v2640_v21  ;;  %v2712_v42 = vadd.s32 184, %v2669_v12 }
 0x193   : > { %v580_v50 = vmax.f32 %v577_v48, %v578_v46  ;;  %v2716_v46 = vadd.s32 96, %v2669_v12 }
 0x195   : > { %v581_v13 = vmax.f32 %v579_v49, %v580_v50  ;;  %v2723_v50 = vadd.s32 104, %v2669_v12  ;;  %v2738_v49 = vadd.s32 208, %v2669_v12 }
 0x197   : > { %v582_v14 = vrot.slane %v581_v13, 4 }
 0x199   : > { %v583_v19 = vmax.f32 %v581_v13, %v582_v14  ;;  %v2726_v13 = vadd.s32 200, %v2669_v12  ;;  %v2729_v14 = vadd.s32 112, %v2669_v12 }
 0x19b   : > { %v584_v27 = vrot.slane %v583_v19, 2  ;;  %3468 = vst [vmem:[#allocation14_spill] sm:$0xff] %v2726_v13  ;;  %v2778_v13 = vadd.s32 232, %v2669_v12 }
 0x19d   : > { %v585_v36 = vmax.f32 %v583_v19, %v584_v27  ;;  %v2759_v27 = vadd.s32 224, %v2669_v12  ;;  %v2762_v19 = vadd.s32 144, %v2669_v12 }
 0x19f   : > { %v586_v48 = vrot.slane %v585_v36, 1  ;;  %3470 = vst [vmem:[#allocation16_spill] sm:$0xff] %v2759_v27  ;;  %v3473_v24 = vcvt.s32.f32 %v2762_v19 }
 0x1a1   : > { %v2734_v38 = vmax.f32 %v585_v36, %v586_v48  ;;  %v2786_v48 = vadd.s32 152, %v2669_v12  ;;  %v2792_v36 = vadd.s32 168, %v2669_v12 }
 0x1a3   : > { %vm655_vm1 = vcmp.eq.f32.partialorder %v2524_v45, %v2734_v38  ;;  %vm659_vm2 = vcmp.eq.f32.partialorder %v2579_v54, %v2734_v38  ;;  %vm663_vm3 = vcmp.eq.f32.partialorder %v2593_v58, %v2734_v38  ;;  %v2798_v58 = vadd.s32 248, %v2669_v12 }
 0x1a4   : > { %v687_v45 = vsel %vm655_vm1, %v3445_v29, 256.0  ;;  %v691_v54 = vsel %vm659_vm2, %v3446_v40, 256.0  ;;  %v2783_v40 = vadd.s32 240, %v2669_v12  ;;  %vm667_vm4 = vcmp.eq.f32.partialorder %v2605_v0, %v2734_v38 }
 0x1a5   : > { %v719_v29 = vmin.f32 %v687_v45, %v691_v54  ;;  %vm671_vm5 = vcmp.eq.f32.partialorder %v2619_v7, %v2734_v38  ;;  %v3471_v54 = vcvt.s32.f32 %v2703_v33  ;;  %vm675_vm6 = vcmp.eq.f32.partialorder %v2657_v35, %v2734_v38 }
 0x1a6   : > { %v640_v45 = vcvt.s32.f32 %v2786_v48  ;;  %v641_v0 = vcvt.s32.f32 %v2789_v25  ;;  %vm679_vm7 = vcmp.eq.f32.partialorder %v2611_v3, %v2734_v38  ;;  %v3472_v7 = vcvt.s32.f32 %v2729_v14 }
 0x1a7   : > { %v695_v47 = vsel %vm663_vm3, %v3471_v54, 256.0  ;;  %v703_v17 = vsel %vm671_vm5, %v3473_v24, 256.0  ;;  %vm653_vm8 = vcmp.eq.f32.partialorder %v2496_v41, %v2734_v38  ;;  %vm654_vm9 = vcmp.eq.f32.partialorder %v2508_v43, %v2734_v38 }
 0x1a8   : > { %v723_v37 = vmin.f32 %v719_v29, %v695_v47  ;;  %v699_v54 = vsel %vm667_vm4, %v3472_v7, 256.0  ;;  %v3474_v29 = vcvt.s32.f32 %v2772_v30  ;;  %vm657_vm10 = vcmp.eq.f32.partialorder %v2561_v52, %v2734_v38 }
 0x1a9   : > { %vm656_vm11 = vcmp.eq.f32.partialorder %v2550_v51, %v2734_v38  ;;  %vm658_vm12 = vcmp.eq.f32.partialorder %v2570_v53, %v2734_v38  ;;  %vm660_vm13 = vcmp.eq.f32.partialorder %v2586_v55, %v2734_v38  ;;  %v3475_v24 = vcvt.s32.f32 %v2738_v49 }
 0x1aa   : > { %v707_v47 = vsel %vm675_vm6, %v3474_v29, 256.0  ;;  %v727_v3 = vmin.f32 %v723_v37, %v699_v54  ;;  %vm661_vm14 = vcmp.eq.f32.partialorder %v2589_v56, %v2734_v38  ;;  %vm662_vm15 = vcmp.eq.f32.partialorder %v2591_v57, %v2734_v38 }
 0x1ab   : > { %v711_v7 = vsel %vm679_vm7, %v3475_v24, 256.0  ;;  %vm664_vm1 = vcmp.eq.f32.partialorder %v2595_v59, %v2734_v38  ;;  %vm665_vm2 = vcmp.eq.f32.partialorder %v2597_v60, %v2734_v38  ;;  %vm666_vm3 = vcmp.eq.f32.partialorder %v2601_v62, %v2734_v38 }
 0x1ac   : > { %v3476_v41 = vcvt.s32.f32 %v2669_v12  ;;  %v3477_v51 = vcvt.s32.f32 %v2681_v20  ;;  %v3478_v53 = vcvt.s32.f32 %v2672_v16  ;;  %v3479_v37 = vcvt.s32.f32 %v2678_v18 }
 0x1ad   : > { %v3480_v29 = vcvt.s32.f32 %v2684_v23  ;;  %v3481_v35 = vcvt.s32.f32 %v2691_v26  ;;  %vm683_vm4 = vcmp.eq.f32.partialorder %v2640_v21, %v2734_v38  ;;  %v731_v39 = vmin.f32 %v727_v3, %v703_v17 }
 0x1ae   : > { %v685_v43 = vsel %vm653_vm8, %v3476_v41, 256.0  ;;  %v689_v52 = vsel %vm657_vm10, %v3477_v51, 256.0  ;;  %v686_v55 = vsel %vm654_vm9, %v3478_v53, 256.0  ;;  %v688_v54 = vsel %vm656_vm11, %v3479_v37, 256.0 }
 0x1af   : > { %v690_v24 = vsel %vm658_vm12, %v3480_v29, 256.0  ;;  %v692_v27 = vsel %vm660_vm13, %v3481_v35, 256.0  ;;  %vm668_vm5 = vcmp.eq.f32.partialorder %v2609_v2, %v2734_v38  ;;  %vm669_vm6 = vcmp.eq.f32.partialorder %v2613_v4, %v2734_v38 }
 0x1b0   : > { %vm670_vm7 = vcmp.eq.f32.partialorder %v2615_v5, %v2734_v38  ;;  %vm672_vm8 = vcmp.eq.f32.partialorder %v2623_v9, %v2734_v38  ;;  %vm673_vm9 = vcmp.eq.f32.partialorder %v2627_v11, %v2734_v38  ;;  %vm674_vm10 = vcmp.eq.f32.partialorder %v2642_v22, %v2734_v38  ;;  %v3492_v11 = vld [vmem:[#allocation10_spill] sm:$0xff] }
 0x1b1   : > { %v717_v35 = vmin.f32 %v685_v43, %v689_v52  ;;  %vm676_vm11 = vcmp.eq.f32.partialorder %v2599_v61, %v2734_v38  ;;  %v3482_v17 = vcvt.s32.f32 %v2697_v31  ;;  %v718_v41 = vmin.f32 %v686_v55, %v690_v24  ;;  %v3496_v61 = vld [vmem:[#allocation14_spill] sm:$0xff] }
 0x1b2   : > { %v720_v51 = vmin.f32 %v688_v54, %v692_v27  ;;  %vm677_vm12 = vcmp.eq.f32.partialorder %v2603_v63, %v2734_v38  ;;  %v3483_v53 = vcvt.s32.f32 %v2700_v32  ;;  %v3484_v52 = vcvt.s32.f32 %v2706_v34 }
 0x1b3   : > { %v693_v3 = vsel %vm661_vm14, %v3482_v17, 256.0  ;;  %v735_v56 = vmin.f32 %v731_v39, %v707_v47  ;;  %v3485_v55 = vcvt.s32.f32 %v2716_v46  ;;  %vm678_vm13 = vcmp.eq.f32.partialorder %v2607_v1, %v2734_v38 }
 0x1b4   : > { %v694_v43 = vsel %vm662_vm15, %v3483_v53, 256.0  ;;  %v696_v37 = vsel %vm664_vm1, %v3484_v52, 256.0  ;;  %v721_v29 = vmin.f32 %v717_v35, %v693_v3  ;;  %v3486_v57 = vcvt.s32.f32 %v2723_v50 }
 0x1b5   : > { %v697_v27 = vsel %vm665_vm2, %v3485_v55, 256.0  ;;  %v722_v54 = vmin.f32 %v718_v41, %v694_v43  ;;  %v724_v24 = vmin.f32 %v720_v51, %v696_v37  ;;  %v3487_v35 = vcvt.s32.f32 %v2741_v28  ;;  %v3493_v55 = vld [vmem:[#allocation13_spill] sm:$0xff] }
 0x1b6   : > { %v698_v59 = vsel %vm666_vm3, %v3486_v57, 256.0  ;;  %v725_v47 = vmin.f32 %v721_v29, %v697_v27  ;;  %vm680_vm14 = vcmp.eq.f32.partialorder %v2617_v6, %v2734_v38  ;;  %v3488_v60 = vcvt.s32.f32 %v2756_v44 }
 0x1b7   : > { %v700_v39 = vsel %vm668_vm5, %v3487_v35, 256.0  ;;  %v726_v3 = vmin.f32 %v722_v54, %v698_v59  ;;  %vm681_vm15 = vcmp.eq.f32.partialorder %v2621_v8, %v2734_v38  ;;  %v3489_v62 = vcvt.s32.f32 %v2775_v15 }
 0x1b8   : > { %v701_v17 = vsel %vm669_vm6, %v3488_v60, 256.0  ;;  %v728_v41 = vmin.f32 %v724_v24, %v700_v39  ;;  %v704_v51 = vsel %vm672_vm8, %v640_v45, 256.0  ;;  %v739_v4 = vmin.f32 %v735_v56, %v711_v7 }
 0x1b9   : > { %v702_v2 = vsel %vm670_vm7, %v3489_v62, 256.0  ;;  %v729_v53 = vmin.f32 %v725_v47, %v701_v17  ;;  %v705_v43 = vsel %vm673_vm9, %v641_v0, 256.0  ;;  %vm682_vm1 = vcmp.eq.f32.partialorder %v2625_v10, %v2734_v38  ;;  %v3498_v47 = vld [vmem:[#allocation15_spill] sm:$0xff] }
 0x1ba   : > { %v730_v52 = vmin.f32 %v726_v3, %v702_v2  ;;  %v732_v37 = vmin.f32 %v728_v41, %v704_v51  ;;  %v3490_v5 = vcvt.s32.f32 %v2792_v36  ;;  %v3491_v29 = vcvt.s32.f32 %v2712_v42  ;;  %v3500_v41 = vld [vmem:[#allocation16_spill] sm:$0xff] }
 0x1bb   : > { %v733_v56 = vmin.f32 %v729_v53, %v705_v43  ;;  %vm684_vm2 = vcmp.eq.f32.partialorder %v3492_v11, %v2734_v38  ;;  %v3494_v27 = vcvt.s32.f32 %v3493_v55  ;;  %v3495_v22 = vcvt.s32.f32 %v2783_v40 }
 0x1bc   : > { %v706_v9 = vsel %vm674_vm10, %v3490_v5, 256.0  ;;  %v708_v7 = vsel %vm676_vm11, %v3491_v29, 256.0  ;;  %v3497_v35 = vcvt.s32.f32 %v3496_v61  ;;  %v3499_v60 = vcvt.s32.f32 %v3498_v47 }
 0x1bd   : > { %v709_v54 = vsel %vm677_vm12, %v3494_v27, 256.0  ;;  %v734_v24 = vmin.f32 %v730_v52, %v706_v9  ;;  %v736_v57 = vmin.f32 %v732_v37, %v708_v7  ;;  %v715_v59 = vsel %vm683_vm4, %v3495_v22, 256.0 }
 0x1be   : > { %v710_v39 = vsel %vm678_vm13, %v3497_v35, 256.0  ;;  %v712_v63 = vsel %vm680_vm14, %v3499_v60, 256.0  ;;  %v737_v17 = vmin.f32 %v733_v56, %v709_v54  ;;  %v743_v3 = vmin.f32 %v739_v4, %v715_v59 }
 0x1bf   : > { %v3501_v62 = vcvt.s32.f32 %v3500_v41  ;;  %v738_v2 = vmin.f32 %v734_v24, %v710_v39  ;;  %v740_v51 = vmin.f32 %v736_v57, %v712_v63  ;;  %v3502_v53 = vcvt.s32.f32 %v2778_v13  ;;  %v1999_v41 = vld [vmem:[%s2268_s6 + $0x30] sm:$0xff] }
 0x1c0   : > { %v3503_v43 = vcvt.s32.f32 %v2798_v58  ;;  %v3505_v38 = vcvt.s32.f32 %v2669_v12  ;;  %v2181_v57 = vmov 1.0   ;;  %v2182_v22 = vmov 0.0  }
 0x1c1   : > { %v713_v21 = vsel %vm681_vm15, %v3501_v62, 256.0  ;;  %v714_v1 = vsel %vm682_vm1, %v3502_v53, 256.0  ;;  %v3506_v35 = vcvt.s32.f32 %v2783_v40  ;;  %v3507_v58 = vmov %v3502_v53 }
 0x1c2   : > { %v716_v6 = vsel %vm684_vm2, %v3503_v43, 256.0  ;;  %v741_v52 = vmin.f32 %v737_v17, %v713_v21  ;;  %v742_v37 = vmin.f32 %v738_v2, %v714_v1  ;;  %v3504_v10 = vmov %v3503_v43 }
 0x1c3   : > { %v744_v4 = vmin.f32 %v740_v51, %v716_v6  ;;  %v3508_v12 = vcvt.s32.f32 %v2672_v16  ;;  %v3509_v39 = vmov %v3501_v62  ;;  %v3510_v40 = vcvt.s32.f32 %v2681_v20  ;;  %v3516_v16 = vld [vmem:[#allocation12_spill] sm:$0xff] }
 0x1c4   : > { %v745_v5 = vmin.f32 %v741_v52, %v742_v37  ;;  %v3513_v13 = vcvt.s32.f32 %v2684_v23  ;;  %v3517_v17 = vcvt.s32.f32 %v3516_v16  ;;  %v3520_v20 = vcvt.s32.f32 %v2691_v26 }
 0x1c5   : > { %v746_v9 = vmin.f32 %v743_v3, %v744_v4  ;;  %v3523_v23 = vcvt.s32.f32 %v3498_v47  ;;  %v3524_v21 = vcvt.s32.f32 %v2738_v49  ;;  %v3525_v2 = vcvt.s32.f32 %v2697_v31 }
 0x1c6   : > { %v3526_v26 = vcvt.s32.f32 %v2700_v32  ;;  %v3527_v51 = vcvt.s32.f32 %v2703_v33  ;;  %v3528_v47 = vcvt.s32.f32 %v2706_v34  ;;  %v3529_v33 = vcvt.s32.f32 %v2716_v46 }
 0x1c7   : > { %v747_v29 = vmin.f32 %v745_v5, %v746_v9  ;;  %v3530_v34 = vcvt.s32.f32 %v2723_v50  ;;  %v3531_v1 = vcvt.s32.f32 %v2729_v14  ;;  %v3532_v43 = vcvt.s32.f32 %v2741_v28  ;;  %v3535_v5 = vld [vmem:[#allocation11_spill] sm:$0xff] }
 0x1c8   : > { %v3533_v50 = vcvt.s32.f32 %v3496_v61  ;;  %v3534_v4 = vcvt.s32.f32 %v3493_v55  ;;  %v3536_v9 = vcvt.s32.f32 %v3535_v5  ;;  %v3538_v55 = vcvt.s32.f32 %v2772_v30 }
 0x1c9   : > { %v748_v7 = vrot.slane %v747_v29, 4  ;;  %v3543_v25 = vcvt.s32.f32 %v2756_v44 }
 0x1cb   : > { %v749_v8 = vmin.f32 %v747_v29, %v748_v7  ;;  %v3537_v7 = vcvt.s32.f32 %v2712_v42  ;;  %v3540_v42 = vcvt.s32.f32 %v2678_v18  ;;  %v3542_v18 = vcvt.s32.f32 %v2775_v15 }
 0x1cd   : > { %v750_v56 = vrot.slane %v749_v8, 2 }
 0x1cf   : > { %v751_v11 = vmin.f32 %v749_v8, %v750_v56  ;;  %v3539_v56 = vcvt.s32.f32 %v2792_v36  ;;  %v3541_v36 = vcvt.s32.f32 %v2762_v19 }
 0x1d1   : > { %v752_v27 = vrot.slane %v751_v11, 1 }
 0x1d3   : > { %v753_v54 = vmin.f32 %v751_v11, %v752_v27 }
 0x1d5   : > { %v2980_v24 = vmin.f32 %v753_v54, 255.0 }
 0x1d7   : > { %vm788_vm3 = vcmp.eq.f32.partialorder %v3504_v10, %v2980_v24  ;;  %vm757_vm4 = vcmp.eq.f32.partialorder %v3505_v38, %v2980_v24  ;;  %vm787_vm5 = vcmp.eq.f32.partialorder %v3506_v35, %v2980_v24  ;;  %vm786_vm6 = vcmp.eq.f32.partialorder %v3507_v58, %v2980_v24  ;;  %v1994_v35 = vld [vmem:[%s2268_s6 + $0x8] sm:$0xff] }
 0x1d8   : > { %1862 = vmatpush.lsf.msk.msk.msrb.mxu2 %vm788_vm3, %v2181_v57  ;;  %v1666_v59 = vsel %vm757_vm4, 1.0, %v2182_v22  ;;  %vm758_vm7 = vcmp.eq.f32.partialorder %v3508_v12, %v2980_v24  ;;  %vm785_vm8 = vcmp.eq.f32.partialorder %v3509_v39, %v2980_v24  ;;  %vm3007_vm9 = vcmp.eq.f32.partialorder %v3510_v40, %v2980_v24  ;;  %v1995_v12 = vld [vmem:[%s2268_s6 + $0x10] sm:$0xff]  ;;  %v1996_v40 = vld [vmem:[%s2268_s6 + $0x18] sm:$0xff] }
 0x1d9   : > { %853 = vxpose.xlu0.b32.start [1/16] %v1666_v59, 128  ;;  %vm3014_vm10 = vcmp.eq.f32.partialorder %v3513_v13, %v2980_v24  ;;  %vm3021_vm11 = vcmp.eq.f32.partialorder %v3517_v17, %v2980_v24  ;;  %vm3028_vm12 = vcmp.eq.f32.partialorder %v3520_v20, %v2980_v24  ;;  %vm784_vm13 = vcmp.eq.f32.partialorder %v3523_v23, %v2980_v24  ;;  %v1997_v13 = vld [vmem:[%s2268_s6 + $0x20] sm:$0xff]  ;;  %v1998_v17 = vld [vmem:[%s2268_s6 + $0x28] sm:$0xff] }
 0x1da   : > { %1863 = vmatpush.lsf.msk.msk.msrb.mxu2 %vm787_vm5, %v2181_v57  ;;  %v1667_v62 = vsel %vm758_vm7, 1.0, %v2182_v22  ;;  %vm783_vm14 = vcmp.eq.f32.partialorder %v3524_v21, %v2980_v24  ;;  %vm765_vm15 = vcmp.eq.f32.partialorder %v3525_v2, %v2980_v24  ;;  %vm766_vm1 = vcmp.eq.f32.partialorder %v3526_v26, %v2980_v24 }
 0x1db   : > { %vm767_vm2 = vcmp.eq.f32.partialorder %v3527_v51, %v2980_v24  ;;  %vm768_vm3 = vcmp.eq.f32.partialorder %v3528_v47, %v2980_v24  ;;  %v1674_v49 = vsel %vm765_vm15, 1.0, %v2182_v22  ;;  %v1675_v31 = vsel %vm766_vm1, 1.0, %v2182_v22  ;;  %v2001_v51 = vld [vmem:[%s2268_s6] sm:$0xff] }
 0x1dc   : > { %1864 = vmatpush.lsf.msk.msk.msrb.mxu2 %vm786_vm6, %v2181_v57  ;;  %v1676_v53 = vsel %vm767_vm2, 1.0, %v2182_v22  ;;  %v1677_v32 = vsel %vm768_vm3, 1.0, %v2182_v22  ;;  %vm769_vm4 = vcmp.eq.f32.partialorder %v3529_v33, %v2980_v24  ;;  %vm770_vm5 = vcmp.eq.f32.partialorder %v3530_v34, %v2980_v24  ;;  %v2002_v47 = vld [vmem:[%s2268_s6 + $0x40] sm:$0xff] }
 0x1dd   : > { %vm771_vm6 = vcmp.eq.f32.partialorder %v3531_v1, %v2980_v24  ;;  %vm772_vm7 = vcmp.eq.f32.partialorder %v3532_v43, %v2980_v24  ;;  %v1678_v6 = vsel %vm769_vm4, 1.0, %v2182_v22  ;;  %v1679_v52 = vsel %vm770_vm5, 1.0, %v2182_v22  ;;  %v2004_v43 = vld [vmem:[%s2268_s6 + $0x50] sm:$0xff] }
 0x1de   : > { %1865 = vmatpush.lsf.msk.msk.msrb.mxu2 %vm785_vm8, %v2181_v57  ;;  %v1680_v46 = vsel %vm771_vm6, 1.0, %v2182_v22  ;;  %v1681_v37 = vsel %vm772_vm7, 1.0, %v2182_v22  ;;  %vm782_vm8 = vcmp.eq.f32.partialorder %v3533_v50, %v2980_v24  ;;  %v1879_v28 = vceil.f32 %v2980_v24 }
 0x1df   : > { %v1880_v14 = vfloor.f32 %v2980_v24  ;;  %vm759_vm15 = vcmp.eq.f32.partialorder %v3536_v9, %v2980_v24  ;;  %vm780_vm1 = vcmp.eq.f32.partialorder %v3537_v7, %v2980_v24  ;;  %vm779_vm2 = vcmp.eq.f32.partialorder %v3538_v55, %v2980_v24  ;;  %v2008_v55 = vld [vmem:[%s2268_s6 + $0x70] sm:$0xff] }
 0x1e0   : > { %1866 = vmatpush.lsf.msk.msk.msrb.mxu2 %vm784_vm13, %v2181_v57  ;;  %vm1878_vm13 = vcmp.lt.s32.totalorder %v2980_v24, 0  ;;  %v1668_v8 = vsel %vm759_vm15, 1.0, %v2182_v22  ;;  %vm778_vm3 = vcmp.eq.f32.partialorder %v3539_v56, %v2980_v24  ;;  %vm777_vm4 = vcmp.eq.f32.partialorder %v641_v0, %v2980_v24 }
 0x1e1   : > { %854 = vxpose.xlu0.b32.cont [2/16] %v1667_v62, 128  ;;  %v1881_v61 = vsel %vm1878_vm13, %v1879_v28, %v1880_v14  ;;  %vm760_vm5 = vcmp.eq.f32.partialorder %v3540_v42, %v2980_v24  ;;  %vm776_vm6 = vcmp.eq.f32.partialorder %v640_v45, %v2980_v24  ;;  %vm775_vm7 = vcmp.eq.f32.partialorder %v3541_v36, %v2980_v24  ;;  %v2000_v62 = vld [vmem:[%s2268_s6 + $0x38] sm:$0xff]  ;;  %v2006_v14 = vld [vmem:[%s2268_s6 + $0x60] sm:$0xff] }
 0x1e2   : > { %1867 = vmatpush.lsf.msk.msk.msrb.mxu2 %vm783_vm14, %v2181_v57  ;;  %vm781_vm14 = vcmp.eq.f32.partialorder %v3534_v4, %v2980_v24  ;;  %v1882_v29 = vcvt.f32.s32 %v1881_v61  ;;  %v1669_v30 = vsel %vm760_vm5, 1.0, %v2182_v22  ;;  %vm773_vm13 = vcmp.eq.f32.partialorder %v3543_v25, %v2980_v24  ;;  %v2007_v61 = vld [vmem:[%s2268_s6 + $0x68] sm:$0xff]  ;;  %v2009_v36 = vld [vmem:[%s2268_s6 + $0x78] sm:$0xff] }
 0x1e3   : > { %v1670_v19 = vsel %vm3007_vm9, 1.0, %v2182_v22  ;;  %v1671_v48 = vsel %vm3014_vm10, 1.0, %v2182_v22  ;;  %v1672_v15 = vsel %vm3021_vm11, 1.0, %v2182_v22  ;;  %v1673_v44 = vsel %vm3028_vm12, 1.0, %v2182_v22  ;;  %v3544_v22 = vld [vmem:[#allocation9_spill] sm:$0xff] }
 0x1e4   : > { %1868 = vmatpush.lsf.msk.msk.msrb.mxu2 %vm782_vm8, %v2181_v57  ;;  %756 = vst [vmem:[%s3456_s12] sm:$0x1] %v1882_v29  ;;  %vm774_vm8 = vcmp.eq.f32.partialorder %v3542_v18, %v2980_v24 }
 0x1e6   : > { %1869 = vmatpush.lsf.msk.msk.msrb.mxu2 %vm781_vm14, %v2181_v57 }
 0x1e8   : > { %1870 = vmatpush.lsf.msk.msk.msrb.mxu2 %vm780_vm1, %v2181_v57 }
 0x1e9   : > { %855 = vxpose.xlu0.b32.cont [3/16] %v1668_v8, 128 }
 0x1ea   : > { %1871 = vmatpush.lsf.msk.msk.msrb.mxu2 %vm779_vm2, %v2181_v57 }
 0x1ec   : > { %1872 = vmatpush.lsf.msk.msk.msrb.mxu2 %vm778_vm3, %v2181_v57 }
 0x1ee   : > { %1873 = vmatpush.lsf.msk.msk.msrb.mxu2 %vm777_vm4, %v2181_v57 }
 0x1f0   : > { %1874 = vmatpush.lsf.msk.msk.msrb.mxu2 %vm776_vm6, %v2181_v57 }
 0x1f1   : > { %856 = vxpose.xlu0.b32.cont [4/16] %v1669_v30, 128 }
 0x1f2   : > { %1875 = vmatpush.lsf.msk.msk.msrb.mxu2 %vm775_vm7, %v2181_v57 }
 0x1f4   : > { %1876 = vmatpush.lsf.msk.msk.msrb.mxu2 %vm774_vm8, %v2181_v57 }
 0x1f6   : > { %1877 = vmatpush.lsf.msk.msk.msrb.mxu2 %vm773_vm13, %v2181_v57 }
 0x1f7   : > { %1845 = vllmr.16.mxu2 }
 0x1f9   : > { %857 = vxpose.xlu0.b32.cont [5/16] %v1670_v19, 128 }
 0x201   : > { %858 = vxpose.xlu0.b32.cont [6/16] %v1671_v48, 128 }
 0x209   : > { %859 = vxpose.xlu0.b32.cont [7/16] %v1672_v15, 128 }
 0x211   : > { %860 = vxpose.xlu0.b32.cont [8/16] %v1673_v44, 128 }
 0x218   : > { %1846 = vmatmul.lmr.bf16.vlgmr.msra.gmra.16.mxu2 }
 0x219   : > { %861 = vxpose.xlu0.b32.cont [9/16] %v1674_v49, 128 }
 0x220   : > { %1847 = vmatmul.lmr.bf16.gmra.16.mxu2 }
 0x221   : > { %862 = vxpose.xlu0.b32.cont [10/16] %v1675_v31, 128 }
 0x228   : > { %1848 = vmatmul.lmr.bf16.gmra.16.mxu2 }
 0x229   : > { %863 = vxpose.xlu0.b32.cont [11/16] %v1676_v53, 128 }
 0x230   : > { %1849 = vmatmul.lmr.bf16.gmra.16.mxu2 }
 0x231   : > { %864 = vxpose.xlu0.b32.cont [12/16] %v1677_v32, 128  ;;  %v2003_v32 = vld [vmem:[%s2268_s6 + $0x48] sm:$0xff] }
 0x238   : > { %1850 = vmatmul.lmr.bf16.gmra.16.mxu2 }
 0x239   : > { %865 = vxpose.xlu0.b32.cont [13/16] %v1678_v6, 128 }
 0x240   : > { %1851 = vmatmul.lmr.bf16.gmra.16.mxu2 }
 0x241   : > { %866 = vxpose.xlu0.b32.cont [14/16] %v1679_v52, 128 }
 0x248   : > { %1852 = vmatmul.lmr.bf16.gmra.16.mxu2 }
 0x249   : > { %867 = vxpose.xlu0.b32.cont [15/16] %v1680_v46, 128 }
 0x250   : > { %1853 = vmatmul.lmr.bf16.gmra.16.mxu2 }
 0x251   : > { %868 = vxpose.xlu0.b32.end [16/16] %v1681_v37, 128  ;;  %v2005_v37 = vld [vmem:[%s2268_s6 + $0x58] sm:$0xff]  ;;  %s1615_s6 = sshll.u32 %s3075_s11, 8 }
 0x252   : > { %s3217_s20 = scalar_lea.vmem [#allocation5], %s1615_s6 }
 0x258   : > { %1854 = vmatmul.lmr.bf16.gmra.16.mxu2 }
 0x260   : > { %1855 = vmatmul.lmr.bf16.gmra.16.mxu2 }
 0x268   : > { %1856 = vmatmul.lmr.bf16.gmra.16.mxu2 }
 0x270   : > { %1857 = vmatmul.lmr.bf16.gmra.16.mxu2 }
 0x278   : > { %1858 = vmatmul.lmr.bf16.gmra.16.mxu2 }
 0x27d   : > { %v869_v45 = vpop.trf.xlu0 }
 0x27e   : > { %933 = vmatmul.f32.vlgmr.msra.gmra.mxu1 %v869_v45 }
 0x280   : > { %1859 = vmatmul.lmr.bf16.gmra.16.mxu2 }
 0x285   : > { %v870_v0 = vpop.trf.xlu0 }
 0x286   : > { %936 = vmatmul.f32.gmra.mxu1 %v870_v0 }
 0x288   : > { %1860 = vmatmul.lmr.bf16.gmra.16.mxu2 }
 0x28d   : > { %v871_v11 = vpop.trf.xlu0 }
 0x28e   : > { %939 = vmatmul.f32.gmra.mxu1 %v871_v11 }
 0x290   : > { %1861 = vmatmul.lmr.bf16.gmra.16.mxu2 }
 0x295   : > { %v872_v27 = vpop.trf.xlu0 }
 0x296   : > { %942 = vmatmul.f32.gmra.mxu1 %v872_v27 }
 0x29b   : > { %v999_v63 = vpop.f32.mrf.mxu2 }
 0x29d   : > { %v873_v54 = vpop.trf.xlu0 }
 0x29e   : > { %945 = vmatmul.f32.gmra.mxu1 %v873_v54 }
 0x2a3   : > { %v1002_v20 = vpop.f32.mrf.mxu2 }
 0x2a5   : > { %v874_v24 = vpop.trf.xlu0 }
 0x2a6   : > { %948 = vmatmul.f32.gmra.mxu1 %v874_v24 }
 0x2ab   : > { %v1005_v21 = vpop.f32.mrf.mxu2 }
 0x2ad   : > { %v875_v10 = vpop.trf.xlu0 }
 0x2ae   : > { %951 = vmatmul.f32.gmra.mxu1 %v875_v10 }
 0x2b3   : > { %v1008_v49 = vpop.f32.mrf.mxu2 }
 0x2b5   : > { %v876_v38 = vpop.trf.xlu0 }
 0x2b6   : > { %954 = vmatmul.f32.gmra.mxu1 %v876_v38 }
 0x2bb   : > { %v1011_v34 = vpop.f32.mrf.mxu2 }
 0x2bd   : > { %v877_v57 = vpop.trf.xlu0 }
 0x2be   : > { %957 = vmatmul.f32.vlgmr.msra.gmra.mxu3 %v877_v57  ;;  %1746 = vmatmul.msk.f32.vlgmr.msrb.gmra.mxu1 %vm293_vm0, %v3544_v22 }
 0x2c3   : > { %v1014_v46 = vpop.f32.mrf.mxu2 }
 0x2c5   : > { %v878_v59 = vpop.trf.xlu0 }
 0x2c6   : > { %960 = vmatmul.f32.gmra.mxu3 %v878_v59  ;;  %1747 = vmatmul.msk.f32.gmra.mxu1 %vm293_vm0, %v1994_v35 }
 0x2cb   : > { %v1017_v4 = vpop.f32.mrf.mxu2 }
 0x2cd   : > { %v879_v58 = vpop.trf.xlu0 }
 0x2ce   : > { %963 = vmatmul.f32.gmra.mxu3 %v879_v58  ;;  %1748 = vmatmul.msk.f32.gmra.mxu1 %vm293_vm0, %v1995_v12 }
 0x2d3   : > { %v1020_v29 = vpop.f32.mrf.mxu2 }
 0x2d5   : > { %v880_v39 = vpop.trf.xlu0 }
 0x2d6   : > { %966 = vmatmul.f32.gmra.mxu3 %v880_v39  ;;  %1749 = vmatmul.msk.f32.gmra.mxu1 %vm293_vm0, %v1996_v40 }
 0x2db   : > { %v1023_v56 = vpop.f32.mrf.mxu2 }
 0x2dd   : > { %v881_v60 = vpop.trf.xlu0 }
 0x2de   : > { %969 = vmatmul.f32.gmra.mxu3 %v881_v60  ;;  %1750 = vmatmul.msk.f32.gmra.mxu1 %vm293_vm0, %v1997_v13 }
 0x2e3   : > { %v1026_v18 = vpop.f32.mrf.mxu2 }
 0x2e5   : > { %v882_v16 = vpop.trf.xlu0 }
 0x2e6   : > { %972 = vmatmul.f32.gmra.mxu3 %v882_v16  ;;  %1751 = vmatmul.msk.f32.gmra.mxu1 %vm293_vm0, %v1998_v17 }
 0x2eb   : > { %v1029_v48 = vpop.f32.mrf.mxu2 }
 0x2ed   : > { %v883_v3 = vpop.trf.xlu0 }
 0x2ee   : > { %975 = vmatmul.f32.gmra.mxu3 %v883_v3  ;;  %1752 = vmatmul.msk.f32.gmra.mxu1 %vm293_vm0, %v1999_v41 }
 0x2f3   : > { %v1032_v45 = vpop.f32.mrf.mxu2 }
 0x2f5   : > { %v884_v23 = vpop.trf.xlu0 }
 0x2f6   : > { %978 = vmatmul.f32.gmra.mxu3 %v884_v23  ;;  %1753 = vmatmul.msk.f32.gmra.mxu1 %vm293_vm0, %v2000_v62 }
 0x2fb   : > { %v934_v2 = vpop.f32.mrf.mxu1  ;;  %v1035_v54 = vpop.f32.mrf.mxu2 }
 0x2fc   : > { %v1000_v26 = vadd.f32 %v999_v63, %v934_v2 }
 0x2fe   : > { %1047 = vst.msk [vmem:[%s3160_s14] sm:$0xff] %vm293_vm0, %v1000_v26  ;;  %1714 = vmatmul.msk.f32.vlgmr.msrb.gmra.mxu3 %vm293_vm0, %v2001_v51  ;;  %1754 = vmatmul.msk.f32.gmra.mxu1 %vm293_vm0, %v2002_v47 }
 0x303   : > { %v937_v31 = vpop.f32.mrf.mxu1  ;;  %v1038_v22 = vpop.f32.mrf.mxu2 }
 0x304   : > { %v1003_v53 = vadd.f32 %v1002_v20, %v937_v31 }
 0x306   : > { %1048 = vst.msk [vmem:[%s3160_s14 + $0x8] sm:$0xff] %vm293_vm0, %v1003_v53  ;;  %1715 = vmatmul.msk.f32.gmra.mxu3 %vm293_vm0, %v1994_v35  ;;  %1755 = vmatmul.msk.f32.gmra.mxu1 %vm293_vm0, %v2003_v32 }
 0x30b   : > { %v940_v33 = vpop.f32.mrf.mxu1 }
 0x30c   : > { %v1006_v1 = vadd.f32 %v1005_v21, %v940_v33 }
 0x30e   : > { %1049 = vst.msk [vmem:[%s3160_s14 + $0x10] sm:$0xff] %vm293_vm0, %v1006_v1  ;;  %1716 = vmatmul.msk.f32.gmra.mxu3 %vm293_vm0, %v1995_v12  ;;  %1756 = vmatmul.msk.f32.gmra.mxu1 %vm293_vm0, %v2004_v43  ;;  %v1041_v12 = vpop.f32.mrf.mxu2 }
 0x313   : > { %v943_v6 = vpop.f32.mrf.mxu1 }
 0x314   : > { %v1009_v52 = vadd.f32 %v1008_v49, %v943_v6 }
 0x316   : > { %1050 = vst.msk [vmem:[%s3160_s14 + $0x18] sm:$0xff] %vm293_vm0, %v1009_v52  ;;  %1717 = vmatmul.msk.f32.gmra.mxu3 %vm293_vm0, %v1996_v40  ;;  %1757 = vmatmul.msk.f32.gmra.mxu1 %vm293_vm0, %v2005_v37 }
 0x31b   : > { %v946_v50 = vpop.f32.mrf.mxu1 }
 0x31c   : > { %v1012_v28 = vadd.f32 %v1011_v34, %v946_v50 }
 0x31e   : > { %1051 = vst.msk [vmem:[%s3160_s14 + $0x20] sm:$0xff] %vm293_vm0, %v1012_v28  ;;  %1718 = vmatmul.msk.f32.gmra.mxu3 %vm293_vm0, %v1997_v13  ;;  %1758 = vmatmul.msk.f32.gmra.mxu1 %vm293_vm0, %v2006_v14  ;;  %v1044_v13 = vpop.f32.mrf.mxu2 }
 0x323   : > { %v949_v5 = vpop.f32.mrf.mxu1 }
 0x324   : > { %v1015_v9 = vadd.f32 %v1014_v46, %v949_v5 }
 0x326   : > { %1052 = vst.msk [vmem:[%s3160_s14 + $0x28] sm:$0xff] %vm293_vm0, %v1015_v9  ;;  %1719 = vmatmul.msk.f32.gmra.mxu3 %vm293_vm0, %v1998_v17  ;;  %1759 = vmatmul.msk.f32.gmra.mxu1 %vm293_vm0, %v2007_v61 }
 0x32b   : > { %v952_v7 = vpop.f32.mrf.mxu1 }
 0x32c   : > { %v1018_v8 = vadd.f32 %v1017_v4, %v952_v7 }
 0x32e   : > { %1053 = vst.msk [vmem:[%s3160_s14 + $0x30] sm:$0xff] %vm293_vm0, %v1018_v8  ;;  %1720 = vmatmul.msk.f32.gmra.mxu3 %vm293_vm0, %v1999_v41  ;;  %1760 = vmatmul.msk.f32.gmra.mxu1 %vm293_vm0, %v2008_v55 }
 0x333   : > { %v955_v42 = vpop.f32.mrf.mxu1 }
 0x334   : > { %v1021_v30 = vadd.f32 %v1020_v29, %v955_v42 }
 0x336   : > { %1054 = vst.msk [vmem:[%s3160_s14 + $0x38] sm:$0xff] %vm293_vm0, %v1021_v30  ;;  %1721 = vmatmul.msk.f32.gmra.mxu3 %vm293_vm0, %v2000_v62  ;;  %1761 = vmatmul.msk.f32.gmra.mxu1 %vm293_vm0, %v2009_v36 }
 0x33b   : > { %v1145_v57 = vpop.f32.mrf.mxu1 }
 0x33c   : > { %1194 = vst [vmem:[%s3217_s20 + $0x8] sm:$0xff] %v1145_v57 }
 0x33e   : > { %1722 = vmatmul.msk.f32.gmra.mxu3 %vm293_vm0, %v2002_v47 }
 0x341   : > { %v958_v25 = vpop.f32.mrf.mxu3 }
 0x342   : > { %v1024_v19 = vadd.f32 %v1023_v56, %v958_v25 }
 0x343   : > { %v1148_v58 = vpop.f32.mrf.mxu1 }
 0x344   : > { %1055 = vst.msk [vmem:[%s3160_s14 + $0x40] sm:$0xff] %vm293_vm0, %v1024_v19 }
 0x345   : > { %1196 = vst [vmem:[%s3217_s20 + $0x18] sm:$0xff] %v1148_v58 }
 0x346   : > { %1723 = vmatmul.msk.f32.gmra.mxu3 %vm293_vm0, %v2003_v32 }
 0x349   : > { %v961_v15 = vpop.f32.mrf.mxu3 }
 0x34a   : > { %v1027_v44 = vadd.f32 %v1026_v18, %v961_v15 }
 0x34b   : > { %v1151_v60 = vpop.f32.mrf.mxu1 }
 0x34c   : > { %1056 = vst.msk [vmem:[%s3160_s14 + $0x48] sm:$0xff] %vm293_vm0, %v1027_v44 }
 0x34d   : > { %1198 = vst [vmem:[%s3217_s20 + $0x28] sm:$0xff] %v1151_v60 }
 0x34e   : > { %1724 = vmatmul.msk.f32.gmra.mxu3 %vm293_vm0, %v2004_v43 }
 0x351   : > { %v964_v0 = vpop.f32.mrf.mxu3 }
 0x352   : > { %v1030_v11 = vadd.f32 %v1029_v48, %v964_v0 }
 0x353   : > { %v1154_v17 = vpop.f32.mrf.mxu1 }
 0x354   : > { %1057 = vst.msk [vmem:[%s3160_s14 + $0x50] sm:$0xff] %vm293_vm0, %v1030_v11 }
 0x355   : > { %1200 = vst [vmem:[%s3217_s20 + $0x38] sm:$0xff] %v1154_v17 }
 0x356   : > { %1725 = vmatmul.msk.f32.gmra.mxu3 %vm293_vm0, %v2005_v37 }
 0x359   : > { %v967_v27 = vpop.f32.mrf.mxu3 }
 0x35a   : > { %v1033_v24 = vadd.f32 %v1032_v45, %v967_v27 }
 0x35b   : > { %v1157_v20 = vpop.f32.mrf.mxu1 }
 0x35c   : > { %1058 = vst.msk [vmem:[%s3160_s14 + $0x58] sm:$0xff] %vm293_vm0, %v1033_v24 }
 0x35d   : > { %1202 = vst [vmem:[%s3217_s20 + $0x48] sm:$0xff] %v1157_v20 }
 0x35e   : > { %1726 = vmatmul.msk.f32.gmra.mxu3 %vm293_vm0, %v2006_v14 }
 0x361   : > { %v970_v10 = vpop.f32.mrf.mxu3 }
 0x362   : > { %v1036_v38 = vadd.f32 %v1035_v54, %v970_v10 }
 0x363   : > { %v1160_v23 = vpop.f32.mrf.mxu1 }
 0x364   : > { %1059 = vst.msk [vmem:[%s3160_s14 + $0x60] sm:$0xff] %vm293_vm0, %v1036_v38 }
 0x365   : > { %1204 = vst [vmem:[%s3217_s20 + $0x58] sm:$0xff] %v1160_v23 }
 0x366   : > { %1727 = vmatmul.msk.f32.gmra.mxu3 %vm293_vm0, %v2007_v61 }
 0x369   : > { %v973_v59 = vpop.f32.mrf.mxu3 }
 0x36a   : > { %v1039_v35 = vadd.f32 %v1038_v22, %v973_v59 }
 0x36b   : > { %v1163_v21 = vpop.f32.mrf.mxu1 }
 0x36c   : > { %1060 = vst.msk [vmem:[%s3160_s14 + $0x68] sm:$0xff] %vm293_vm0, %v1039_v35 }
 0x36d   : > { %1206 = vst [vmem:[%s3217_s20 + $0x68] sm:$0xff] %v1163_v21 }
 0x36e   : > { %1728 = vmatmul.msk.f32.gmra.mxu3 %vm293_vm0, %v2008_v55 }
 0x371   : > { %v976_v39 = vpop.f32.mrf.mxu3 }
 0x372   : > { %v1042_v40 = vadd.f32 %v1041_v12, %v976_v39 }
 0x373   : > { %v1166_v26 = vpop.f32.mrf.mxu1 }
 0x374   : > { %1061 = vst.msk [vmem:[%s3160_s14 + $0x70] sm:$0xff] %vm293_vm0, %v1042_v40 }
 0x375   : > { %1208 = vst [vmem:[%s3217_s20 + $0x78] sm:$0xff] %v1166_v26 }
 0x376   : > { %1729 = vmatmul.msk.f32.gmra.mxu3 %vm293_vm0, %v2009_v36 }
 0x379   : > { %v979_v63 = vpop.f32.mrf.mxu3 }
 0x37a   : > { %v1045_v16 = vadd.f32 %v1044_v13, %v979_v63 }
 0x37b   : > { %v1169_v47 = vpop.f32.mrf.mxu1 }
 0x37c   : > { %1062 = vst.msk [vmem:[%s3160_s14 + $0x78] sm:$0xff] %vm293_vm0, %v1045_v16 }
 0x37d   : > { %1210 = vst [vmem:[%s3217_s20 + $0x88] sm:$0xff] %v1169_v47 }
 0x381   : > { %v1080_v3 = vpop.f32.mrf.mxu3 }
 0x382   : > { %1193 = vst [vmem:[%s3217_s20] sm:$0xff] %v1080_v3 }
 0x383   : > { %v1172_v31 = vpop.f32.mrf.mxu1 }
 0x384   : > { %1212 = vst [vmem:[%s3217_s20 + $0x98] sm:$0xff] %v1172_v31 }
 0x389   : > { %v1083_v41 = vpop.f32.mrf.mxu3 }
 0x38a   : > { %1195 = vst [vmem:[%s3217_s20 + $0x10] sm:$0xff] %v1083_v41 }
 0x38b   : > { %v1175_v32 = vpop.f32.mrf.mxu1 }
 0x38c   : > { %1214 = vst [vmem:[%s3217_s20 + $0xa8] sm:$0xff] %v1175_v32 }
 0x391   : > { %v1086_v62 = vpop.f32.mrf.mxu3 }
 0x392   : > { %1197 = vst [vmem:[%s3217_s20 + $0x20] sm:$0xff] %v1086_v62 }
 0x393   : > { %v1178_v34 = vpop.f32.mrf.mxu1 }
 0x394   : > { %1216 = vst [vmem:[%s3217_s20 + $0xb8] sm:$0xff] %v1178_v34 }
 0x399   : > { %v1089_v2 = vpop.f32.mrf.mxu3 }
 0x39a   : > { %1199 = vst [vmem:[%s3217_s20 + $0x30] sm:$0xff] %v1089_v2 }
 0x39b   : > { %v1181_v43 = vpop.f32.mrf.mxu1 }
 0x39c   : > { %1218 = vst [vmem:[%s3217_s20 + $0xc8] sm:$0xff] %v1181_v43 }
 0x3a1   : > { %v1092_v51 = vpop.f32.mrf.mxu3 }
 0x3a2   : > { %1201 = vst [vmem:[%s3217_s20 + $0x40] sm:$0xff] %v1092_v51 }
 0x3a3   : > { %v1184_v52 = vpop.f32.mrf.mxu1 }
 0x3a4   : > { %1220 = vst [vmem:[%s3217_s20 + $0xd8] sm:$0xff] %v1184_v52 }
 0x3a9   : > { %v1095_v49 = vpop.f32.mrf.mxu3 }
 0x3aa   : > { %1203 = vst [vmem:[%s3217_s20 + $0x50] sm:$0xff] %v1095_v49 }
 0x3ab   : > { %v1187_v37 = vpop.f32.mrf.mxu1 }
 0x3ac   : > { %1222 = vst [vmem:[%s3217_s20 + $0xe8] sm:$0xff] %v1187_v37 }
 0x3b1   : > { %v1098_v53 = vpop.f32.mrf.mxu3 }
 0x3b2   : > { %1205 = vst [vmem:[%s3217_s20 + $0x60] sm:$0xff] %v1098_v53 }
 0x3b3   : > { %v1190_v28 = vpop.f32.mrf.mxu1 }
 0x3b4   : > { %1224 = vst [vmem:[%s3217_s20 + $0xf8] sm:$0xff] %v1190_v28 }
 0x3b9   : > { %v1101_v33 = vpop.f32.mrf.mxu3 }
 0x3ba   : > { %1207 = vst [vmem:[%s3217_s20 + $0x70] sm:$0xff] %v1101_v33 }
 0x3c1   : > { %v1104_v1 = vpop.f32.mrf.mxu3 }
 0x3c2   : > { %1209 = vst [vmem:[%s3217_s20 + $0x80] sm:$0xff] %v1104_v1 }
 0x3c9   : > { %v1107_v6 = vpop.f32.mrf.mxu3 }
 0x3ca   : > { %1211 = vst [vmem:[%s3217_s20 + $0x90] sm:$0xff] %v1107_v6 }
 0x3d1   : > { %v1110_v46 = vpop.f32.mrf.mxu3 }
 0x3d2   : > { %1213 = vst [vmem:[%s3217_s20 + $0xa0] sm:$0xff] %v1110_v46 }
 0x3d9   : > { %v1113_v50 = vpop.f32.mrf.mxu3 }
 0x3da   : > { %1215 = vst [vmem:[%s3217_s20 + $0xb0] sm:$0xff] %v1113_v50 }
 0x3e1   : > { %v1116_v14 = vpop.f32.mrf.mxu3 }
 0x3e2   : > { %1217 = vst [vmem:[%s3217_s20 + $0xc0] sm:$0xff] %v1116_v14 }
 0x3e9   : > { %v1119_v4 = vpop.f32.mrf.mxu3 }
 0x3ea   : > { %1219 = vst [vmem:[%s3217_s20 + $0xd0] sm:$0xff] %v1119_v4 }
 0x3f1   : > { %v1122_v5 = vpop.f32.mrf.mxu3 }
 0x3f2   : > { %1221 = vst [vmem:[%s3217_s20 + $0xe0] sm:$0xff] %v1122_v5 }
 0x3f6   : > { %1240 = sbr.rel (!%p2250_p5) target bundleno = 1067 (0x42b), region = 32 }
 0x3f9   : > { %v1125_v9 = vpop.f32.mrf.mxu3 }
 0x3fa   : > { %1223 = vst [vmem:[%s3217_s20 + $0xf0] sm:$0xff] %v1125_v9 }
 0x3fb   : > { %s3560_s28 = smov (!%p1243_p11, %s1242_s28), 16 }
 0x3fc   : > { %s1765_s8 = sshll.u32 %s3560_s28, 3 }
 0x3fd   : > { %p1768_p12 = scmp.eq.s32.totalorder %s1765_s8, 0 }
 0x3fe   : > { %s3277_s9 = sshrl.u32 (!%p1768_p12), %s3560_s28, 4 }
 0x3ff   : > { %1251 = sbr.rel (%p1768_p12) target bundleno = 1067 (0x42b), region = 36  ;;  %p1769_p13 = scmp.le.s32.totalorder (!%p1768_p12), %s3277_s9, 0 }
 0x404   : > { %1548 = sbr.rel (%p1769_p13) target bundleno = 1050 (0x41a), region = 146  ;;  %s3545_s10 = smov (!%p1769_p13), %s3271_s7 }
 0x405   : > { %s3546_s13 = smov (!%p1769_p13), %s3160_s14  ;;  %s3286_s6 = smov (!%p1769_p13), 0  }
 0x406   : > { %s3288_s29 = smov (!%p1769_p13), 0  }
 0x409 LB: >> { %v1344_v61 = vld [vmem:[%s2155_s13] sm:$0xff]  ;;  %v1346_v29 = vld [vmem:[%s2155_s13 + $0x8] sm:$0xff]  ;;  %v1348_v7 = vld [vmem:[%s2155_s13 + $0x10] sm:$0xff]  ;;  %s1376_s30 = sadd.s32 1, %s2159_s6  ;;  %s1338_s29 = sadd.s32 1, %s2163_s29   ;;  %s2163_s29 = sphi %s3288_s29, %s1338_s29   ;;  %s2159_s6 = sphi %s3286_s6, %s3549_s6   ;;  %s2155_s13 = sphi %s3546_s13, %s3548_s13   ;;  %s2151_s10 = sphi %s3545_s10, %s3547_s10  }
 0x40a   : >> { %1345 = vst [vmem:[%s2151_s10] sm:$0xff] %v1344_v61  ;;  %v1350_v8 = vld [vmem:[%s2155_s13 + $0x18] sm:$0xff]  ;;  %p1377_p0 = scmp.ge.s32.totalorder %s1376_s30, %s3277_s9  ;;  %v1352_v55 = vld [vmem:[%s2155_s13 + $0x20] sm:$0xff]  ;;  %v1354_v56 = vld [vmem:[%s2155_s13 + $0x28] sm:$0xff]  ;;  %p1337_p1 = scmp.ge.s32.totalorder %s1338_s29, %s3277_s9 }
 0x40b   : >> { %1347 = vst [vmem:[%s2151_s10 + $0x8] sm:$0xff] %v1346_v29  ;;  %v1356_v42 = vld [vmem:[%s2155_s13 + $0x30] sm:$0xff]  ;;  %v1358_v30 = vld [vmem:[%s2155_s13 + $0x38] sm:$0xff]  ;;  %v1360_v36 = vld [vmem:[%s2155_s13 + $0x40] sm:$0xff] }
 0x40c   : >> { %1349 = vst [vmem:[%s2151_s10 + $0x10] sm:$0xff] %v1348_v7  ;;  %s3562_s30 = smov (%p1377_p0, %s1376_s30), 0  ;;  %v1362_v18 = vld [vmem:[%s2155_s13 + $0x48] sm:$0xff]  ;;  %v1364_v25 = vld [vmem:[%s2155_s13 + $0x50] sm:$0xff]  ;;  %v1366_v19 = vld [vmem:[%s2155_s13 + $0x58] sm:$0xff] }
 0x40d   : >> { %1351 = vst [vmem:[%s2151_s10 + $0x18] sm:$0xff] %v1350_v8  ;;  %s1770_s5 = sshll.u32 %s3562_s30, 7  ;;  %v1368_v48 = vld [vmem:[%s2155_s13 + $0x60] sm:$0xff]  ;;  %v1370_v15 = vld [vmem:[%s2155_s13 + $0x68] sm:$0xff]  ;;  %v1372_v44 = vld [vmem:[%s2155_s13 + $0x70] sm:$0xff] }
 0x40e   : >> { %1353 = vst [vmem:[%s2151_s10 + $0x20] sm:$0xff] %v1352_v55  ;;  %s1381_s8 = scalar_lea.vmem %s3160_s14, %s1770_s5 [#allocation2]   ;;  %s1382_s6 = scalar_lea.vmem %s3271_s7, %s1770_s5   ;;  %v1374_v45 = vld [vmem:[%s2155_s13 + $0x78] sm:$0xff] }
 0x40f   : >> { %1355 = vst [vmem:[%s2151_s10 + $0x28] sm:$0xff] %v1354_v56  ;;  %s3548_s13 = smov %s1381_s8 }
 0x410   : >> { %1357 = vst [vmem:[%s2151_s10 + $0x30] sm:$0xff] %v1356_v42 }
 0x411   : >> { %1359 = vst [vmem:[%s2151_s10 + $0x38] sm:$0xff] %v1358_v30 }
 0x412   : >> { %1361 = vst [vmem:[%s2151_s10 + $0x40] sm:$0xff] %v1360_v36 }
 0x413   : >> { %1363 = vst [vmem:[%s2151_s10 + $0x48] sm:$0xff] %v1362_v18 }
 0x414   : >> { %1365 = vst [vmem:[%s2151_s10 + $0x50] sm:$0xff] %v1364_v25 }
 0x415   : >> { %1367 = vst [vmem:[%s2151_s10 + $0x58] sm:$0xff] %v1366_v19  ;;  %1340 = sbr.rel (!%p1337_p1) target bundleno = 1033 (0x409), region = 152 }
 0x416   : >> { %1369 = vst [vmem:[%s2151_s10 + $0x60] sm:$0xff] %v1368_v48 }
 0x417   : >> { %1371 = vst [vmem:[%s2151_s10 + $0x68] sm:$0xff] %v1370_v15 }
 0x418   : >> { %1373 = vst [vmem:[%s2151_s10 + $0x70] sm:$0xff] %v1372_v44 }
 0x419   : >> { %1375 = vst [vmem:[%s2151_s10 + $0x78] sm:$0xff] %v1374_v45  ;;  %s3547_s10 = smov %s1382_s6  ;;  %s3549_s6 = smov %s3562_s30 }
 0x41a PF: > { %s3350_s5 = sand.u32 15, %s3560_s28   ;;  %s1789_s23 = sshll.u32 %s3277_s9, 7 }
 0x41b   : > { %s1387_s22 = scalar_lea.vmem %s3160_s14, %s1789_s23 [#allocation2]   ;;  %s1389_s12 = scalar_lea.vmem %s3271_s7, %s1789_s23  }
 0x41c   : > { %p1775_p2 = scmp.le.s32.totalorder %s3350_s5, 0 }
 0x41d   : > { %s2165_s0 = smov (!%p1775_p2), %s1389_s12   ;;  %s2169_s8 = smov (!%p1775_p2), %s1387_s22  }
 0x41e   : > { %1562 = sbr.rel (%p1775_p2) target bundleno = 1067 (0x42b), region = 157  ;;  %s2173_s1 = smov (!%p1775_p2), 0  }
 0x41f   : > { %s2177_s30 = smov (!%p1775_p2), 0  }
 0x423 LB: >> { %v1399_v0 = vld [vmem:[%s2171_s8] sm:$0xff]  ;;  %s1401_s28 = sadd.s32 1, %s2175_s1  ;;  %s1393_s30 = sadd.s32 1, %s2179_s30   ;;  %s2179_s30 = sphi %s2177_s30, %s1393_s30   ;;  %s2175_s1 = sphi %s2173_s1, %s2174_s1   ;;  %s2171_s8 = sphi %s2169_s8, %s1406_s8   ;;  %s2167_s0 = sphi %s2165_s0, %s1407_s0  }
 0x424   : >> { %1400 = vst [vmem:[%s2167_s0] sm:$0xff] %v1399_v0  ;;  %p1402_p3 = scmp.ge.s32.totalorder %s1401_s28, %s3350_s5  ;;  %p1392_p4 = scmp.ge.s32.totalorder %s1393_s30, %s3350_s5 }
 0x426   : >> { %s3564_s28 = smov (%p1402_p3, %s1401_s28), 0  ;;  %1395 = sbr.rel (!%p1392_p4) target bundleno = 1059 (0x423), region = 163 }
 0x427   : >> { %s1776_s14 = sshll.u32 %s3564_s28, 3  ;;  %s2174_s1 = smov %s3564_s28  }
 0x428   : >> { %s1406_s8 = scalar_lea.vmem %s1387_s22, %s1776_s14 [#allocation2]   ;;  %s1407_s0 = scalar_lea.vmem %s1389_s12, %s1776_s14  }
 0x42b PF: > { %s1416_s7 = scalar_lea.hbm %s3440_s3, %s2233_s19  ;;  %s3550_s9 = scalar_lea.vmem [#allocation3], %s3075_s11 }
 0x42c   : > { %s1418_s10 = sshll.u32 %s3550_s9, 4  ;;  %s1420_s13 = sshll.u32 %s1416_s7, 4  ;;  %s1419_s10 = int_to_ptr.vmem [resolvable:$true] %s1418_s10  ;;  %s1421_s13 = int_to_ptr.hbm [resolvable:$true] %s1420_s13 }
 0x42d   : > { %s2024_s0 = sshra.s32 %s1421_s13, 4  ;;  %s2030_s6 = scalar_lea.hbm %s3440_s3, 3  ;;  %s2025_s0 = int_to_ptr.hbm [resolvable:$true] %s2024_s0 }
 0x42e   : > { %s2026_s29 = scalar_lea.hbm %s2025_s0, 1  ;;  %p2031_p10 = scmp.lt.s32.totalorder %s2025_s0, %s3440_s3 }
 0x42f   : > { %p2027_p7 = scmp.ne.s32.totalorder %s2025_s0, %s2026_s29  ;;  %p2032_p11 = scmp.lt.s32.totalorder %s2030_s6, %s2026_s29 }
 0x431   : > { %p2028_p8 = pnand %p2027_p7, %p2250_p5  ;;  %p2033_p12 = por %p2032_p11, %p2031_p10 }
 0x433   : > { %p2029_p9 = pneg %p2028_p8 }
 0x435   : > { %p2034_p13 = pnand %p2033_p12, %p2029_p9 }
 0x437   : > { %2037 = shalt.err (!%p2034_p13)
}
 0x438   : > { %s3551_s30 = scalar_lea.sflag [#allocation4], %s3075_s11  ;;  %1426 = sbr.rel (!%p2250_p5) target bundleno = 1117 (0x45d), region = 88 }
 0x439   : > { %1883 = dma.vmem_to_hbm [thread:$0]  (%p2250_p5), %s1419_s10, 16, %s1421_s13, %s3551_s30  }
 0x43a   : > { %s1428_s28 = ssub.s32 (%p2250_p5), 40, %s2261_s27  ;;  %s3552_s7 = scalar_lea.sflag (%p2250_p5), [#allocation6], %s3075_s11 }
 0x43b   : > { %p1429_p0 = scmp.lt.s32.totalorder (%p2250_p5), %s1428_s28, 16 }
 0x43d   : > { %s3566_s28 = smov (!%p1429_p0, %s1428_s28), 16 }
 0x43e   : > { %s1791_s14 = sshll.u32 %s3566_s28, 4 }
 0x43f   : > { %s1433_s23 = ssub.s32 256, %s1791_s14 }
 0x440   : > { %s1434_s1 = sshll.u32 %s1433_s23, 4 }
 0x441   : > { %1435 = vsyncadd %s3552_s7, %s1434_s1  ;;  %p3384_p1 = scmp.ne.s32.totalorder %s1791_s14, 0  ;;  %s1793_s25 = sshll.u32 %s2233_s19, 8 }
 0x442   : > { %s1439_s13 = scalar_lea.hbm %s3441_s4, %s1793_s25  ;;  %s1441_s0 = sshll.u32 %s3217_s20, 4  ;;  %s3393_s0 = int_to_ptr.vmem [resolvable:$true] %s1441_s0 }
 0x443   : > { %s1443_s29 = sshll.u32 %s1439_s13, 4  ;;  %s1785_s12 = sshll.u32 %s3566_s28, 8  ;;  %s3395_s29 = int_to_ptr.hbm [resolvable:$true] %s1443_s29 }
 0x444   : > { %s2038_s22 = sshra.s32 %s3393_s0, 4  ;;  %s2040_s6 = sshrl.u32 %s1785_s12, 4  ;;  %s2039_s22 = int_to_ptr.vmem [resolvable:$true] %s2038_s22 }
 0x445   : > { %s2045_s5 = scalar_lea.vmem %s2039_s22, %s2040_s6  ;;  %s2183_s19 = smov [#allocation5]  }
 0x446   : > { %p2046_p5 = scmp.ne.s32.totalorder %s2039_s22, %s2045_s5  ;;  %s2049_s8 = scalar_lea.vmem %s2183_s19, 512 }
 0x447   : > { %p2051_p4 = scmp.lt.s32.totalorder %s2049_s8, %s2045_s5 }
 0x448   : > { %p2047_p2 = pnand %p2046_p5, %p3384_p1 }
 0x44a   : > { %p2048_p3 = pneg %p2047_p2 }
 0x44c   : > { %p2053_p7 = pnand %p2051_p4, %p2048_p3 }
 0x44e   : > { %2056 = shalt.err (!%p2053_p7)
}
 0x44f   : > { %s2057_s20 = sshra.s32 %s3395_s29, 4  ;;  %s2068_s1 = scalar_lea.hbm %s3441_s4, 640  ;;  %s2058_s20 = int_to_ptr.hbm [resolvable:$true] %s2057_s20 }
 0x450   : > { %s2064_s30 = scalar_lea.hbm %s2058_s20, %s2040_s6  ;;  %p2069_p11 = scmp.lt.s32.totalorder %s2058_s20, %s3441_s4 }
 0x451   : > { %p2065_p8 = scmp.ne.s32.totalorder %s2058_s20, %s2064_s30  ;;  %p2070_p12 = scmp.lt.s32.totalorder %s2068_s1, %s2064_s30 }
 0x453   : > { %p2066_p9 = pnand %p2065_p8, %p3384_p1  ;;  %p2071_p13 = por %p2070_p12, %p2069_p11 }
 0x455   : > { %p2067_p10 = pneg %p2066_p9 }
 0x457   : > { %p2072_p0 = pnand %p2071_p13, %p2067_p10 }
 0x459   : > { %2075 = shalt.err (!%p2072_p0)
}
 0x45a   : > { %s2184_s27 = smov 256   ;;  %s2185_s10 = smov 16  }
 0x45b   : > { %s3554_s13 = scalar_lea.sflag [#allocation6], %s3075_s11 }
 0x45c   : > { %1449 = dma.vmem_to_hbm [thread:$0]  (%p3384_p1), %s3393_s0, %s1785_s12, %s3395_s29, %s3554_s13, %s2184_s27, %s2184_s27, %s2185_s10  }
 0x45d PF: > { %p1893_p5 = scmp.ge.s32.totalorder %s2147_s18, 2  ;;  %s1465_s22 = sand.u32 1, %s2135_s15  }
 0x45e   : > { %s1466_s6 = scalar_lea.sflag [#allocation4], %s1465_s22 }
 0x45f   : > { %p1887_p2 = pnand %p1893_p5, %p2254_p6 }
 0x461   : > { %p1888_p3 = pneg %p1887_p2 }
 0x463   : > { %2126 = dma.done.wait (%p1888_p3), %s1466_s6, 16  }
 0x464   : > { %2128 = vsyncadd (%p1888_p3), %s1466_s6, 4294967280  ;;  %s1475_s5 = scalar_lea.sflag [#allocation6], %s1465_s22 }
 0x465   : > { %2130 = dma.done.wait (%p1888_p3), %s1475_s5, 4096  }
 0x466   : > { %2132 = vsyncadd (%p1888_p3), %s1475_s5, 4294963200  ;;  %p18_p1 = scmp.ge.s32.totalorder %s2237_s21, 5   ;;  %s3555_s15 = smov %s2139_s16 }
 0x467   : > { %s3556_s16 = smov %s2143_s17  ;;  %s3557_s17 = smov %s2248_s24 }
 0x468   : > { %s3558_s18 = smov %s2237_s21  ;;  %20 = sbr.rel (!%p18_p1) target bundleno = 8 (0x8), region = 174 }
 0x46d   :  { %1481 = vsyncpa [#allocation4], 1 }
 0x46e   :  { %1483 = vsyncpa [#allocation4 + $0x1], 1 }
 0x46f   :  { %1484 = vsyncpa [#allocation6], 1 }
 0x470   :  { %1486 = vsyncpa [#allocation6 + $0x1], 1 }

// kernel: tpu_custom_call.1
= control target key start
LH: loop header
LB: loop body
LE: loop exit
PB: predicated region body
PF: predicated region fallthrough
CT: control target
= control target key end

     0   :  { %s3437_s0 = inlined_call_operand.vmem [shape: f32[320,32], index: 0, kind: input, shape index: {}]   ;;  %s3438_s1 = inlined_call_operand.vmem [shape: f32[256,33], index: 1, kind: input, shape index: {}]   ;;  %s3439_s2 = inlined_call_operand.vmem [shape: f32[320,32], index: 2, kind: output, shape index: {0}]   ;;  %s3440_s3 = inlined_call_operand.hbm [shape: s32[1,320], index: 3, kind: output, shape index: {1}]   ;;  %s3441_s4 = inlined_call_operand.hbm [shape: f32[320,256], index: 4, kind: output, shape index: {2}]  }
   0x1   :  { %3457 = sst [smem:[#allocation17_spill]] %s3437_s0 }
   0x2   :  { %3458 = sst [smem:[#allocation18_spill]] %s3438_s1 }
   0x3   :  { %10 = vsyncpa [#allocation4], 0 }
   0x4   :  { %12 = vsyncpa [#allocation4 + $0x1], 0 }
   0x5   :  { %13 = vsyncpa [#allocation6], 0 }
   0x6   :  { %15 = vsyncpa [#allocation6 + $0x1], 0  ;;  %s2212_s15 = smov 0   ;;  %s2214_s16 = smov 0  }
   0x7   :  { %s2216_s17 = smov 0   ;;  %s2218_s18 = smov 0  }
   0x8 LB: > { %s2233_s19 = sadd.s32 4294967295, %s2147_s18   ;;  %s1610_s20 = sadd.s32 4294967294, %s2147_s18   ;;  %s2147_s18 = sphi %s2218_s18, %s3558_s18   ;;  %s2143_s17 = sphi %s2216_s17, %s3557_s17   ;;  %s2139_s16 = sphi %s2214_s16, %s3556_s16   ;;  %s2135_s15 = sphi %s2212_s15, %s3555_s15  }
   0x9   : > { %s2237_s21 = sadd.s32 1, %s2147_s18   ;;  %s75_s22 = sadd.s32 1, %s2143_s17 }
   0xa   : > { %s72_s23 = ssub.s32 %s2147_s18, %s2237_s21  ;;  %p85_p0 = scmp.ne.s32.totalorder %s2143_s17, %s2139_s16 }
   0xb   : > { %p73_p1 = scmp.eq.s32.totalorder %s72_s23, 0  ;;  %p86_p2 = scmp.eq.s32.totalorder %s2233_s19, 2 }
   0xc   : > { %p117_p3 = scmp.ne.s32.totalorder %s2139_s16, %s2135_s15  ;;  %p118_p4 = scmp.eq.s32.totalorder %s1610_s20, 2 }
   0xd   : > { %s2248_s24 = scalar_select %p73_p1, %s2143_s17, %s75_s22  }
   0xe   : > { %p2250_p5 = por %p86_p2, %p85_p0  ;;  %p2254_p6 = por %p118_p4, %p117_p3 }
   0xf   : > { %p1613_p7 = scmp.ge.s32.totalorder %s2147_s18, 1  ;;  %p182_p8 = scmp.lt.s32.totalorder %s2147_s18, 4 }
  0x11   : > { %p183_p9 = pnand %p1613_p7, %p182_p8 }
  0x13   : > { %186 = sbr.rel (%p183_p9) target bundleno = 1117 (0x45d), region = 28 }
  0x18   : > { %s2261_s27 = sshll.u32 %s2233_s19, 4  ;;  %vm293_vm0 = vcmask 261120   ;;  %s3461_s0 = sld [smem:[#allocation17_spill]] }
  0x19   : > { %p225_p10 = scmp.lt.s32.totalorder %s2261_s27, 39  ;;  %s3463_s1 = sld [smem:[#allocation18_spill]] }
  0x1a   : > { %s3075_s11 = sand.u32 1, %s2139_s16  }
  0x1b   : > { %s226_s28 = scalar_select %p225_p10, %s2261_s27, 39 }
  0x1c   : > { %s3456_s12 = scalar_lea.vmem [#allocation3], %s3075_s11  ;;  %s1614_s13 = sshll.u32 %s3075_s11, 7 }
  0x1d   : > { %s1617_s29 = sshll.u32 %s226_s28, 3  ;;  %s3160_s14 = scalar_lea.vmem [#allocation2], %s1614_s13  }
  0x1e   : > { %s2268_s6 = scalar_lea.vmem %s3461_s0, %s1617_s29  ;;  %s1242_s28 = ssub.s32 (%p2250_p5), 40, %s2261_s27 }
  0x1f   : > { %v260_v0 = vld [vmem:[%s2268_s6 + $0x78] sm:$0xff]  ;;  %v259_v1 = vld [vmem:[%s2268_s6 + $0x70] sm:$0xff]  ;;  %v258_v2 = vld [vmem:[%s2268_s6 + $0x68] sm:$0xff]  ;;  %s1788_s29 = sshll.u32 (%p2250_p5), %s2233_s19, 7  ;;  %p1243_p11 = scmp.lt.s32.totalorder (%p2250_p5), %s1242_s28, 16 }
  0x20   : > { %1618 = vmatpush.xpose.msk.msra.mxu0 %vm293_vm0, %v260_v0  ;;  %1794 = vmatpush.xpose.msk.msra.mxu2 %vm293_vm0, %v260_v0  ;;  %v257_v3 = vld [vmem:[%s2268_s6 + $0x60] sm:$0xff]  ;;  %v256_v4 = vld [vmem:[%s2268_s6 + $0x58] sm:$0xff]  ;;  %v255_v5 = vld [vmem:[%s2268_s6 + $0x50] sm:$0xff]  ;;  %s3271_s7 = scalar_lea.vmem (%p2250_p5), %s3439_s2, %s1788_s29  }
  0x21   : > { %v254_v6 = vld [vmem:[%s2268_s6 + $0x48] sm:$0xff]  ;;  %v253_v7 = vld [vmem:[%s2268_s6 + $0x40] sm:$0xff]  ;;  %v252_v8 = vld [vmem:[%s2268_s6 + $0x38] sm:$0xff] }
  0x22   : > { %v251_v9 = vld [vmem:[%s2268_s6 + $0x30] sm:$0xff]  ;;  %v250_v10 = vld [vmem:[%s2268_s6 + $0x28] sm:$0xff]  ;;  %v249_v11 = vld [vmem:[%s2268_s6 + $0x20] sm:$0xff] }
  0x23   : > { %v248_v12 = vld [vmem:[%s2268_s6 + $0x18] sm:$0xff]  ;;  %v247_v13 = vld [vmem:[%s2268_s6 + $0x10] sm:$0xff]  ;;  %v246_v14 = vld [vmem:[%s2268_s6 + $0x8] sm:$0xff] }
  0x24   : > { %1619 = vmatpush.xpose.msk.msra.mxu0 %vm293_vm0, %v259_v1  ;;  %1795 = vmatpush.xpose.msk.msra.mxu2 %vm293_vm0, %v259_v1  ;;  %v2316_v15 = vld [vmem:[%s2268_s6] sm:$0xff]  ;;  %v2332_v17 = vld [vmem:[%s3463_s1 + $0x8] sm:$0xff]  ;;  %v2339_v18 = vld [vmem:[%s3463_s1 + $0x10] sm:$0xff] }
  0x25   : > { %3462 = vst [vmem:[#allocation9_spill] sm:$0xff] %v2316_v15  ;;  %v2323_v16 = vld [vmem:[%s3463_s1] sm:$0xff]  ;;  %v2346_v19 = vld [vmem:[%s3463_s1 + $0x18] sm:$0xff]  ;;  %v2360_v21 = vld [vmem:[%s3463_s1 + $0x28] sm:$0xff] }
  0x26   : > { %v2353_v20 = vld [vmem:[%s3463_s1 + $0x20] sm:$0xff]  ;;  %v2367_v22 = vld [vmem:[%s3463_s1 + $0x30] sm:$0xff]  ;;  %v2374_v23 = vld [vmem:[%s3463_s1 + $0x38] sm:$0xff] }
  0x27   : > { %v2379_v24 = vld [vmem:[%s3463_s1 + $0xb8] sm:$0xff]  ;;  %v2388_v25 = vld [vmem:[%s3463_s1 + $0x40] sm:$0xff]  ;;  %v2402_v27 = vld [vmem:[%s3463_s1 + $0x48] sm:$0xff] }
  0x28   : > { %1620 = vmatpush.xpose.msk.msra.mxu0 %vm293_vm0, %v258_v2  ;;  %1796 = vmatpush.xpose.msk.msra.mxu2 %vm293_vm0, %v258_v2  ;;  %v2393_v26 = vld [vmem:[%s3463_s1 + $0xc0] sm:$0xff]  ;;  %v2407_v28 = vld [vmem:[%s3463_s1 + $0xc8] sm:$0xff]  ;;  %v2416_v29 = vld [vmem:[%s3463_s1 + $0x50] sm:$0xff] }
  0x29   : > { %v2421_v30 = vld [vmem:[%s3463_s1 + $0xd0] sm:$0xff]  ;;  %v276_v31 = vld [vmem:[%s3463_s1 + $0x78] sm:$0xff]  ;;  %v274_v33 = vld [vmem:[%s3463_s1 + $0x68] sm:$0xff] }
  0x2a   : > { %917 = vmatpush.msra.mxu1 %v276_v31  ;;  %1810 = vmatpush.msra.mxu3 %v276_v31  ;;  %v275_v32 = vld [vmem:[%s3463_s1 + $0x70] sm:$0xff]  ;;  %v272_v34 = vld [vmem:[%s3463_s1 + $0x58] sm:$0xff]  ;;  %v273_v35 = vld [vmem:[%s3463_s1 + $0x60] sm:$0xff] }
  0x2b   : > { %v2445_v36 = vld [vmem:[%s3463_s1 + $0xd8] sm:$0xff]  ;;  %v289_v37 = vld [vmem:[%s3463_s1 + $0xe0] sm:$0xff]  ;;  %v290_v38 = vld [vmem:[%s3463_s1 + $0xe8] sm:$0xff] }
  0x2c   : > { %1621 = vmatpush.xpose.msk.msra.mxu0 %vm293_vm0, %v257_v3  ;;  %1797 = vmatpush.xpose.msk.msra.mxu2 %vm293_vm0, %v257_v3  ;;  %v291_v39 = vld [vmem:[%s3463_s1 + $0xf0] sm:$0xff]  ;;  %v292_v40 = vld [vmem:[%s3463_s1 + $0xf8] sm:$0xff]  ;;  %v277_v42 = vld [vmem:[%s3463_s1 + $0x80] sm:$0xff] }
  0x2d   : > { %918 = vmatpush.msra.mxu1 %v275_v32  ;;  %1811 = vmatpush.msra.mxu3 %v275_v32  ;;  %v278_v44 = vld [vmem:[%s3463_s1 + $0x88] sm:$0xff]  ;;  %v279_v46 = vld [vmem:[%s3463_s1 + $0x90] sm:$0xff]  ;;  %v281_v49 = vld [vmem:[%s3463_s1 + $0xa0] sm:$0xff] }
  0x2e   : > { %v283_v47 = vld [vmem:[%s3463_s1 + $0xb0] sm:$0xff]  ;;  %v282_v48 = vld [vmem:[%s3463_s1 + $0xa8] sm:$0xff]  ;;  %v280_v50 = vld [vmem:[%s3463_s1 + $0x98] sm:$0xff] }
  0x2f   : > { %919 = vmatpush.msra.mxu1 %v274_v33  ;;  %1812 = vmatpush.msra.mxu3 %v274_v33 }
  0x30   : > { %1622 = vmatpush.xpose.msk.msra.mxu0 %vm293_vm0, %v256_v4  ;;  %1798 = vmatpush.xpose.msk.msra.mxu2 %vm293_vm0, %v256_v4 }
  0x31   : > { %920 = vmatpush.msra.mxu1 %v273_v35  ;;  %1813 = vmatpush.msra.mxu3 %v273_v35 }
  0x33   : > { %921 = vmatpush.msra.mxu1 %v272_v34  ;;  %1814 = vmatpush.msra.mxu3 %v272_v34 }
  0x34   : > { %1623 = vmatpush.xpose.msk.msra.mxu0 %vm293_vm0, %v255_v5  ;;  %1799 = vmatpush.xpose.msk.msra.mxu2 %vm293_vm0, %v255_v5 }
  0x35   : > { %922 = vmatpush.msra.mxu1 %v2416_v29  ;;  %1815 = vmatpush.msra.mxu3 %v2416_v29 }
  0x37   : > { %923 = vmatpush.msra.mxu1 %v2402_v27  ;;  %1816 = vmatpush.msra.mxu3 %v2402_v27 }
  0x38   : > { %1624 = vmatpush.xpose.msk.msra.mxu0 %vm293_vm0, %v254_v6  ;;  %1800 = vmatpush.xpose.msk.msra.mxu2 %vm293_vm0, %v254_v6 }
  0x39   : > { %924 = vmatpush.msra.mxu1 %v2388_v25  ;;  %1817 = vmatpush.msra.mxu3 %v2388_v25 }
  0x3b   : > { %925 = vmatpush.msra.mxu1 %v2374_v23  ;;  %1818 = vmatpush.msra.mxu3 %v2374_v23 }
  0x3c   : > { %1625 = vmatpush.xpose.msk.msra.mxu0 %vm293_vm0, %v253_v7  ;;  %1801 = vmatpush.xpose.msk.msra.mxu2 %vm293_vm0, %v253_v7 }
  0x3d   : > { %926 = vmatpush.msra.mxu1 %v2367_v22  ;;  %1819 = vmatpush.msra.mxu3 %v2367_v22 }
  0x3f   : > { %927 = vmatpush.msra.mxu1 %v2360_v21  ;;  %1820 = vmatpush.msra.mxu3 %v2360_v21 }
  0x40   : > { %1626 = vmatpush.xpose.msk.msra.mxu0 %vm293_vm0, %v252_v8  ;;  %1802 = vmatpush.xpose.msk.msra.mxu2 %vm293_vm0, %v252_v8 }
  0x41   : > { %928 = vmatpush.msra.mxu1 %v2353_v20  ;;  %1821 = vmatpush.msra.mxu3 %v2353_v20 }
  0x43   : > { %929 = vmatpush.msra.mxu1 %v2346_v19  ;;  %1822 = vmatpush.msra.mxu3 %v2346_v19 }
  0x44   : > { %1627 = vmatpush.xpose.msk.msra.mxu0 %vm293_vm0, %v251_v9  ;;  %1803 = vmatpush.xpose.msk.msra.mxu2 %vm293_vm0, %v251_v9 }
  0x45   : > { %930 = vmatpush.msra.mxu1 %v2339_v18  ;;  %1823 = vmatpush.msra.mxu3 %v2339_v18 }
  0x47   : > { %931 = vmatpush.msra.mxu1 %v2332_v17  ;;  %1824 = vmatpush.msra.mxu3 %v2332_v17 }
  0x48   : > { %1628 = vmatpush.xpose.msk.msra.mxu0 %vm293_vm0, %v250_v10  ;;  %1804 = vmatpush.xpose.msk.msra.mxu2 %vm293_vm0, %v250_v10 }
  0x49   : > { %932 = vmatpush.msra.mxu1 %v2323_v16  ;;  %1825 = vmatpush.msra.mxu3 %v2323_v16 }
  0x4b   : > { %1698 = vmatpush.xpose.msk.msrb.mxu3 %vm293_vm0, %v276_v31  ;;  %1730 = vmatpush.xpose.msk.msrb.mxu1 %vm293_vm0, %v292_v40 }
  0x4c   : > { %1629 = vmatpush.xpose.msk.msra.mxu0 %vm293_vm0, %v249_v11  ;;  %1805 = vmatpush.xpose.msk.msra.mxu2 %vm293_vm0, %v249_v11 }
  0x4f   : > { %1699 = vmatpush.xpose.msk.msrb.mxu3 %vm293_vm0, %v275_v32  ;;  %1731 = vmatpush.xpose.msk.msrb.mxu1 %vm293_vm0, %v291_v39 }
  0x50   : > { %1630 = vmatpush.xpose.msk.msra.mxu0 %vm293_vm0, %v248_v12  ;;  %1806 = vmatpush.xpose.msk.msra.mxu2 %vm293_vm0, %v248_v12 }
  0x53   : > { %1700 = vmatpush.xpose.msk.msrb.mxu3 %vm293_vm0, %v274_v33  ;;  %1732 = vmatpush.xpose.msk.msrb.mxu1 %vm293_vm0, %v290_v38 }
  0x54   : > { %1631 = vmatpush.xpose.msk.msra.mxu0 %vm293_vm0, %v247_v13  ;;  %1807 = vmatpush.xpose.msk.msra.mxu2 %vm293_vm0, %v247_v13 }
  0x57   : > { %1701 = vmatpush.xpose.msk.msrb.mxu3 %vm293_vm0, %v273_v35  ;;  %1733 = vmatpush.xpose.msk.msrb.mxu1 %vm293_vm0, %v289_v37 }
  0x58   : > { %1632 = vmatpush.xpose.msk.msra.mxu0 %vm293_vm0, %v246_v14  ;;  %1808 = vmatpush.xpose.msk.msra.mxu2 %vm293_vm0, %v246_v14 }
  0x5b   : > { %1702 = vmatpush.xpose.msk.msrb.mxu3 %vm293_vm0, %v272_v34  ;;  %1734 = vmatpush.xpose.msk.msrb.mxu1 %vm293_vm0, %v2445_v36 }
  0x5c   : > { %1633 = vmatpush.xpose.msk.msra.mxu0 %vm293_vm0, %v2316_v15  ;;  %1809 = vmatpush.xpose.msk.msra.mxu2 %vm293_vm0, %v2316_v15 }
  0x5f   : > { %1634 = vmatmul.msk.f32.vlgmr.msra.gmra.mxu0 %vm293_vm0, %v2323_v16  ;;  %1657 = vmatmul.msk.f32.vlgmr.msra.gmra.mxu2 %vm293_vm0, %v2379_v24 }
  0x60   : > { %982 = vmatpush.msra.mxu2 %v292_v40  ;;  %1703 = vmatpush.xpose.msk.msrb.mxu3 %vm293_vm0, %v2416_v29 }
  0x61   : > { %1735 = vmatpush.xpose.msk.msrb.mxu1 %vm293_vm0, %v2421_v30 }
  0x62   : > { %983 = vmatpush.msra.mxu2 %v291_v39 }
  0x64   : > { %984 = vmatpush.msra.mxu2 %v290_v38  ;;  %1704 = vmatpush.xpose.msk.msrb.mxu3 %vm293_vm0, %v2402_v27 }
  0x65   : > { %1736 = vmatpush.xpose.msk.msrb.mxu1 %vm293_vm0, %v2407_v28 }
  0x66   : > { %985 = vmatpush.msra.mxu2 %v289_v37 }
  0x67   : > { %1635 = vmatmul.msk.f32.gmra.mxu0 %vm293_vm0, %v2332_v17  ;;  %1658 = vmatmul.msk.f32.gmra.mxu2 %vm293_vm0, %v2393_v26 }
  0x68   : > { %986 = vmatpush.msra.mxu2 %v2445_v36  ;;  %1705 = vmatpush.xpose.msk.msrb.mxu3 %vm293_vm0, %v2388_v25 }
  0x69   : > { %1737 = vmatpush.xpose.msk.msrb.mxu1 %vm293_vm0, %v2393_v26 }
  0x6a   : > { %987 = vmatpush.msra.mxu2 %v2421_v30 }
  0x6c   : > { %988 = vmatpush.msra.mxu2 %v2407_v28  ;;  %1706 = vmatpush.xpose.msk.msrb.mxu3 %vm293_vm0, %v2374_v23 }
  0x6d   : > { %1738 = vmatpush.xpose.msk.msrb.mxu1 %vm293_vm0, %v2379_v24 }
  0x6e   : > { %989 = vmatpush.msra.mxu2 %v2393_v26 }
  0x6f   : > { %1636 = vmatmul.msk.f32.gmra.mxu0 %vm293_vm0, %v2339_v18  ;;  %1659 = vmatmul.msk.f32.gmra.mxu2 %vm293_vm0, %v2407_v28 }
  0x70   : > { %990 = vmatpush.msra.mxu2 %v2379_v24  ;;  %1707 = vmatpush.xpose.msk.msrb.mxu3 %vm293_vm0, %v2367_v22 }
  0x71   : > { %1739 = vmatpush.xpose.msk.msrb.mxu1 %vm293_vm0, %v283_v47 }
  0x72   : > { %991 = vmatpush.msra.mxu2 %v283_v47 }
  0x74   : > { %992 = vmatpush.msra.mxu2 %v282_v48  ;;  %1708 = vmatpush.xpose.msk.msrb.mxu3 %vm293_vm0, %v2360_v21 }
  0x75   : > { %1740 = vmatpush.xpose.msk.msrb.mxu1 %vm293_vm0, %v282_v48 }
  0x76   : > { %993 = vmatpush.msra.mxu2 %v281_v49 }
  0x77   : > { %1637 = vmatmul.msk.f32.gmra.mxu0 %vm293_vm0, %v2346_v19  ;;  %1660 = vmatmul.msk.f32.gmra.mxu2 %vm293_vm0, %v2421_v30 }
  0x78   : > { %994 = vmatpush.msra.mxu2 %v280_v50  ;;  %1709 = vmatpush.xpose.msk.msrb.mxu3 %vm293_vm0, %v2353_v20 }
  0x79   : > { %1741 = vmatpush.xpose.msk.msrb.mxu1 %vm293_vm0, %v281_v49 }
  0x7a   : > { %995 = vmatpush.msra.mxu2 %v279_v46 }
  0x7c   : > { %996 = vmatpush.msra.mxu2 %v278_v44  ;;  %1710 = vmatpush.xpose.msk.msrb.mxu3 %vm293_vm0, %v2346_v19 }
  0x7d   : > { %1742 = vmatpush.xpose.msk.msrb.mxu1 %vm293_vm0, %v280_v50 }
  0x7e   : > { %997 = vmatpush.msra.mxu2 %v277_v42 }
  0x7f   : > { %1638 = vmatmul.msk.f32.gmra.mxu0 %vm293_vm0, %v2353_v20  ;;  %1661 = vmatmul.msk.f32.gmra.mxu2 %vm293_vm0, %v2445_v36 }
  0x80   : > { %1711 = vmatpush.xpose.msk.msrb.mxu3 %vm293_vm0, %v2339_v18 }
  0x81   : > { %1743 = vmatpush.xpose.msk.msrb.mxu1 %vm293_vm0, %v279_v46 }
  0x84   : > { %1712 = vmatpush.xpose.msk.msrb.mxu3 %vm293_vm0, %v2332_v17 }
  0x85   : > { %1744 = vmatpush.xpose.msk.msrb.mxu1 %vm293_vm0, %v278_v44 }
  0x87   : > { %1639 = vmatmul.msk.f32.gmra.mxu0 %vm293_vm0, %v2360_v21  ;;  %1662 = vmatmul.msk.f32.gmra.mxu2 %vm293_vm0, %v289_v37 }
  0x88   : > { %1713 = vmatpush.xpose.msk.msrb.mxu3 %vm293_vm0, %v2323_v16 }
  0x89   : > { %1745 = vmatpush.xpose.msk.msrb.mxu1 %vm293_vm0, %v277_v42 }
  0x8f   : > { %1640 = vmatmul.msk.f32.gmra.mxu0 %vm293_vm0, %v2367_v22  ;;  %1663 = vmatmul.msk.f32.gmra.mxu2 %vm293_vm0, %v290_v38 }
  0x97   : > { %1641 = vmatmul.msk.f32.gmra.mxu0 %vm293_vm0, %v2374_v23  ;;  %1664 = vmatmul.msk.f32.gmra.mxu2 %vm293_vm0, %v291_v39 }
  0x9f   : > { %1642 = vmatmul.msk.f32.gmra.mxu0 %vm293_vm0, %v2388_v25  ;;  %1665 = vmatmul.msk.f32.gmra.mxu2 %vm293_vm0, %v292_v40 }
  0xa7   : > { %1643 = vmatmul.msk.f32.gmra.mxu0 %vm293_vm0, %v2402_v27 }
  0xaf   : > { %1644 = vmatmul.msk.f32.gmra.mxu0 %vm293_vm0, %v2416_v29 }
  0xb7   : > { %1645 = vmatmul.msk.f32.gmra.mxu0 %vm293_vm0, %v272_v34 }
  0xbf   : > { %1646 = vmatmul.msk.f32.gmra.mxu0 %vm293_vm0, %v273_v35 }
  0xc7   : > { %1647 = vmatmul.msk.f32.gmra.mxu0 %vm293_vm0, %v274_v33 }
  0xcf   : > { %1648 = vmatmul.msk.f32.gmra.mxu0 %vm293_vm0, %v275_v32 }
  0xd7   : > { %1649 = vmatmul.msk.f32.gmra.mxu0 %vm293_vm0, %v276_v31 }
  0xdc   : > { %v2496_v41 = vpop.f32.mrf.mxu0 }
  0xdf   : > { %1650 = vmatmul.msk.f32.gmra.mxu0 %vm293_vm0, %v277_v42 }
  0xe2   : > { %v2599_v61 = vpop.f32.mrf.mxu2 }
  0xe4   : > { %v2508_v43 = vpop.f32.mrf.mxu0 }
  0xe7   : > { %1651 = vmatmul.msk.f32.gmra.mxu0 %vm293_vm0, %v278_v44  ;;  %v588_v44 = vlaneseq }
  0xea   : > { %v2603_v63 = vpop.f32.mrf.mxu2 }
  0xec   : > { %v2524_v45 = vpop.f32.mrf.mxu0 }
  0xef   : > { %1652 = vmatmul.msk.f32.gmra.mxu0 %vm293_vm0, %v279_v46 }
  0xf2   : > { %v2607_v1 = vpop.f32.mrf.mxu2 }
  0xf4   : > { %v2550_v51 = vpop.f32.mrf.mxu0 }
  0xf7   : > { %1653 = vmatmul.msk.f32.gmra.mxu0 %vm293_vm0, %v280_v50 }
  0xfa   : > { %v2611_v3 = vpop.f32.mrf.mxu2 }
  0xfc   : > { %v2561_v52 = vpop.f32.mrf.mxu0 }
  0xfd   : > { %v551_v14 = vmax.f32 %v2496_v41, %v2561_v52 }
  0xff   : > { %1654 = vmatmul.msk.f32.gmra.mxu0 %vm293_vm0, %v281_v49 }
 0x102   : > { %v2617_v6 = vpop.f32.mrf.mxu2 }
 0x104   : > { %v2570_v53 = vpop.f32.mrf.mxu0 }
 0x105   : > { %v552_v12 = vmax.f32 %v2508_v43, %v2570_v53 }
 0x107   : > { %1655 = vmatmul.msk.f32.gmra.mxu0 %vm293_vm0, %v282_v48 }
 0x10a   : > { %v2621_v8 = vpop.f32.mrf.mxu2 }
 0x10c   : > { %v2579_v54 = vpop.f32.mrf.mxu0 }
 0x10d   : > { %v553_v23 = vmax.f32 %v2524_v45, %v2579_v54 }
 0x10f   : > { %1656 = vmatmul.msk.f32.gmra.mxu0 %vm293_vm0, %v283_v47 }
 0x112   : > { %v2625_v10 = vpop.f32.mrf.mxu2 }
 0x114   : > { %v2586_v55 = vpop.f32.mrf.mxu0 }
 0x115   : > { %v554_v13 = vmax.f32 %v2550_v51, %v2586_v55 }
 0x11a   : > { %v2640_v21 = vpop.f32.mrf.mxu2 }
 0x11c   : > { %v2589_v56 = vpop.f32.mrf.mxu0 }
 0x11d   : > { %v555_v18 = vmax.f32 %v551_v14, %v2589_v56 }
 0x122   : > { %v2662_v39 = vpop.f32.mrf.mxu2 }
 0x123   : > { %3464 = vst [vmem:[#allocation10_spill] sm:$0xff] %v2662_v39 }
 0x124   : > { %v2591_v57 = vpop.f32.mrf.mxu0 }
 0x125   : > { %v556_v16 = vmax.f32 %v552_v12, %v2591_v57  ;;  %v2669_v12 = vshrl.u32 %v588_v44, 7 }
 0x127   : > { %v2756_v44 = vadd.s32 128, %v2669_v12  ;;  %v2775_v15 = vadd.s32 136, %v2669_v12 }
 0x12c   : > { %v2593_v58 = vpop.f32.mrf.mxu0 }
 0x12d   : > { %v557_v27 = vmax.f32 %v553_v23, %v2593_v58  ;;  %v2684_v23 = vadd.s32 40, %v2669_v12 }
 0x134   : > { %v2595_v59 = vpop.f32.mrf.mxu0 }
 0x135   : > { %v558_v17 = vmax.f32 %v554_v13, %v2595_v59 }
 0x13c   : > { %v2597_v60 = vpop.f32.mrf.mxu0 }
 0x13d   : > { %v559_v24 = vmax.f32 %v555_v18, %v2597_v60  ;;  %v2678_v18 = vadd.s32 24, %v2669_v12 }
 0x144   : > { %v2601_v62 = vpop.f32.mrf.mxu0 }
 0x145   : > { %v560_v19 = vmax.f32 %v556_v16, %v2601_v62  ;;  %v2672_v16 = vadd.s32 8, %v2669_v12 }
 0x14c   : > { %v2605_v0 = vpop.f32.mrf.mxu0 }
 0x14d   : > { %v561_v30 = vmax.f32 %v557_v27, %v2605_v0 }
 0x154   : > { %v2609_v2 = vpop.f32.mrf.mxu0 }
 0x155   : > { %v562_v20 = vmax.f32 %v558_v17, %v2609_v2  ;;  %v2675_v17 = vadd.s32 16, %v2669_v12 }
 0x157   : > { %3465 = vst [vmem:[#allocation11_spill] sm:$0xff] %v2675_v17 }
 0x15c   : > { %v2613_v4 = vpop.f32.mrf.mxu0 }
 0x15d   : > { %v563_v28 = vmax.f32 %v559_v24, %v2613_v4  ;;  %v2687_v24 = vadd.s32 48, %v2669_v12 }
 0x15f   : > { %3466 = vst [vmem:[#allocation12_spill] sm:$0xff] %v2687_v24 }
 0x164   : > { %v2615_v5 = vpop.f32.mrf.mxu0 }
 0x165   : > { %v564_v25 = vmax.f32 %v560_v19, %v2615_v5 }
 0x16c   : > { %v2619_v7 = vpop.f32.mrf.mxu0 }
 0x16d   : > { %v565_v33 = vmax.f32 %v561_v30, %v2619_v7  ;;  %v2772_v30 = vadd.s32 176, %v2669_v12 }
 0x174   : > { %v2623_v9 = vpop.f32.mrf.mxu0 }
 0x175   : > { %v566_v26 = vmax.f32 %v562_v20, %v2623_v9  ;;  %v2681_v20 = vadd.s32 32, %v2669_v12 }
 0x177   : > { %v570_v31 = vmax.f32 %v566_v26, %v2599_v61  ;;  %v2691_v26 = vadd.s32 56, %v2669_v12 }
 0x179   : > { %v574_v36 = vmax.f32 %v570_v31, %v2617_v6  ;;  %v2697_v31 = vadd.s32 64, %v2669_v12 }
 0x17b   : > { %v578_v46 = vmax.f32 %v574_v36, %v2662_v39 }
 0x17c   : > { %v2627_v11 = vpop.f32.mrf.mxu0 }
 0x17d   : > { %v567_v32 = vmax.f32 %v563_v28, %v2627_v11  ;;  %v2741_v28 = vadd.s32 120, %v2669_v12 }
 0x17f   : > { %v571_v37 = vmax.f32 %v567_v32, %v2603_v63  ;;  %v2700_v32 = vadd.s32 72, %v2669_v12 }
 0x181   : > { %v575_v47 = vmax.f32 %v571_v37, %v2621_v8  ;;  %v2744_v37 = vadd.s32 216, %v2669_v12 }
 0x183   : > { %3469 = vst [vmem:[#allocation15_spill] sm:$0xff] %v2744_v37 }
 0x184   : > { %v2642_v22 = vpop.f32.mrf.mxu0 }
 0x185   : > { %v568_v29 = vmax.f32 %v564_v25, %v2642_v22  ;;  %v2789_v25 = vadd.s32 160, %v2669_v12 }
 0x187   : > { %v572_v34 = vmax.f32 %v568_v29, %v2607_v1  ;;  %v3445_v29 = vcvt.s32.f32 %v2675_v17 }
 0x189   : > { %v576_v40 = vmax.f32 %v572_v34, %v2625_v10  ;;  %v2706_v34 = vadd.s32 88, %v2669_v12 }
 0x18b   : > { %v579_v49 = vmax.f32 %v575_v47, %v576_v40  ;;  %v3446_v40 = vcvt.s32.f32 %v2687_v24  ;;  %v2719_v47 = vadd.s32 192, %v2669_v12 }
 0x18c   : > { %v2657_v35 = vpop.f32.mrf.mxu0 }
 0x18d   : > { %v569_v38 = vmax.f32 %v565_v33, %v2657_v35  ;;  %v2703_v33 = vadd.s32 80, %v2669_v12  ;;  %3467 = vst [vmem:[#allocation13_spill] sm:$0xff] %v2719_v47 }
 0x18f   : > { %v573_v42 = vmax.f32 %v569_v38, %v2611_v3 }
 0x191   : > { %v577_v48 = vmax.f32 %v573_v42, %v2640_v21  ;;  %v2712_v42 = vadd.s32 184, %v2669_v12 }
 0x193   : > { %v580_v50 = vmax.f32 %v577_v48, %v578_v46  ;;  %v2716_v46 = vadd.s32 96, %v2669_v12 }
 0x195   : > { %v581_v13 = vmax.f32 %v579_v49, %v580_v50  ;;  %v2723_v50 = vadd.s32 104, %v2669_v12  ;;  %v2738_v49 = vadd.s32 208, %v2669_v12 }
 0x197   : > { %v582_v14 = vrot.slane %v581_v13, 4 }
 0x199   : > { %v583_v19 = vmax.f32 %v581_v13, %v582_v14  ;;  %v2726_v13 = vadd.s32 200, %v2669_v12  ;;  %v2729_v14 = vadd.s32 112, %v2669_v12 }
 0x19b   : > { %v584_v27 = vrot.slane %v583_v19, 2  ;;  %3468 = vst [vmem:[#allocation14_spill] sm:$0xff] %v2726_v13  ;;  %v2778_v13 = vadd.s32 232, %v2669_v12 }
 0x19d   : > { %v585_v36 = vmax.f32 %v583_v19, %v584_v27  ;;  %v2759_v27 = vadd.s32 224, %v2669_v12  ;;  %v2762_v19 = vadd.s32 144, %v2669_v12 }
 0x19f   : > { %v586_v48 = vrot.slane %v585_v36, 1  ;;  %3470 = vst [vmem:[#allocation16_spill] sm:$0xff] %v2759_v27  ;;  %v3473_v24 = vcvt.s32.f32 %v2762_v19 }
 0x1a1   : > { %v2734_v38 = vmax.f32 %v585_v36, %v586_v48  ;;  %v2786_v48 = vadd.s32 152, %v2669_v12  ;;  %v2792_v36 = vadd.s32 168, %v2669_v12 }
 0x1a3   : > { %vm655_vm1 = vcmp.eq.f32.partialorder %v2524_v45, %v2734_v38  ;;  %vm659_vm2 = vcmp.eq.f32.partialorder %v2579_v54, %v2734_v38  ;;  %vm663_vm3 = vcmp.eq.f32.partialorder %v2593_v58, %v2734_v38  ;;  %v2798_v58 = vadd.s32 248, %v2669_v12 }
 0x1a4   : > { %v687_v45 = vsel %vm655_vm1, %v3445_v29, 256.0  ;;  %v691_v54 = vsel %vm659_vm2, %v3446_v40, 256.0  ;;  %v2783_v40 = vadd.s32 240, %v2669_v12  ;;  %vm667_vm4 = vcmp.eq.f32.partialorder %v2605_v0, %v2734_v38 }
 0x1a5   : > { %v719_v29 = vmin.f32 %v687_v45, %v691_v54  ;;  %vm671_vm5 = vcmp.eq.f32.partialorder %v2619_v7, %v2734_v38  ;;  %v3471_v54 = vcvt.s32.f32 %v2703_v33  ;;  %vm675_vm6 = vcmp.eq.f32.partialorder %v2657_v35, %v2734_v38 }
 0x1a6   : > { %v640_v45 = vcvt.s32.f32 %v2786_v48  ;;  %v641_v0 = vcvt.s32.f32 %v2789_v25  ;;  %vm679_vm7 = vcmp.eq.f32.partialorder %v2611_v3, %v2734_v38  ;;  %v3472_v7 = vcvt.s32.f32 %v2729_v14 }
 0x1a7   : > { %v695_v47 = vsel %vm663_vm3, %v3471_v54, 256.0  ;;  %v703_v17 = vsel %vm671_vm5, %v3473_v24, 256.0  ;;  %vm653_vm8 = vcmp.eq.f32.partialorder %v2496_v41, %v2734_v38  ;;  %vm654_vm9 = vcmp.eq.f32.partialorder %v2508_v43, %v2734_v38 }
 0x1a8   : > { %v723_v37 = vmin.f32 %v719_v29, %v695_v47  ;;  %v699_v54 = vsel %vm667_vm4, %v3472_v7, 256.0  ;;  %v3474_v29 = vcvt.s32.f32 %v2772_v30  ;;  %vm657_vm10 = vcmp.eq.f32.partialorder %v2561_v52, %v2734_v38 }
 0x1a9   : > { %vm656_vm11 = vcmp.eq.f32.partialorder %v2550_v51, %v2734_v38  ;;  %vm658_vm12 = vcmp.eq.f32.partialorder %v2570_v53, %v2734_v38  ;;  %vm660_vm13 = vcmp.eq.f32.partialorder %v2586_v55, %v2734_v38  ;;  %v3475_v24 = vcvt.s32.f32 %v2738_v49 }
 0x1aa   : > { %v707_v47 = vsel %vm675_vm6, %v3474_v29, 256.0  ;;  %v727_v3 = vmin.f32 %v723_v37, %v699_v54  ;;  %vm661_vm14 = vcmp.eq.f32.partialorder %v2589_v56, %v2734_v38  ;;  %vm662_vm15 = vcmp.eq.f32.partialorder %v2591_v57, %v2734_v38 }
 0x1ab   : > { %v711_v7 = vsel %vm679_vm7, %v3475_v24, 256.0  ;;  %vm664_vm1 = vcmp.eq.f32.partialorder %v2595_v59, %v2734_v38  ;;  %vm665_vm2 = vcmp.eq.f32.partialorder %v2597_v60, %v2734_v38  ;;  %vm666_vm3 = vcmp.eq.f32.partialorder %v2601_v62, %v2734_v38 }
 0x1ac   : > { %v3476_v41 = vcvt.s32.f32 %v2669_v12  ;;  %v3477_v51 = vcvt.s32.f32 %v2681_v20  ;;  %v3478_v53 = vcvt.s32.f32 %v2672_v16  ;;  %v3479_v37 = vcvt.s32.f32 %v2678_v18 }
 0x1ad   : > { %v3480_v29 = vcvt.s32.f32 %v2684_v23  ;;  %v3481_v35 = vcvt.s32.f32 %v2691_v26  ;;  %vm683_vm4 = vcmp.eq.f32.partialorder %v2640_v21, %v2734_v38  ;;  %v731_v39 = vmin.f32 %v727_v3, %v703_v17 }
 0x1ae   : > { %v685_v43 = vsel %vm653_vm8, %v3476_v41, 256.0  ;;  %v689_v52 = vsel %vm657_vm10, %v3477_v51, 256.0  ;;  %v686_v55 = vsel %vm654_vm9, %v3478_v53, 256.0  ;;  %v688_v54 = vsel %vm656_vm11, %v3479_v37, 256.0 }
 0x1af   : > { %v690_v24 = vsel %vm658_vm12, %v3480_v29, 256.0  ;;  %v692_v27 = vsel %vm660_vm13, %v3481_v35, 256.0  ;;  %vm668_vm5 = vcmp.eq.f32.partialorder %v2609_v2, %v2734_v38  ;;  %vm669_vm6 = vcmp.eq.f32.partialorder %v2613_v4, %v2734_v38 }
 0x1b0   : > { %vm670_vm7 = vcmp.eq.f32.partialorder %v2615_v5, %v2734_v38  ;;  %vm672_vm8 = vcmp.eq.f32.partialorder %v2623_v9, %v2734_v38  ;;  %vm673_vm9 = vcmp.eq.f32.partialorder %v2627_v11, %v2734_v38  ;;  %vm674_vm10 = vcmp.eq.f32.partialorder %v2642_v22, %v2734_v38  ;;  %v3492_v11 = vld [vmem:[#allocation10_spill] sm:$0xff] }
 0x1b1   : > { %v717_v35 = vmin.f32 %v685_v43, %v689_v52  ;;  %vm676_vm11 = vcmp.eq.f32.partialorder %v2599_v61, %v2734_v38  ;;  %v3482_v17 = vcvt.s32.f32 %v2697_v31  ;;  %v718_v41 = vmin.f32 %v686_v55, %v690_v24  ;;  %v3496_v61 = vld [vmem:[#allocation14_spill] sm:$0xff] }
 0x1b2   : > { %v720_v51 = vmin.f32 %v688_v54, %v692_v27  ;;  %vm677_vm12 = vcmp.eq.f32.partialorder %v2603_v63, %v2734_v38  ;;  %v3483_v53 = vcvt.s32.f32 %v2700_v32  ;;  %v3484_v52 = vcvt.s32.f32 %v2706_v34 }
 0x1b3   : > { %v693_v3 = vsel %vm661_vm14, %v3482_v17, 256.0  ;;  %v735_v56 = vmin.f32 %v731_v39, %v707_v47  ;;  %v3485_v55 = vcvt.s32.f32 %v2716_v46  ;;  %vm678_vm13 = vcmp.eq.f32.partialorder %v2607_v1, %v2734_v38 }
 0x1b4   : > { %v694_v43 = vsel %vm662_vm15, %v3483_v53, 256.0  ;;  %v696_v37 = vsel %vm664_vm1, %v3484_v52, 256.0  ;;  %v721_v29 = vmin.f32 %v717_v35, %v693_v3  ;;  %v3486_v57 = vcvt.s32.f32 %v2723_v50 }
 0x1b5   : > { %v697_v27 = vsel %vm665_vm2, %v3485_v55, 256.0  ;;  %v722_v54 = vmin.f32 %v718_v41, %v694_v43  ;;  %v724_v24 = vmin.f32 %v720_v51, %v696_v37  ;;  %v3487_v35 = vcvt.s32.f32 %v2741_v28  ;;  %v3493_v55 = vld [vmem:[#allocation13_spill] sm:$0xff] }
 0x1b6   : > { %v698_v59 = vsel %vm666_vm3, %v3486_v57, 256.0  ;;  %v725_v47 = vmin.f32 %v721_v29, %v697_v27  ;;  %vm680_vm14 = vcmp.eq.f32.partialorder %v2617_v6, %v2734_v38  ;;  %v3488_v60 = vcvt.s32.f32 %v2756_v44 }
 0x1b7   : > { %v700_v39 = vsel %vm668_vm5, %v3487_v35, 256.0  ;;  %v726_v3 = vmin.f32 %v722_v54, %v698_v59  ;;  %vm681_vm15 = vcmp.eq.f32.partialorder %v2621_v8, %v2734_v38  ;;  %v3489_v62 = vcvt.s32.f32 %v2775_v15 }
 0x1b8   : > { %v701_v17 = vsel %vm669_vm6, %v3488_v60, 256.0  ;;  %v728_v41 = vmin.f32 %v724_v24, %v700_v39  ;;  %v704_v51 = vsel %vm672_vm8, %v640_v45, 256.0  ;;  %v739_v4 = vmin.f32 %v735_v56, %v711_v7 }
 0x1b9   : > { %v702_v2 = vsel %vm670_vm7, %v3489_v62, 256.0  ;;  %v729_v53 = vmin.f32 %v725_v47, %v701_v17  ;;  %v705_v43 = vsel %vm673_vm9, %v641_v0, 256.0  ;;  %vm682_vm1 = vcmp.eq.f32.partialorder %v2625_v10, %v2734_v38  ;;  %v3498_v47 = vld [vmem:[#allocation15_spill] sm:$0xff] }
 0x1ba   : > { %v730_v52 = vmin.f32 %v726_v3, %v702_v2  ;;  %v732_v37 = vmin.f32 %v728_v41, %v704_v51  ;;  %v3490_v5 = vcvt.s32.f32 %v2792_v36  ;;  %v3491_v29 = vcvt.s32.f32 %v2712_v42  ;;  %v3500_v41 = vld [vmem:[#allocation16_spill] sm:$0xff] }
 0x1bb   : > { %v733_v56 = vmin.f32 %v729_v53, %v705_v43  ;;  %vm684_vm2 = vcmp.eq.f32.partialorder %v3492_v11, %v2734_v38  ;;  %v3494_v27 = vcvt.s32.f32 %v3493_v55  ;;  %v3495_v22 = vcvt.s32.f32 %v2783_v40 }
 0x1bc   : > { %v706_v9 = vsel %vm674_vm10, %v3490_v5, 256.0  ;;  %v708_v7 = vsel %vm676_vm11, %v3491_v29, 256.0  ;;  %v3497_v35 = vcvt.s32.f32 %v3496_v61  ;;  %v3499_v60 = vcvt.s32.f32 %v3498_v47 }
 0x1bd   : > { %v709_v54 = vsel %vm677_vm12, %v3494_v27, 256.0  ;;  %v734_v24 = vmin.f32 %v730_v52, %v706_v9  ;;  %v736_v57 = vmin.f32 %v732_v37, %v708_v7  ;;  %v715_v59 = vsel %vm683_vm4, %v3495_v22, 256.0 }
 0x1be   : > { %v710_v39 = vsel %vm678_vm13, %v3497_v35, 256.0  ;;  %v712_v63 = vsel %vm680_vm14, %v3499_v60, 256.0  ;;  %v737_v17 = vmin.f32 %v733_v56, %v709_v54  ;;  %v743_v3 = vmin.f32 %v739_v4, %v715_v59 }
 0x1bf   : > { %v3501_v62 = vcvt.s32.f32 %v3500_v41  ;;  %v738_v2 = vmin.f32 %v734_v24, %v710_v39  ;;  %v740_v51 = vmin.f32 %v736_v57, %v712_v63  ;;  %v3502_v53 = vcvt.s32.f32 %v2778_v13  ;;  %v1999_v41 = vld [vmem:[%s2268_s6 + $0x30] sm:$0xff] }
 0x1c0   : > { %v3503_v43 = vcvt.s32.f32 %v2798_v58  ;;  %v3505_v38 = vcvt.s32.f32 %v2669_v12  ;;  %v2181_v57 = vmov 1.0   ;;  %v2182_v22 = vmov 0.0  }
 0x1c1   : > { %v713_v21 = vsel %vm681_vm15, %v3501_v62, 256.0  ;;  %v714_v1 = vsel %vm682_vm1, %v3502_v53, 256.0  ;;  %v3506_v35 = vcvt.s32.f32 %v2783_v40  ;;  %v3507_v58 = vmov %v3502_v53 }
 0x1c2   : > { %v716_v6 = vsel %vm684_vm2, %v3503_v43, 256.0  ;;  %v741_v52 = vmin.f32 %v737_v17, %v713_v21  ;;  %v742_v37 = vmin.f32 %v738_v2, %v714_v1  ;;  %v3504_v10 = vmov %v3503_v43 }
 0x1c3   : > { %v744_v4 = vmin.f32 %v740_v51, %v716_v6  ;;  %v3508_v12 = vcvt.s32.f32 %v2672_v16  ;;  %v3509_v39 = vmov %v3501_v62  ;;  %v3510_v40 = vcvt.s32.f32 %v2681_v20  ;;  %v3516_v16 = vld [vmem:[#allocation12_spill] sm:$0xff] }
 0x1c4   : > { %v745_v5 = vmin.f32 %v741_v52, %v742_v37  ;;  %v3513_v13 = vcvt.s32.f32 %v2684_v23  ;;  %v3517_v17 = vcvt.s32.f32 %v3516_v16  ;;  %v3520_v20 = vcvt.s32.f32 %v2691_v26 }
 0x1c5   : > { %v746_v9 = vmin.f32 %v743_v3, %v744_v4  ;;  %v3523_v23 = vcvt.s32.f32 %v3498_v47  ;;  %v3524_v21 = vcvt.s32.f32 %v2738_v49  ;;  %v3525_v2 = vcvt.s32.f32 %v2697_v31 }
 0x1c6   : > { %v3526_v26 = vcvt.s32.f32 %v2700_v32  ;;  %v3527_v51 = vcvt.s32.f32 %v2703_v33  ;;  %v3528_v47 = vcvt.s32.f32 %v2706_v34  ;;  %v3529_v33 = vcvt.s32.f32 %v2716_v46 }
 0x1c7   : > { %v747_v29 = vmin.f32 %v745_v5, %v746_v9  ;;  %v3530_v34 = vcvt.s32.f32 %v2723_v50  ;;  %v3531_v1 = vcvt.s32.f32 %v2729_v14  ;;  %v3532_v43 = vcvt.s32.f32 %v2741_v28  ;;  %v3535_v5 = vld [vmem:[#allocation11_spill] sm:$0xff] }
 0x1c8   : > { %v3533_v50 = vcvt.s32.f32 %v3496_v61  ;;  %v3534_v4 = vcvt.s32.f32 %v3493_v55  ;;  %v3536_v9 = vcvt.s32.f32 %v3535_v5  ;;  %v3538_v55 = vcvt.s32.f32 %v2772_v30 }
 0x1c9   : > { %v748_v7 = vrot.slane %v747_v29, 4  ;;  %v3543_v25 = vcvt.s32.f32 %v2756_v44 }
 0x1cb   : > { %v749_v8 = vmin.f32 %v747_v29, %v748_v7  ;;  %v3537_v7 = vcvt.s32.f32 %v2712_v42  ;;  %v3540_v42 = vcvt.s32.f32 %v2678_v18  ;;  %v3542_v18 = vcvt.s32.f32 %v2775_v15 }
 0x1cd   : > { %v750_v56 = vrot.slane %v749_v8, 2 }
 0x1cf   : > { %v751_v11 = vmin.f32 %v749_v8, %v750_v56  ;;  %v3539_v56 = vcvt.s32.f32 %v2792_v36  ;;  %v3541_v36 = vcvt.s32.f32 %v2762_v19 }
 0x1d1   : > { %v752_v27 = vrot.slane %v751_v11, 1 }
 0x1d3   : > { %v753_v54 = vmin.f32 %v751_v11, %v752_v27 }
 0x1d5   : > { %v2980_v24 = vmin.f32 %v753_v54, 255.0 }
 0x1d7   : > { %vm788_vm3 = vcmp.eq.f32.partialorder %v3504_v10, %v2980_v24  ;;  %vm757_vm4 = vcmp.eq.f32.partialorder %v3505_v38, %v2980_v24  ;;  %vm787_vm5 = vcmp.eq.f32.partialorder %v3506_v35, %v2980_v24  ;;  %vm786_vm6 = vcmp.eq.f32.partialorder %v3507_v58, %v2980_v24  ;;  %v1994_v35 = vld [vmem:[%s2268_s6 + $0x8] sm:$0xff] }
 0x1d8   : > { %1862 = vmatpush.lsf.msk.msk.msrb.mxu2 %vm788_vm3, %v2181_v57  ;;  %v1666_v59 = vsel %vm757_vm4, 1.0, %v2182_v22  ;;  %vm758_vm7 = vcmp.eq.f32.partialorder %v3508_v12, %v2980_v24  ;;  %vm785_vm8 = vcmp.eq.f32.partialorder %v3509_v39, %v2980_v24  ;;  %vm3007_vm9 = vcmp.eq.f32.partialorder %v3510_v40, %v2980_v24  ;;  %v1995_v12 = vld [vmem:[%s2268_s6 + $0x10] sm:$0xff]  ;;  %v1996_v40 = vld [vmem:[%s2268_s6 + $0x18] sm:$0xff] }
 0x1d9   : > { %853 = vxpose.xlu0.b32.start [1/16] %v1666_v59, 128  ;;  %vm3014_vm10 = vcmp.eq.f32.partialorder %v3513_v13, %v2980_v24  ;;  %vm3021_vm11 = vcmp.eq.f32.partialorder %v3517_v17, %v2980_v24  ;;  %vm3028_vm12 = vcmp.eq.f32.partialorder %v3520_v20, %v2980_v24  ;;  %vm784_vm13 = vcmp.eq.f32.partialorder %v3523_v23, %v2980_v24  ;;  %v1997_v13 = vld [vmem:[%s2268_s6 + $0x20] sm:$0xff]  ;;  %v1998_v17 = vld [vmem:[%s2268_s6 + $0x28] sm:$0xff] }
 0x1da   : > { %1863 = vmatpush.lsf.msk.msk.msrb.mxu2 %vm787_vm5, %v2181_v57  ;;  %v1667_v62 = vsel %vm758_vm7, 1.0, %v2182_v22  ;;  %vm783_vm14 = vcmp.eq.f32.partialorder %v3524_v21, %v2980_v24  ;;  %vm765_vm15 = vcmp.eq.f32.partialorder %v3525_v2, %v2980_v24  ;;  %vm766_vm1 = vcmp.eq.f32.partialorder %v3526_v26, %v2980_v24 }
 0x1db   : > { %vm767_vm2 = vcmp.eq.f32.partialorder %v3527_v51, %v2980_v24  ;;  %vm768_vm3 = vcmp.eq.f32.partialorder %v3528_v47, %v2980_v24  ;;  %v1674_v49 = vsel %vm765_vm15, 1.0, %v2182_v22  ;;  %v1675_v31 = vsel %vm766_vm1, 1.0, %v2182_v22  ;;  %v2001_v51 = vld [vmem:[%s2268_s6] sm:$0xff] }
 0x1dc   : > { %1864 = vmatpush.lsf.msk.msk.msrb.mxu2 %vm786_vm6, %v2181_v57  ;;  %v1676_v53 = vsel %vm767_vm2, 1.0, %v2182_v22  ;;  %v1677_v32 = vsel %vm768_vm3, 1.0, %v2182_v22  ;;  %vm769_vm4 = vcmp.eq.f32.partialorder %v3529_v33, %v2980_v24  ;;  %vm770_vm5 = vcmp.eq.f32.partialorder %v3530_v34, %v2980_v24  ;;  %v2002_v47 = vld [vmem:[%s2268_s6 + $0x40] sm:$0xff] }
 0x1dd   : > { %vm771_vm6 = vcmp.eq.f32.partialorder %v3531_v1, %v2980_v24  ;;  %vm772_vm7 = vcmp.eq.f32.partialorder %v3532_v43, %v2980_v24  ;;  %v1678_v6 = vsel %vm769_vm4, 1.0, %v2182_v22  ;;  %v1679_v52 = vsel %vm770_vm5, 1.0, %v2182_v22  ;;  %v2004_v43 = vld [vmem:[%s2268_s6 + $0x50] sm:$0xff] }
 0x1de   : > { %1865 = vmatpush.lsf.msk.msk.msrb.mxu2 %vm785_vm8, %v2181_v57  ;;  %v1680_v46 = vsel %vm771_vm6, 1.0, %v2182_v22  ;;  %v1681_v37 = vsel %vm772_vm7, 1.0, %v2182_v22  ;;  %vm782_vm8 = vcmp.eq.f32.partialorder %v3533_v50, %v2980_v24  ;;  %v1879_v28 = vceil.f32 %v2980_v24 }
 0x1df   : > { %v1880_v14 = vfloor.f32 %v2980_v24  ;;  %vm759_vm15 = vcmp.eq.f32.partialorder %v3536_v9, %v2980_v24  ;;  %vm780_vm1 = vcmp.eq.f32.partialorder %v3537_v7, %v2980_v24  ;;  %vm779_vm2 = vcmp.eq.f32.partialorder %v3538_v55, %v2980_v24  ;;  %v2008_v55 = vld [vmem:[%s2268_s6 + $0x70] sm:$0xff] }
 0x1e0   : > { %1866 = vmatpush.lsf.msk.msk.msrb.mxu2 %vm784_vm13, %v2181_v57  ;;  %vm1878_vm13 = vcmp.lt.s32.totalorder %v2980_v24, 0  ;;  %v1668_v8 = vsel %vm759_vm15, 1.0, %v2182_v22  ;;  %vm778_vm3 = vcmp.eq.f32.partialorder %v3539_v56, %v2980_v24  ;;  %vm777_vm4 = vcmp.eq.f32.partialorder %v641_v0, %v2980_v24 }
 0x1e1   : > { %854 = vxpose.xlu0.b32.cont [2/16] %v1667_v62, 128  ;;  %v1881_v61 = vsel %vm1878_vm13, %v1879_v28, %v1880_v14  ;;  %vm760_vm5 = vcmp.eq.f32.partialorder %v3540_v42, %v2980_v24  ;;  %vm776_vm6 = vcmp.eq.f32.partialorder %v640_v45, %v2980_v24  ;;  %vm775_vm7 = vcmp.eq.f32.partialorder %v3541_v36, %v2980_v24  ;;  %v2000_v62 = vld [vmem:[%s2268_s6 + $0x38] sm:$0xff]  ;;  %v2006_v14 = vld [vmem:[%s2268_s6 + $0x60] sm:$0xff] }
 0x1e2   : > { %1867 = vmatpush.lsf.msk.msk.msrb.mxu2 %vm783_vm14, %v2181_v57  ;;  %vm781_vm14 = vcmp.eq.f32.partialorder %v3534_v4, %v2980_v24  ;;  %v1882_v29 = vcvt.f32.s32 %v1881_v61  ;;  %v1669_v30 = vsel %vm760_vm5, 1.0, %v2182_v22  ;;  %vm773_vm13 = vcmp.eq.f32.partialorder %v3543_v25, %v2980_v24  ;;  %v2007_v61 = vld [vmem:[%s2268_s6 + $0x68] sm:$0xff]  ;;  %v2009_v36 = vld [vmem:[%s2268_s6 + $0x78] sm:$0xff] }
 0x1e3   : > { %v1670_v19 = vsel %vm3007_vm9, 1.0, %v2182_v22  ;;  %v1671_v48 = vsel %vm3014_vm10, 1.0, %v2182_v22  ;;  %v1672_v15 = vsel %vm3021_vm11, 1.0, %v2182_v22  ;;  %v1673_v44 = vsel %vm3028_vm12, 1.0, %v2182_v22  ;;  %v3544_v22 = vld [vmem:[#allocation9_spill] sm:$0xff] }
 0x1e4   : > { %1868 = vmatpush.lsf.msk.msk.msrb.mxu2 %vm782_vm8, %v2181_v57  ;;  %756 = vst [vmem:[%s3456_s12] sm:$0x1] %v1882_v29  ;;  %vm774_vm8 = vcmp.eq.f32.partialorder %v3542_v18, %v2980_v24 }
 0x1e6   : > { %1869 = vmatpush.lsf.msk.msk.msrb.mxu2 %vm781_vm14, %v2181_v57 }
 0x1e8   : > { %1870 = vmatpush.lsf.msk.msk.msrb.mxu2 %vm780_vm1, %v2181_v57 }
 0x1e9   : > { %855 = vxpose.xlu0.b32.cont [3/16] %v1668_v8, 128 }
 0x1ea   : > { %1871 = vmatpush.lsf.msk.msk.msrb.mxu2 %vm779_vm2, %v2181_v57 }
 0x1ec   : > { %1872 = vmatpush.lsf.msk.msk.msrb.mxu2 %vm778_vm3, %v2181_v57 }
 0x1ee   : > { %1873 = vmatpush.lsf.msk.msk.msrb.mxu2 %vm777_vm4, %v2181_v57 }
 0x1f0   : > { %1874 = vmatpush.lsf.msk.msk.msrb.mxu2 %vm776_vm6, %v2181_v57 }
 0x1f1   : > { %856 = vxpose.xlu0.b32.cont [4/16] %v1669_v30, 128 }
 0x1f2   : > { %1875 = vmatpush.lsf.msk.msk.msrb.mxu2 %vm775_vm7, %v2181_v57 }
 0x1f4   : > { %1876 = vmatpush.lsf.msk.msk.msrb.mxu2 %vm774_vm8, %v2181_v57 }
 0x1f6   : > { %1877 = vmatpush.lsf.msk.msk.msrb.mxu2 %vm773_vm13, %v2181_v57 }
 0x1f7   : > { %1845 = vllmr.16.mxu2 }
 0x1f9   : > { %857 = vxpose.xlu0.b32.cont [5/16] %v1670_v19, 128 }
 0x201   : > { %858 = vxpose.xlu0.b32.cont [6/16] %v1671_v48, 128 }
 0x209   : > { %859 = vxpose.xlu0.b32.cont [7/16] %v1672_v15, 128 }
 0x211   : > { %860 = vxpose.xlu0.b32.cont [8/16] %v1673_v44, 128 }
 0x218   : > { %1846 = vmatmul.lmr.bf16.vlgmr.msra.gmra.16.mxu2 }
 0x219   : > { %861 = vxpose.xlu0.b32.cont [9/16] %v1674_v49, 128 }
 0x220   : > { %1847 = vmatmul.lmr.bf16.gmra.16.mxu2 }
 0x221   : > { %862 = vxpose.xlu0.b32.cont [10/16] %v1675_v31, 128 }
 0x228   : > { %1848 = vmatmul.lmr.bf16.gmra.16.mxu2 }
 0x229   : > { %863 = vxpose.xlu0.b32.cont [11/16] %v1676_v53, 128 }
 0x230   : > { %1849 = vmatmul.lmr.bf16.gmra.16.mxu2 }
 0x231   : > { %864 = vxpose.xlu0.b32.cont [12/16] %v1677_v32, 128  ;;  %v2003_v32 = vld [vmem:[%s2268_s6 + $0x48] sm:$0xff] }
 0x238   : > { %1850 = vmatmul.lmr.bf16.gmra.16.mxu2 }
 0x239   : > { %865 = vxpose.xlu0.b32.cont [13/16] %v1678_v6, 128 }
 0x240   : > { %1851 = vmatmul.lmr.bf16.gmra.16.mxu2 }
 0x241   : > { %866 = vxpose.xlu0.b32.cont [14/16] %v1679_v52, 128 }
 0x248   : > { %1852 = vmatmul.lmr.bf16.gmra.16.mxu2 }
 0x249   : > { %867 = vxpose.xlu0.b32.cont [15/16] %v1680_v46, 128 }
 0x250   : > { %1853 = vmatmul.lmr.bf16.gmra.16.mxu2 }
 0x251   : > { %868 = vxpose.xlu0.b32.end [16/16] %v1681_v37, 128  ;;  %v2005_v37 = vld [vmem:[%s2268_s6 + $0x58] sm:$0xff]  ;;  %s1615_s6 = sshll.u32 %s3075_s11, 8 }
 0x252   : > { %s3217_s20 = scalar_lea.vmem [#allocation5], %s1615_s6 }
 0x258   : > { %1854 = vmatmul.lmr.bf16.gmra.16.mxu2 }
 0x260   : > { %1855 = vmatmul.lmr.bf16.gmra.16.mxu2 }
 0x268   : > { %1856 = vmatmul.lmr.bf16.gmra.16.mxu2 }
 0x270   : > { %1857 = vmatmul.lmr.bf16.gmra.16.mxu2 }
 0x278   : > { %1858 = vmatmul.lmr.bf16.gmra.16.mxu2 }
 0x27d   : > { %v869_v45 = vpop.trf.xlu0 }
 0x27e   : > { %933 = vmatmul.f32.vlgmr.msra.gmra.mxu1 %v869_v45 }
 0x280   : > { %1859 = vmatmul.lmr.bf16.gmra.16.mxu2 }
 0x285   : > { %v870_v0 = vpop.trf.xlu0 }
 0x286   : > { %936 = vmatmul.f32.gmra.mxu1 %v870_v0 }
 0x288   : > { %1860 = vmatmul.lmr.bf16.gmra.16.mxu2 }
 0x28d   : > { %v871_v11 = vpop.trf.xlu0 }
 0x28e   : > { %939 = vmatmul.f32.gmra.mxu1 %v871_v11 }
 0x290   : > { %1861 = vmatmul.lmr.bf16.gmra.16.mxu2 }
 0x295   : > { %v872_v27 = vpop.trf.xlu0 }
 0x296   : > { %942 = vmatmul.f32.gmra.mxu1 %v872_v27 }
 0x29b   : > { %v999_v63 = vpop.f32.mrf.mxu2 }
 0x29d   : > { %v873_v54 = vpop.trf.xlu0 }
 0x29e   : > { %945 = vmatmul.f32.gmra.mxu1 %v873_v54 }
 0x2a3   : > { %v1002_v20 = vpop.f32.mrf.mxu2 }
 0x2a5   : > { %v874_v24 = vpop.trf.xlu0 }
 0x2a6   : > { %948 = vmatmul.f32.gmra.mxu1 %v874_v24 }
 0x2ab   : > { %v1005_v21 = vpop.f32.mrf.mxu2 }
 0x2ad   : > { %v875_v10 = vpop.trf.xlu0 }
 0x2ae   : > { %951 = vmatmul.f32.gmra.mxu1 %v875_v10 }
 0x2b3   : > { %v1008_v49 = vpop.f32.mrf.mxu2 }
 0x2b5   : > { %v876_v38 = vpop.trf.xlu0 }
 0x2b6   : > { %954 = vmatmul.f32.gmra.mxu1 %v876_v38 }
 0x2bb   : > { %v1011_v34 = vpop.f32.mrf.mxu2 }
 0x2bd   : > { %v877_v57 = vpop.trf.xlu0 }
 0x2be   : > { %957 = vmatmul.f32.vlgmr.msra.gmra.mxu3 %v877_v57  ;;  %1746 = vmatmul.msk.f32.vlgmr.msrb.gmra.mxu1 %vm293_vm0, %v3544_v22 }
 0x2c3   : > { %v1014_v46 = vpop.f32.mrf.mxu2 }
 0x2c5   : > { %v878_v59 = vpop.trf.xlu0 }
 0x2c6   : > { %960 = vmatmul.f32.gmra.mxu3 %v878_v59  ;;  %1747 = vmatmul.msk.f32.gmra.mxu1 %vm293_vm0, %v1994_v35 }
 0x2cb   : > { %v1017_v4 = vpop.f32.mrf.mxu2 }
 0x2cd   : > { %v879_v58 = vpop.trf.xlu0 }
 0x2ce   : > { %963 = vmatmul.f32.gmra.mxu3 %v879_v58  ;;  %1748 = vmatmul.msk.f32.gmra.mxu1 %vm293_vm0, %v1995_v12 }
 0x2d3   : > { %v1020_v29 = vpop.f32.mrf.mxu2 }
 0x2d5   : > { %v880_v39 = vpop.trf.xlu0 }
 0x2d6   : > { %966 = vmatmul.f32.gmra.mxu3 %v880_v39  ;;  %1749 = vmatmul.msk.f32.gmra.mxu1 %vm293_vm0, %v1996_v40 }
 0x2db   : > { %v1023_v56 = vpop.f32.mrf.mxu2 }
 0x2dd   : > { %v881_v60 = vpop.trf.xlu0 }
 0x2de   : > { %969 = vmatmul.f32.gmra.mxu3 %v881_v60  ;;  %1750 = vmatmul.msk.f32.gmra.mxu1 %vm293_vm0, %v1997_v13 }
 0x2e3   : > { %v1026_v18 = vpop.f32.mrf.mxu2 }
 0x2e5   : > { %v882_v16 = vpop.trf.xlu0 }
 0x2e6   : > { %972 = vmatmul.f32.gmra.mxu3 %v882_v16  ;;  %1751 = vmatmul.msk.f32.gmra.mxu1 %vm293_vm0, %v1998_v17 }
 0x2eb   : > { %v1029_v48 = vpop.f32.mrf.mxu2 }
 0x2ed   : > { %v883_v3 = vpop.trf.xlu0 }
 0x2ee   : > { %975 = vmatmul.f32.gmra.mxu3 %v883_v3  ;;  %1752 = vmatmul.msk.f32.gmra.mxu1 %vm293_vm0, %v1999_v41 }
 0x2f3   : > { %v1032_v45 = vpop.f32.mrf.mxu2 }
 0x2f5   : > { %v884_v23 = vpop.trf.xlu0 }
 0x2f6   : > { %978 = vmatmul.f32.gmra.mxu3 %v884_v23  ;;  %1753 = vmatmul.msk.f32.gmra.mxu1 %vm293_vm0, %v2000_v62 }
 0x2fb   : > { %v934_v2 = vpop.f32.mrf.mxu1  ;;  %v1035_v54 = vpop.f32.mrf.mxu2 }
 0x2fc   : > { %v1000_v26 = vadd.f32 %v999_v63, %v934_v2 }
 0x2fe   : > { %1047 = vst.msk [vmem:[%s3160_s14] sm:$0xff] %vm293_vm0, %v1000_v26  ;;  %1714 = vmatmul.msk.f32.vlgmr.msrb.gmra.mxu3 %vm293_vm0, %v2001_v51  ;;  %1754 = vmatmul.msk.f32.gmra.mxu1 %vm293_vm0, %v2002_v47 }
 0x303   : > { %v937_v31 = vpop.f32.mrf.mxu1  ;;  %v1038_v22 = vpop.f32.mrf.mxu2 }
 0x304   : > { %v1003_v53 = vadd.f32 %v1002_v20, %v937_v31 }
 0x306   : > { %1048 = vst.msk [vmem:[%s3160_s14 + $0x8] sm:$0xff] %vm293_vm0, %v1003_v53  ;;  %1715 = vmatmul.msk.f32.gmra.mxu3 %vm293_vm0, %v1994_v35  ;;  %1755 = vmatmul.msk.f32.gmra.mxu1 %vm293_vm0, %v2003_v32 }
 0x30b   : > { %v940_v33 = vpop.f32.mrf.mxu1 }
 0x30c   : > { %v1006_v1 = vadd.f32 %v1005_v21, %v940_v33 }
 0x30e   : > { %1049 = vst.msk [vmem:[%s3160_s14 + $0x10] sm:$0xff] %vm293_vm0, %v1006_v1  ;;  %1716 = vmatmul.msk.f32.gmra.mxu3 %vm293_vm0, %v1995_v12  ;;  %1756 = vmatmul.msk.f32.gmra.mxu1 %vm293_vm0, %v2004_v43  ;;  %v1041_v12 = vpop.f32.mrf.mxu2 }
 0x313   : > { %v943_v6 = vpop.f32.mrf.mxu1 }
 0x314   : > { %v1009_v52 = vadd.f32 %v1008_v49, %v943_v6 }
 0x316   : > { %1050 = vst.msk [vmem:[%s3160_s14 + $0x18] sm:$0xff] %vm293_vm0, %v1009_v52  ;;  %1717 = vmatmul.msk.f32.gmra.mxu3 %vm293_vm0, %v1996_v40  ;;  %1757 = vmatmul.msk.f32.gmra.mxu1 %vm293_vm0, %v2005_v37 }
 0x31b   : > { %v946_v50 = vpop.f32.mrf.mxu1 }
 0x31c   : > { %v1012_v28 = vadd.f32 %v1011_v34, %v946_v50 }
 0x31e   : > { %1051 = vst.msk [vmem:[%s3160_s14 + $0x20] sm:$0xff] %vm293_vm0, %v1012_v28  ;;  %1718 = vmatmul.msk.f32.gmra.mxu3 %vm293_vm0, %v1997_v13  ;;  %1758 = vmatmul.msk.f32.gmra.mxu1 %vm293_vm0, %v2006_v14  ;;  %v1044_v13 = vpop.f32.mrf.mxu2 }
 0x323   : > { %v949_v5 = vpop.f32.mrf.mxu1 }
 0x324   : > { %v1015_v9 = vadd.f32 %v1014_v46, %v949_v5 }
 0x326   : > { %1052 = vst.msk [vmem:[%s3160_s14 + $0x28] sm:$0xff] %vm293_vm0, %v1015_v9  ;;  %1719 = vmatmul.msk.f32.gmra.mxu3 %vm293_vm0, %v1998_v17  ;;  %1759 = vmatmul.msk.f32.gmra.mxu1 %vm293_vm0, %v2007_v61 }
 0x32b   : > { %v952_v7 = vpop.f32.mrf.mxu1 }
 0x32c   : > { %v1018_v8 = vadd.f32 %v1017_v4, %v952_v7 }
 0x32e   : > { %1053 = vst.msk [vmem:[%s3160_s14 + $0x30] sm:$0xff] %vm293_vm0, %v1018_v8  ;;  %1720 = vmatmul.msk.f32.gmra.mxu3 %vm293_vm0, %v1999_v41  ;;  %1760 = vmatmul.msk.f32.gmra.mxu1 %vm293_vm0, %v2008_v55 }
 0x333   : > { %v955_v42 = vpop.f32.mrf.mxu1 }
 0x334   : > { %v1021_v30 = vadd.f32 %v1020_v29, %v955_v42 }
 0x336   : > { %1054 = vst.msk [vmem:[%s3160_s14 + $0x38] sm:$0xff] %vm293_vm0, %v1021_v30  ;;  %1721 = vmatmul.msk.f32.gmra.mxu3 %vm293_vm0, %v2000_v62  ;;  %1761 = vmatmul.msk.f32.gmra.mxu1 %vm293_vm0, %v2009_v36 }
 0x33b   : > { %v1145_v57 = vpop.f32.mrf.mxu1 }
 0x33c   : > { %1194 = vst [vmem:[%s3217_s20 + $0x8] sm:$0xff] %v1145_v57 }
 0x33e   : > { %1722 = vmatmul.msk.f32.gmra.mxu3 %vm293_vm0, %v2002_v47 }
 0x341   : > { %v958_v25 = vpop.f32.mrf.mxu3 }
 0x342   : > { %v1024_v19 = vadd.f32 %v1023_v56, %v958_v25 }
 0x343   : > { %v1148_v58 = vpop.f32.mrf.mxu1 }
 0x344   : > { %1055 = vst.msk [vmem:[%s3160_s14 + $0x40] sm:$0xff] %vm293_vm0, %v1024_v19 }
 0x345   : > { %1196 = vst [vmem:[%s3217_s20 + $0x18] sm:$0xff] %v1148_v58 }
 0x346   : > { %1723 = vmatmul.msk.f32.gmra.mxu3 %vm293_vm0, %v2003_v32 }
 0x349   : > { %v961_v15 = vpop.f32.mrf.mxu3 }
 0x34a   : > { %v1027_v44 = vadd.f32 %v1026_v18, %v961_v15 }
 0x34b   : > { %v1151_v60 = vpop.f32.mrf.mxu1 }
 0x34c   : > { %1056 = vst.msk [vmem:[%s3160_s14 + $0x48] sm:$0xff] %vm293_vm0, %v1027_v44 }
 0x34d   : > { %1198 = vst [vmem:[%s3217_s20 + $0x28] sm:$0xff] %v1151_v60 }
 0x34e   : > { %1724 = vmatmul.msk.f32.gmra.mxu3 %vm293_vm0, %v2004_v43 }
 0x351   : > { %v964_v0 = vpop.f32.mrf.mxu3 }
 0x352   : > { %v1030_v11 = vadd.f32 %v1029_v48, %v964_v0 }
 0x353   : > { %v1154_v17 = vpop.f32.mrf.mxu1 }
 0x354   : > { %1057 = vst.msk [vmem:[%s3160_s14 + $0x50] sm:$0xff] %vm293_vm0, %v1030_v11 }
 0x355   : > { %1200 = vst [vmem:[%s3217_s20 + $0x38] sm:$0xff] %v1154_v17 }
 0x356   : > { %1725 = vmatmul.msk.f32.gmra.mxu3 %vm293_vm0, %v2005_v37 }
 0x359   : > { %v967_v27 = vpop.f32.mrf.mxu3 }
 0x35a   : > { %v1033_v24 = vadd.f32 %v1032_v45, %v967_v27 }
 0x35b   : > { %v1157_v20 = vpop.f32.mrf.mxu1 }
 0x35c   : > { %1058 = vst.msk [vmem:[%s3160_s14 + $0x58] sm:$0xff] %vm293_vm0, %v1033_v24 }
 0x35d   : > { %1202 = vst [vmem:[%s3217_s20 + $0x48] sm:$0xff] %v1157_v20 }
 0x35e   : > { %1726 = vmatmul.msk.f32.gmra.mxu3 %vm293_vm0, %v2006_v14 }
 0x361   : > { %v970_v10 = vpop.f32.mrf.mxu3 }
 0x362   : > { %v1036_v38 = vadd.f32 %v1035_v54, %v970_v10 }
 0x363   : > { %v1160_v23 = vpop.f32.mrf.mxu1 }
 0x364   : > { %1059 = vst.msk [vmem:[%s3160_s14 + $0x60] sm:$0xff] %vm293_vm0, %v1036_v38 }
 0x365   : > { %1204 = vst [vmem:[%s3217_s20 + $0x58] sm:$0xff] %v1160_v23 }
 0x366   : > { %1727 = vmatmul.msk.f32.gmra.mxu3 %vm293_vm0, %v2007_v61 }
 0x369   : > { %v973_v59 = vpop.f32.mrf.mxu3 }
 0x36a   : > { %v1039_v35 = vadd.f32 %v1038_v22, %v973_v59 }
 0x36b   : > { %v1163_v21 = vpop.f32.mrf.mxu1 }
 0x36c   : > { %1060 = vst.msk [vmem:[%s3160_s14 + $0x68] sm:$0xff] %vm293_vm0, %v1039_v35 }
 0x36d   : > { %1206 = vst [vmem:[%s3217_s20 + $0x68] sm:$0xff] %v1163_v21 }
 0x36e   : > { %1728 = vmatmul.msk.f32.gmra.mxu3 %vm293_vm0, %v2008_v55 }
 0x371   : > { %v976_v39 = vpop.f32.mrf.mxu3 }
 0x372   : > { %v1042_v40 = vadd.f32 %v1041_v12, %v976_v39 }
 0x373   : > { %v1166_v26 = vpop.f32.mrf.mxu1 }
 0x374   : > { %1061 = vst.msk [vmem:[%s3160_s14 + $0x70] sm:$0xff] %vm293_vm0, %v1042_v40 }
 0x375   : > { %1208 = vst [vmem:[%s3217_s20 + $0x78] sm:$0xff] %v1166_v26 }
 0x376   : > { %1729 = vmatmul.msk.f32.gmra.mxu3 %vm293_vm0, %v2009_v36 }
 0x379   : > { %v979_v63 = vpop.f32.mrf.mxu3 }
 0x37a   : > { %v1045_v16 = vadd.f32 %v1044_v13, %v979_v63 }
 0x37b   : > { %v1169_v47 = vpop.f32.mrf.mxu1 }
 0x37c   : > { %1062 = vst.msk [vmem:[%s3160_s14 + $0x78] sm:$0xff] %vm293_vm0, %v1045_v16 }
 0x37d   : > { %1210 = vst [vmem:[%s3217_s20 + $0x88] sm:$0xff] %v1169_v47 }
 0x381   : > { %v1080_v3 = vpop.f32.mrf.mxu3 }
 0x382   : > { %1193 = vst [vmem:[%s3217_s20] sm:$0xff] %v1080_v3 }
 0x383   : > { %v1172_v31 = vpop.f32.mrf.mxu1 }
 0x384   : > { %1212 = vst [vmem:[%s3217_s20 + $0x98] sm:$0xff] %v1172_v31 }
 0x389   : > { %v1083_v41 = vpop.f32.mrf.mxu3 }
 0x38a   : > { %1195 = vst [vmem:[%s3217_s20 + $0x10] sm:$0xff] %v1083_v41 }
 0x38b   : > { %v1175_v32 = vpop.f32.mrf.mxu1 }
 0x38c   : > { %1214 = vst [vmem:[%s3217_s20 + $0xa8] sm:$0xff] %v1175_v32 }
 0x391   : > { %v1086_v62 = vpop.f32.mrf.mxu3 }
 0x392   : > { %1197 = vst [vmem:[%s3217_s20 + $0x20] sm:$0xff] %v1086_v62 }
 0x393   : > { %v1178_v34 = vpop.f32.mrf.mxu1 }
 0x394   : > { %1216 = vst [vmem:[%s3217_s20 + $0xb8] sm:$0xff] %v1178_v34 }
 0x399   : > { %v1089_v2 = vpop.f32.mrf.mxu3 }
 0x39a   : > { %1199 = vst [vmem:[%s3217_s20 + $0x30] sm:$0xff] %v1089_v2 }
 0x39b   : > { %v1181_v43 = vpop.f32.mrf.mxu1 }
 0x39c   : > { %1218 = vst [vmem:[%s3217_s20 + $0xc8] sm:$0xff] %v1181_v43 }
 0x3a1   : > { %v1092_v51 = vpop.f32.mrf.mxu3 }
 0x3a2   : > { %1201 = vst [vmem:[%s3217_s20 + $0x40] sm:$0xff] %v1092_v51 }
 0x3a3   : > { %v1184_v52 = vpop.f32.mrf.mxu1 }
 0x3a4   : > { %1220 = vst [vmem:[%s3217_s20 + $0xd8] sm:$0xff] %v1184_v52 }
 0x3a9   : > { %v1095_v49 = vpop.f32.mrf.mxu3 }
 0x3aa   : > { %1203 = vst [vmem:[%s3217_s20 + $0x50] sm:$0xff] %v1095_v49 }
 0x3ab   : > { %v1187_v37 = vpop.f32.mrf.mxu1 }
 0x3ac   : > { %1222 = vst [vmem:[%s3217_s20 + $0xe8] sm:$0xff] %v1187_v37 }
 0x3b1   : > { %v1098_v53 = vpop.f32.mrf.mxu3 }
 0x3b2   : > { %1205 = vst [vmem:[%s3217_s20 + $0x60] sm:$0xff] %v1098_v53 }
 0x3b3   : > { %v1190_v28 = vpop.f32.mrf.mxu1 }
 0x3b4   : > { %1224 = vst [vmem:[%s3217_s20 + $0xf8] sm:$0xff] %v1190_v28 }
 0x3b9   : > { %v1101_v33 = vpop.f32.mrf.mxu3 }
 0x3ba   : > { %1207 = vst [vmem:[%s3217_s20 + $0x70] sm:$0xff] %v1101_v33 }
 0x3c1   : > { %v1104_v1 = vpop.f32.mrf.mxu3 }
 0x3c2   : > { %1209 = vst [vmem:[%s3217_s20 + $0x80] sm:$0xff] %v1104_v1 }
 0x3c9   : > { %v1107_v6 = vpop.f32.mrf.mxu3 }
 0x3ca   : > { %1211 = vst [vmem:[%s3217_s20 + $0x90] sm:$0xff] %v1107_v6 }
 0x3d1   : > { %v1110_v46 = vpop.f32.mrf.mxu3 }
 0x3d2   : > { %1213 = vst [vmem:[%s3217_s20 + $0xa0] sm:$0xff] %v1110_v46 }
 0x3d9   : > { %v1113_v50 = vpop.f32.mrf.mxu3 }
 0x3da   : > { %1215 = vst [vmem:[%s3217_s20 + $0xb0] sm:$0xff] %v1113_v50 }
 0x3e1   : > { %v1116_v14 = vpop.f32.mrf.mxu3 }
 0x3e2   : > { %1217 = vst [vmem:[%s3217_s20 + $0xc0] sm:$0xff] %v1116_v14 }
 0x3e9   : > { %v1119_v4 = vpop.f32.mrf.mxu3 }
 0x3ea   : > { %1219 = vst [vmem:[%s3217_s20 + $0xd0] sm:$0xff] %v1119_v4 }
 0x3f1   : > { %v1122_v5 = vpop.f32.mrf.mxu3 }
 0x3f2   : > { %1221 = vst [vmem:[%s3217_s20 + $0xe0] sm:$0xff] %v1122_v5 }
 0x3f6   : > { %1240 = sbr.rel (!%p2250_p5) target bundleno = 1067 (0x42b), region = 32 }
 0x3f9   : > { %v1125_v9 = vpop.f32.mrf.mxu3 }
 0x3fa   : > { %1223 = vst [vmem:[%s3217_s20 + $0xf0] sm:$0xff] %v1125_v9 }
 0x3fb   : > { %s3560_s28 = smov (!%p1243_p11, %s1242_s28), 16 }
 0x3fc   : > { %s1765_s8 = sshll.u32 %s3560_s28, 3 }
 0x3fd   : > { %p1768_p12 = scmp.eq.s32.totalorder %s1765_s8, 0 }
 0x3fe   : > { %s3277_s9 = sshrl.u32 (!%p1768_p12), %s3560_s28, 4 }
 0x3ff   : > { %1251 = sbr.rel (%p1768_p12) target bundleno = 1067 (0x42b), region = 36  ;;  %p1769_p13 = scmp.le.s32.totalorder (!%p1768_p12), %s3277_s9, 0 }
 0x404   : > { %1548 = sbr.rel (%p1769_p13) target bundleno = 1050 (0x41a), region = 146  ;;  %s3545_s10 = smov (!%p1769_p13), %s3271_s7 }
 0x405   : > { %s3546_s13 = smov (!%p1769_p13), %s3160_s14  ;;  %s3286_s6 = smov (!%p1769_p13), 0  }
 0x406   : > { %s3288_s29 = smov (!%p1769_p13), 0  }
 0x409 LB: >> { %v1344_v61 = vld [vmem:[%s2155_s13] sm:$0xff]  ;;  %v1346_v29 = vld [vmem:[%s2155_s13 + $0x8] sm:$0xff]  ;;  %v1348_v7 = vld [vmem:[%s2155_s13 + $0x10] sm:$0xff]  ;;  %s1376_s30 = sadd.s32 1, %s2159_s6  ;;  %s1338_s29 = sadd.s32 1, %s2163_s29   ;;  %s2163_s29 = sphi %s3288_s29, %s1338_s29   ;;  %s2159_s6 = sphi %s3286_s6, %s3549_s6   ;;  %s2155_s13 = sphi %s3546_s13, %s3548_s13   ;;  %s2151_s10 = sphi %s3545_s10, %s3547_s10  }
 0x40a   : >> { %1345 = vst [vmem:[%s2151_s10] sm:$0xff] %v1344_v61  ;;  %v1350_v8 = vld [vmem:[%s2155_s13 + $0x18] sm:$0xff]  ;;  %p1377_p0 = scmp.ge.s32.totalorder %s1376_s30, %s3277_s9  ;;  %v1352_v55 = vld [vmem:[%s2155_s13 + $0x20] sm:$0xff]  ;;  %v1354_v56 = vld [vmem:[%s2155_s13 + $0x28] sm:$0xff]  ;;  %p1337_p1 = scmp.ge.s32.totalorder %s1338_s29, %s3277_s9 }
 0x40b   : >> { %1347 = vst [vmem:[%s2151_s10 + $0x8] sm:$0xff] %v1346_v29  ;;  %v1356_v42 = vld [vmem:[%s2155_s13 + $0x30] sm:$0xff]  ;;  %v1358_v30 = vld [vmem:[%s2155_s13 + $0x38] sm:$0xff]  ;;  %v1360_v36 = vld [vmem:[%s2155_s13 + $0x40] sm:$0xff] }
 0x40c   : >> { %1349 = vst [vmem:[%s2151_s10 + $0x10] sm:$0xff] %v1348_v7  ;;  %s3562_s30 = smov (%p1377_p0, %s1376_s30), 0  ;;  %v1362_v18 = vld [vmem:[%s2155_s13 + $0x48] sm:$0xff]  ;;  %v1364_v25 = vld [vmem:[%s2155_s13 + $0x50] sm:$0xff]  ;;  %v1366_v19 = vld [vmem:[%s2155_s13 + $0x58] sm:$0xff] }
 0x40d   : >> { %1351 = vst [vmem:[%s2151_s10 + $0x18] sm:$0xff] %v1350_v8  ;;  %s1770_s5 = sshll.u32 %s3562_s30, 7  ;;  %v1368_v48 = vld [vmem:[%s2155_s13 + $0x60] sm:$0xff]  ;;  %v1370_v15 = vld [vmem:[%s2155_s13 + $0x68] sm:$0xff]  ;;  %v1372_v44 = vld [vmem:[%s2155_s13 + $0x70] sm:$0xff] }
 0x40e   : >> { %1353 = vst [vmem:[%s2151_s10 + $0x20] sm:$0xff] %v1352_v55  ;;  %s1381_s8 = scalar_lea.vmem %s3160_s14, %s1770_s5 [#allocation2]   ;;  %s1382_s6 = scalar_lea.vmem %s3271_s7, %s1770_s5   ;;  %v1374_v45 = vld [vmem:[%s2155_s13 + $0x78] sm:$0xff] }
 0x40f   : >> { %1355 = vst [vmem:[%s2151_s10 + $0x28] sm:$0xff] %v1354_v56  ;;  %s3548_s13 = smov %s1381_s8 }
 0x410   : >> { %1357 = vst [vmem:[%s2151_s10 + $0x30] sm:$0xff] %v1356_v42 }
 0x411   : >> { %1359 = vst [vmem:[%s2151_s10 + $0x38] sm:$0xff] %v1358_v30 }
 0x412   : >> { %1361 = vst [vmem:[%s2151_s10 + $0x40] sm:$0xff] %v1360_v36 }
 0x413   : >> { %1363 = vst [vmem:[%s2151_s10 + $0x48] sm:$0xff] %v1362_v18 }
 0x414   : >> { %1365 = vst [vmem:[%s2151_s10 + $0x50] sm:$0xff] %v1364_v25 }
 0x415   : >> { %1367 = vst [vmem:[%s2151_s10 + $0x58] sm:$0xff] %v1366_v19  ;;  %1340 = sbr.rel (!%p1337_p1) target bundleno = 1033 (0x409), region = 152 }
 0x416   : >> { %1369 = vst [vmem:[%s2151_s10 + $0x60] sm:$0xff] %v1368_v48 }
 0x417   : >> { %1371 = vst [vmem:[%s2151_s10 + $0x68] sm:$0xff] %v1370_v15 }
 0x418   : >> { %1373 = vst [vmem:[%s2151_s10 + $0x70] sm:$0xff] %v1372_v44 }
 0x419   : >> { %1375 = vst [vmem:[%s2151_s10 + $0x78] sm:$0xff] %v1374_v45  ;;  %s3547_s10 = smov %s1382_s6  ;;  %s3549_s6 = smov %s3562_s30 }
 0x41a PF: > { %s3350_s5 = sand.u32 15, %s3560_s28   ;;  %s1789_s23 = sshll.u32 %s3277_s9, 7 }
 0x41b   : > { %s1387_s22 = scalar_lea.vmem %s3160_s14, %s1789_s23 [#allocation2]   ;;  %s1389_s12 = scalar_lea.vmem %s3271_s7, %s1789_s23  }
 0x41c   : > { %p1775_p2 = scmp.le.s32.totalorder %s3350_s5, 0 }
 0x41d   : > { %s2165_s0 = smov (!%p1775_p2), %s1389_s12   ;;  %s2169_s8 = smov (!%p1775_p2), %s1387_s22  }
 0x41e   : > { %1562 = sbr.rel (%p1775_p2) target bundleno = 1067 (0x42b), region = 157  ;;  %s2173_s1 = smov (!%p1775_p2), 0  }
 0x41f   : > { %s2177_s30 = smov (!%p1775_p2), 0  }
 0x423 LB: >> { %v1399_v0 = vld [vmem:[%s2171_s8] sm:$0xff]  ;;  %s1401_s28 = sadd.s32 1, %s2175_s1  ;;  %s1393_s30 = sadd.s32 1, %s2179_s30   ;;  %s2179_s30 = sphi %s2177_s30, %s1393_s30   ;;  %s2175_s1 = sphi %s2173_s1, %s2174_s1   ;;  %s2171_s8 = sphi %s2169_s8, %s1406_s8   ;;  %s2167_s0 = sphi %s2165_s0, %s1407_s0  }
 0x424   : >> { %1400 = vst [vmem:[%s2167_s0] sm:$0xff] %v1399_v0  ;;  %p1402_p3 = scmp.ge.s32.totalorder %s1401_s28, %s3350_s5  ;;  %p1392_p4 = scmp.ge.s32.totalorder %s1393_s30, %s3350_s5 }
 0x426   : >> { %s3564_s28 = smov (%p1402_p3, %s1401_s28), 0  ;;  %1395 = sbr.rel (!%p1392_p4) target bundleno = 1059 (0x423), region = 163 }
 0x427   : >> { %s1776_s14 = sshll.u32 %s3564_s28, 3  ;;  %s2174_s1 = smov %s3564_s28  }
 0x428   : >> { %s1406_s8 = scalar_lea.vmem %s1387_s22, %s1776_s14 [#allocation2]   ;;  %s1407_s0 = scalar_lea.vmem %s1389_s12, %s1776_s14  }
 0x42b PF: > { %s1416_s7 = scalar_lea.hbm %s3440_s3, %s2233_s19  ;;  %s3550_s9 = scalar_lea.vmem [#allocation3], %s3075_s11 }
 0x42c   : > { %s1418_s10 = sshll.u32 %s3550_s9, 4  ;;  %s1420_s13 = sshll.u32 %s1416_s7, 4  ;;  %s1419_s10 = int_to_ptr.vmem [resolvable:$true] %s1418_s10  ;;  %s1421_s13 = int_to_ptr.hbm [resolvable:$true] %s1420_s13 }
 0x42d   : > { %s2024_s0 = sshra.s32 %s1421_s13, 4  ;;  %s2030_s6 = scalar_lea.hbm %s3440_s3, 3  ;;  %s2025_s0 = int_to_ptr.hbm [resolvable:$true] %s2024_s0 }
 0x42e   : > { %s2026_s29 = scalar_lea.hbm %s2025_s0, 1  ;;  %p2031_p10 = scmp.lt.s32.totalorder %s2025_s0, %s3440_s3 }
 0x42f   : > { %p2027_p7 = scmp.ne.s32.totalorder %s2025_s0, %s2026_s29  ;;  %p2032_p11 = scmp.lt.s32.totalorder %s2030_s6, %s2026_s29 }
 0x431   : > { %p2028_p8 = pnand %p2027_p7, %p2250_p5  ;;  %p2033_p12 = por %p2032_p11, %p2031_p10 }
 0x433   : > { %p2029_p9 = pneg %p2028_p8 }
 0x435   : > { %p2034_p13 = pnand %p2033_p12, %p2029_p9 }
 0x437   : > { %2037 = shalt.err (!%p2034_p13)
}
 0x438   : > { %s3551_s30 = scalar_lea.sflag [#allocation4], %s3075_s11  ;;  %1426 = sbr.rel (!%p2250_p5) target bundleno = 1117 (0x45d), region = 88 }
 0x439   : > { %1883 = dma.vmem_to_hbm [thread:$0]  (%p2250_p5), %s1419_s10, 16, %s1421_s13, %s3551_s30  }
 0x43a   : > { %s1428_s28 = ssub.s32 (%p2250_p5), 40, %s2261_s27  ;;  %s3552_s7 = scalar_lea.sflag (%p2250_p5), [#allocation6], %s3075_s11 }
 0x43b   : > { %p1429_p0 = scmp.lt.s32.totalorder (%p2250_p5), %s1428_s28, 16 }
 0x43d   : > { %s3566_s28 = smov (!%p1429_p0, %s1428_s28), 16 }
 0x43e   : > { %s1791_s14 = sshll.u32 %s3566_s28, 4 }
 0x43f   : > { %s1433_s23 = ssub.s32 256, %s1791_s14 }
 0x440   : > { %s1434_s1 = sshll.u32 %s1433_s23, 4 }
 0x441   : > { %1435 = vsyncadd %s3552_s7, %s1434_s1  ;;  %p3384_p1 = scmp.ne.s32.totalorder %s1791_s14, 0  ;;  %s1793_s25 = sshll.u32 %s2233_s19, 8 }
 0x442   : > { %s1439_s13 = scalar_lea.hbm %s3441_s4, %s1793_s25  ;;  %s1441_s0 = sshll.u32 %s3217_s20, 4  ;;  %s3393_s0 = int_to_ptr.vmem [resolvable:$true] %s1441_s0 }
 0x443   : > { %s1443_s29 = sshll.u32 %s1439_s13, 4  ;;  %s1785_s12 = sshll.u32 %s3566_s28, 8  ;;  %s3395_s29 = int_to_ptr.hbm [resolvable:$true] %s1443_s29 }
 0x444   : > { %s2038_s22 = sshra.s32 %s3393_s0, 4  ;;  %s2040_s6 = sshrl.u32 %s1785_s12, 4  ;;  %s2039_s22 = int_to_ptr.vmem [resolvable:$true] %s2038_s22 }
 0x445   : > { %s2045_s5 = scalar_lea.vmem %s2039_s22, %s2040_s6  ;;  %s2183_s19 = smov [#allocation5]  }
 0x446   : > { %p2046_p5 = scmp.ne.s32.totalorder %s2039_s22, %s2045_s5  ;;  %s2049_s8 = scalar_lea.vmem %s2183_s19, 512 }
 0x447   : > { %p2051_p4 = scmp.lt.s32.totalorder %s2049_s8, %s2045_s5 }
 0x448   : > { %p2047_p2 = pnand %p2046_p5, %p3384_p1 }
 0x44a   : > { %p2048_p3 = pneg %p2047_p2 }
 0x44c   : > { %p2053_p7 = pnand %p2051_p4, %p2048_p3 }
 0x44e   : > { %2056 = shalt.err (!%p2053_p7)
}
 0x44f   : > { %s2057_s20 = sshra.s32 %s3395_s29, 4  ;;  %s2068_s1 = scalar_lea.hbm %s3441_s4, 640  ;;  %s2058_s20 = int_to_ptr.hbm [resolvable:$true] %s2057_s20 }
 0x450   : > { %s2064_s30 = scalar_lea.hbm %s2058_s20, %s2040_s6  ;;  %p2069_p11 = scmp.lt.s32.totalorder %s2058_s20, %s3441_s4 }
 0x451   : > { %p2065_p8 = scmp.ne.s32.totalorder %s2058_s20, %s2064_s30  ;;  %p2070_p12 = scmp.lt.s32.totalorder %s2068_s1, %s2064_s30 }
 0x453   : > { %p2066_p9 = pnand %p2065_p8, %p3384_p1  ;;  %p2071_p13 = por %p2070_p12, %p2069_p11 }
 0x455   : > { %p2067_p10 = pneg %p2066_p9 }
 0x457   : > { %p2072_p0 = pnand %p2071_p13, %p2067_p10 }
 0x459   : > { %2075 = shalt.err (!%p2072_p0)
}
 0x45a   : > { %s2184_s27 = smov 256   ;;  %s2185_s10 = smov 16  }
 0x45b   : > { %s3554_s13 = scalar_lea.sflag [#allocation6], %s3075_s11 }
 0x45c   : > { %1449 = dma.vmem_to_hbm [thread:$0]  (%p3384_p1), %s3393_s0, %s1785_s12, %s3395_s29, %s3554_s13, %s2184_s27, %s2184_s27, %s2185_s10  }
 0x45d PF: > { %p1893_p5 = scmp.ge.s32.totalorder %s2147_s18, 2  ;;  %s1465_s22 = sand.u32 1, %s2135_s15  }
 0x45e   : > { %s1466_s6 = scalar_lea.sflag [#allocation4], %s1465_s22 }
 0x45f   : > { %p1887_p2 = pnand %p1893_p5, %p2254_p6 }
 0x461   : > { %p1888_p3 = pneg %p1887_p2 }
 0x463   : > { %2126 = dma.done.wait (%p1888_p3), %s1466_s6, 16  }
 0x464   : > { %2128 = vsyncadd (%p1888_p3), %s1466_s6, 4294967280  ;;  %s1475_s5 = scalar_lea.sflag [#allocation6], %s1465_s22 }
 0x465   : > { %2130 = dma.done.wait (%p1888_p3), %s1475_s5, 4096  }
 0x466   : > { %2132 = vsyncadd (%p1888_p3), %s1475_s5, 4294963200  ;;  %p18_p1 = scmp.ge.s32.totalorder %s2237_s21, 5   ;;  %s3555_s15 = smov %s2139_s16 }
 0x467   : > { %s3556_s16 = smov %s2143_s17  ;;  %s3557_s17 = smov %s2248_s24 }
 0x468   : > { %s3558_s18 = smov %s2237_s21  ;;  %20 = sbr.rel (!%p18_p1) target bundleno = 8 (0x8), region = 174 }
 0x46d   :  { %1481 = vsyncpa [#allocation4], 1 }
 0x46e   :  { %1483 = vsyncpa [#allocation4 + $0x1], 1 }
 0x46f   :  { %1484 = vsyncpa [#allocation6], 1 }
 0x470   :  { %1486 = vsyncpa [#allocation6 + $0x1], 1 }

</bundles_post_ra>
